<compile_context>
chip_gen: v5e
topology: v5e:2x2
jax: 0.10.0
libtpu: 0.0.40
codegen_flags: <defaults>
</compile_context>

<pallas_src>
import functools

import jax
import jax.numpy as jnp
import numpy as np
from jax.experimental import pallas as pl
from jax.experimental.pallas import tpu as pltpu


def _round_up(x, m):
    return (x + m - 1) // m * m


def _fused_kernel(x_ref, w1_ref, b1_ref, w2_ref, b2_ref, s1_ref, s2_ref,
                  o_ref, c1_ref, x2_ref, c2_ref, *, H, W):
    # x_ref : (1, (H+3)*(W+2), Cp)  f32  zero-padded, row-flattened NHWC input
    # w1_ref: (9, Cp, C1)           bf16 conv1 taps (t = dh*3+dw)
    # b1_ref: (1, C1)               f32
    # w2_ref: (9, C1, C2)           bf16 conv2 taps
    # b2_ref: (1, C2)               f32
    # s1_ref: (Q1, L1)              bf16 0/1 selection: pooled1 -> stage-2 padded grid
    # s2_ref: (Hq*Wq, L2)           bf16 0/1 selection: pooled2 -> compact output rows
    # o_ref : (1, Hq*Wq, C2)        f32
    # c1_ref/x2_ref/c2_ref: VMEM f32 scratch for conv1 / stage-2 input / conv2.
    C1 = w1_ref.shape[2]
    C2 = w2_ref.shape[2]
    Wp1 = W + 2
    M1 = H * Wp1
    Hh, Wh = H // 2, W // 2
    Wp2 = Wh + 2
    M2 = Hh * Wp2
    L1 = M1 - Wp1 - 1
    L2 = M2 - Wp2 - 1

    # ---- stage 1: conv 3x3 (pad 1) as 9 shifted-window matmuls, f32 accumulation ----
    acc1 = jnp.zeros((M1, C1), jnp.float32)
    for t in range(9):
        off = (t // 3) * Wp1 + (t % 3)
        acc1 = acc1 + jnp.dot(
            x_ref[0, off:off + M1, :].astype(jnp.bfloat16),
            w1_ref[t],
            preferred_element_type=jnp.float32)
    c1_ref[...] = acc1                                   # stage in VMEM scratch

    # ---- stage 1: 2x2 max-pool (4 shifted windows) + bias + ReLU ----
    vm1 = jnp.maximum(
        jnp.maximum(c1_ref[0:L1, :], c1_ref[1:L1 + 1, :]),
        jnp.maximum(c1_ref[Wp1:Wp1 + L1, :], c1_ref[Wp1 + 1:Wp1 + 1 + L1, :]))
    act1 = jnp.maximum(vm1 + b1_ref[...], 0.0).astype(jnp.bfloat16)   # (L1, C1)

    # ---- re-layout pooled map into stage-2 zero-padded flat grid (selection matmul) --
    x2_ref[...] = jnp.dot(s1_ref[...], act1, preferred_element_type=jnp.float32)

    # ---- stage 2: conv 3x3 (pad 1) ----
    acc2 = jnp.zeros((M2, C2), jnp.float32)
    for t in range(9):
        off = (t // 3) * Wp2 + (t % 3)
        acc2 = acc2 + jnp.dot(
            x2_ref[off:off + M2, :].astype(jnp.bfloat16),
            w2_ref[t],
            preferred_element_type=jnp.float32)
    c2_ref[...] = acc2

    # ---- stage 2: 2x2 max-pool + bias + ReLU ----
    vm2 = jnp.maximum(
        jnp.maximum(c2_ref[0:L2, :], c2_ref[1:L2 + 1, :]),
        jnp.maximum(c2_ref[Wp2:Wp2 + L2, :], c2_ref[Wp2 + 1:Wp2 + 1 + L2, :]))
    act2 = jnp.maximum(vm2 + b2_ref[...], 0.0).astype(jnp.bfloat16)   # (L2, C2)

    # ---- compact the final pooled rows and store (lane-dense f32 output) ----
    o_ref[0] = jnp.dot(s2_ref[...], act2, preferred_element_type=jnp.float32)


def prepare_params(params):
    """One-time parameter packing (hoisted out of the per-forward path)."""
    w1 = jnp.asarray(params["w1"], jnp.float32)      # (3,3,Cin,C1) HWIO
    b1 = jnp.asarray(params["b1"], jnp.float32)
    w2 = jnp.asarray(params["w2"], jnp.float32)      # (3,3,C1,C2) HWIO
    b2 = jnp.asarray(params["b2"], jnp.float32)
    kh, kw, cin, c1 = w1.shape
    assert (kh, kw) == (3, 3) and w2.shape[:2] == (3, 3) and w2.shape[2] == c1
    c2 = w2.shape[3]
    cin_p = _round_up(cin, 8)
    w1p = jnp.pad(w1, ((0, 0), (0, 0), (0, cin_p - cin), (0, 0)))
    return {
        "w1": w1p.reshape(9, cin_p, c1).astype(jnp.bfloat16),
        "b1": b1.reshape(1, c1),
        "w2": w2.reshape(9, c1, c2).astype(jnp.bfloat16),
        "b2": b2.reshape(1, c2),
    }


def alexnet_down_cifar(x_nchw, prep):
    """Forward pass of AlexNetDownCifar; input/output are NCHW like PyTorch."""
    N, Cin, H, W = x_nchw.shape
    assert H % 4 == 0 and W % 4 == 0, "kernel assumes H, W divisible by 4"
    w1p, b1p, w2p, b2p = prep["w1"], prep["b1"], prep["w2"], prep["b2"]
    Cp, C1 = w1p.shape[1], w1p.shape[2]
    C2 = w2p.shape[2]
    assert Cp >= Cin and w2p.shape[1] == C1

    Wp1 = W + 2
    Hh, Wh = H // 2, W // 2
    Wp2 = Wh + 2
    Hq, Wq = Hh // 2, Wh // 2
    M1 = H * Wp1
    M2 = Hh * Wp2
    L1 = M1 - Wp1 - 1
    L2 = M2 - Wp2 - 1
    R1 = (H + 3) * Wp1
    Q1 = _round_up(M2 + 2 * Wp2 + 2, 8)

    # Input: NCHW -> zero-padded (spatial 1 top/left/right, 2 bottom; channels to Cp),
    # row-flattened NHWC (f32; the kernel casts tap windows to bf16).
    x = jnp.transpose(x_nchw, (0, 2, 3, 1)).astype(jnp.float32)
    x = jnp.pad(x, ((0, 0), (1, 2), (1, 1), (0, Cp - Cin)))
    x = x.reshape(N, R1, Cp)

    # Constant 0/1 selection matrices (numpy -> compile-time constants).
    s1 = np.zeros((Q1, L1), np.float32)
    for i2 in range(Hh):
        for j2 in range(Wh):
            s1[(i2 + 1) * Wp2 + (j2 + 1), 2 * i2 * Wp1 + 2 * j2] = 1.0
    s2 = np.zeros((Hq * Wq, L2), np.float32)
    for i3 in range(Hq):
        for j3 in range(Wq):
            s2[i3 * Wq + j3, 2 * i3 * Wp2 + 2 * j3] = 1.0
    s1 = jnp.asarray(s1, jnp.bfloat16)
    s2 = jnp.asarray(s2, jnp.bfloat16)

    kernel = functools.partial(_fused_kernel, H=H, W=W)
    out = pl.pallas_call(
        kernel,
        out_shape=jax.ShapeDtypeStruct((N, Hq * Wq, C2), jnp.float32),
        grid_spec=pltpu.PrefetchScalarGridSpec(
            num_scalar_prefetch=0,
            grid=(N,),
            in_specs=[
                pl.BlockSpec((1, R1, Cp), lambda n: (n, 0, 0)),     # input image n
                pl.BlockSpec((9, Cp, C1), lambda n: (0, 0, 0)),     # w1 (grid-invariant)
                pl.BlockSpec((1, C1), lambda n: (0, 0)),            # b1
                pl.BlockSpec((9, C1, C2), lambda n: (0, 0, 0)),     # w2
                pl.BlockSpec((1, C2), lambda n: (0, 0)),            # b2
                pl.BlockSpec((Q1, L1), lambda n: (0, 0)),           # S1
                pl.BlockSpec((Hq * Wq, L2), lambda n: (0, 0)),      # S2
            ],
            out_specs=pl.BlockSpec((1, Hq * Wq, C2), lambda n: (n, 0, 0)),
            scratch_shapes=[
                pltpu.VMEM((M1, C1), jnp.float32),   # conv1 result
                pltpu.VMEM((Q1, C1), jnp.float32),   # stage-2 padded flat input
                pltpu.VMEM((M2, C2), jnp.float32),   # conv2 result
            ],
        ),
        compiler_params=pltpu.CompilerParams(
            dimension_semantics=("parallel",)),
    )(x, w1p, b1p, w2p, b2p, s1, s2)

    return jnp.transpose(out.reshape(N, Hq, Wq, C2), (0, 3, 1, 2))   # NHWC -> NCHW


def _reference(x_nchw, params):
    """Plain-JAX reference (XLA conv / reduce_window) for the correctness check."""
    def stage(x, w_hwio, b):
        y = jax.lax.conv_general_dilated(
            x, w_hwio, window_strides=(1, 1), padding=((1, 1), (1, 1)),
            dimension_numbers=("NCHW", "HWIO", "NCHW"),
            precision=jax.lax.Precision.HIGHEST)
        y = y + b[None, :, None, None]
        y = jax.lax.reduce_window(y, -jnp.inf, jax.lax.max,
                                  (1, 1, 2, 2), (1, 1, 2, 2), "VALID")
        return jnp.maximum(y, 0.0)
    x = stage(x_nchw, params["w1"], params["b1"])
    x = stage(x, params["w2"], params["b2"])
    return x


if __name__ == "__main__":
    key = jax.random.PRNGKey(0)
    k1, k2, k3, k4, kx = jax.random.split(key, 5)

    # Deterministic synthetic parameters (HWIO layout for conv weights).
    params = {
        "w1": jax.random.normal(k1, (3, 3, 3, 32), jnp.float32) * 0.1,
        "b1": jax.random.normal(k2, (32,), jnp.float32) * 0.1,
        "w2": jax.random.normal(k3, (3, 3, 32, 64), jnp.float32) * 0.05,
        "b2": jax.random.normal(k4, (64,), jnp.float32) * 0.1,
    }

    # Small CIFAR-like input: batch=2, channels=3, spatial=16x16 (NCHW).
    x = jax.random.normal(kx, (2, 3, 16, 16), jnp.float32)

    prep = prepare_params(params)                      # one-time weight packing
    fwd = jax.jit(alexnet_down_cifar)

    out = jax.block_until_ready(fwd(x, prep))
    assert out.shape == (2, 64, 4, 4), out.shape

    ref = jax.block_until_ready(_reference(x, params))
    # bf16 MXU inputs with f32 accumulation -> slightly loose tolerance (intentional).
    max_err = float(jnp.max(jnp.abs(out - ref)))
    assert jnp.allclose(out, ref, rtol=2e-2, atol=2e-2), max_err

    print("KERNEL_OK")
</pallas_src>

<mosaic_0001>
module attributes {stable_mosaic.version = 11 : i64} {
  func.func @_fused_kernel(%arg0: i32, %arg1: memref<1x342x8xf32, #tpu.memory_space<vmem>>, %arg2: memref<9x8x32xbf16, #tpu.memory_space<vmem>>, %arg3: memref<1x32xf32, #tpu.memory_space<vmem>>, %arg4: memref<9x32x64xbf16, #tpu.memory_space<vmem>>, %arg5: memref<1x64xf32, #tpu.memory_space<vmem>>, %arg6: memref<104x269xbf16, #tpu.memory_space<vmem>>, %arg7: memref<16x69xbf16, #tpu.memory_space<vmem>>, %arg8: memref<1x16x64xf32, #tpu.memory_space<vmem>>, %arg9: memref<288x32xf32, #tpu.memory_space<vmem>>, %arg10: memref<104x32xf32, #tpu.memory_space<vmem>>, %arg11: memref<80x64xf32, #tpu.memory_space<vmem>>) attributes {dimension_semantics = [#tpu.dimension_semantics<parallel>], iteration_bounds = array<i64: 2>, scalar_prefetch = 0 : i64, scratch_operands = 3 : i64, tpu.core_type = #tpu.core_type<tc>, window_params = [{transform_indices = @transform_0, window_bounds = array<i64: 1, 342, 8>}, {pipeline_mode = #tpu.pipeline_mode<synchronous>, transform_indices = @transform_1, window_bounds = array<i64: 9, 8, 32>}, {pipeline_mode = #tpu.pipeline_mode<synchronous>, transform_indices = @transform_2, window_bounds = array<i64: 1, 32>}, {pipeline_mode = #tpu.pipeline_mode<synchronous>, transform_indices = @transform_3, window_bounds = array<i64: 9, 32, 64>}, {pipeline_mode = #tpu.pipeline_mode<synchronous>, transform_indices = @transform_4, window_bounds = array<i64: 1, 64>}, {pipeline_mode = #tpu.pipeline_mode<synchronous>, transform_indices = @transform_5, window_bounds = array<i64: 104, 269>}, {pipeline_mode = #tpu.pipeline_mode<synchronous>, transform_indices = @transform_6, window_bounds = array<i64: 16, 69>}, {transform_indices = @transform_7, window_bounds = array<i64: 1, 16, 64>}]} {
    %cst = arith.constant 0.000000e+00 : f32
    %0 = vector.broadcast %cst : f32 to vector<288x32xf32>
    %c0 = arith.constant 0 : index
    %c0_0 = arith.constant 0 : index
    %c0_1 = arith.constant 0 : index
    %1 = vector.load %arg1[%c0, %c0_0, %c0_1] : memref<1x342x8xf32, #tpu.memory_space<vmem>>, vector<1x288x8xf32>
    %2 = vector.shape_cast %1 : vector<1x288x8xf32> to vector<288x8xf32>
    %3 = arith.truncf %2 : vector<288x8xf32> to vector<288x8xbf16>
    %c0_2 = arith.constant 0 : index
    %c0_3 = arith.constant 0 : index
    %c0_4 = arith.constant 0 : index
    %4 = vector.load %arg2[%c0_2, %c0_3, %c0_4] : memref<9x8x32xbf16, #tpu.memory_space<vmem>>, vector<1x8x32xbf16>
    %5 = vector.shape_cast %4 : vector<1x8x32xbf16> to vector<8x32xbf16>
    %cst_5 = arith.constant dense<0.000000e+00> : vector<288x32xf32>
    %6 = tpu.matmul %3, %5, %cst_5 {dimension_numbers = #tpu.dot_dimension_numbers<[1], [0], [0], [1], [0, 0, 1, 1], [], []>} : vector<288x8xbf16>, vector<8x32xbf16>, vector<288x32xf32> -> vector<288x32xf32>
    %7 = arith.addf %0, %6 : vector<288x32xf32>
    %c0_6 = arith.constant 0 : index
    %c1 = arith.constant 1 : index
    %c0_7 = arith.constant 0 : index
    %8 = vector.load %arg1[%c0_6, %c1, %c0_7] : memref<1x342x8xf32, #tpu.memory_space<vmem>>, vector<1x288x8xf32>
    %9 = vector.shape_cast %8 : vector<1x288x8xf32> to vector<288x8xf32>
    %10 = arith.truncf %9 : vector<288x8xf32> to vector<288x8xbf16>
    %c1_8 = arith.constant 1 : index
    %c0_9 = arith.constant 0 : index
    %c0_10 = arith.constant 0 : index
    %11 = vector.load %arg2[%c1_8, %c0_9, %c0_10] : memref<9x8x32xbf16, #tpu.memory_space<vmem>>, vector<1x8x32xbf16>
    %12 = vector.shape_cast %11 : vector<1x8x32xbf16> to vector<8x32xbf16>
    %cst_11 = arith.constant dense<0.000000e+00> : vector<288x32xf32>
    %13 = tpu.matmul %10, %12, %cst_11 {dimension_numbers = #tpu.dot_dimension_numbers<[1], [0], [0], [1], [0, 0, 1, 1], [], []>} : vector<288x8xbf16>, vector<8x32xbf16>, vector<288x32xf32> -> vector<288x32xf32>
    %14 = arith.addf %7, %13 : vector<288x32xf32>
    %c0_12 = arith.constant 0 : index
    %c2 = arith.constant 2 : index
    %c0_13 = arith.constant 0 : index
    %15 = vector.load %arg1[%c0_12, %c2, %c0_13] : memref<1x342x8xf32, #tpu.memory_space<vmem>>, vector<1x288x8xf32>
    %16 = vector.shape_cast %15 : vector<1x288x8xf32> to vector<288x8xf32>
    %17 = arith.truncf %16 : vector<288x8xf32> to vector<288x8xbf16>
    %c2_14 = arith.constant 2 : index
    %c0_15 = arith.constant 0 : index
    %c0_16 = arith.constant 0 : index
    %18 = vector.load %arg2[%c2_14, %c0_15, %c0_16] : memref<9x8x32xbf16, #tpu.memory_space<vmem>>, vector<1x8x32xbf16>
    %19 = vector.shape_cast %18 : vector<1x8x32xbf16> to vector<8x32xbf16>
    %cst_17 = arith.constant dense<0.000000e+00> : vector<288x32xf32>
    %20 = tpu.matmul %17, %19, %cst_17 {dimension_numbers = #tpu.dot_dimension_numbers<[1], [0], [0], [1], [0, 0, 1, 1], [], []>} : vector<288x8xbf16>, vector<8x32xbf16>, vector<288x32xf32> -> vector<288x32xf32>
    %21 = arith.addf %14, %20 : vector<288x32xf32>
    %c0_18 = arith.constant 0 : index
    %c18 = arith.constant 18 : index
    %c0_19 = arith.constant 0 : index
    %22 = vector.load %arg1[%c0_18, %c18, %c0_19] : memref<1x342x8xf32, #tpu.memory_space<vmem>>, vector<1x288x8xf32>
    %23 = vector.shape_cast %22 : vector<1x288x8xf32> to vector<288x8xf32>
    %24 = arith.truncf %23 : vector<288x8xf32> to vector<288x8xbf16>
    %c3 = arith.constant 3 : index
    %c0_20 = arith.constant 0 : index
    %c0_21 = arith.constant 0 : index
    %25 = vector.load %arg2[%c3, %c0_20, %c0_21] : memref<9x8x32xbf16, #tpu.memory_space<vmem>>, vector<1x8x32xbf16>
    %26 = vector.shape_cast %25 : vector<1x8x32xbf16> to vector<8x32xbf16>
    %cst_22 = arith.constant dense<0.000000e+00> : vector<288x32xf32>
    %27 = tpu.matmul %24, %26, %cst_22 {dimension_numbers = #tpu.dot_dimension_numbers<[1], [0], [0], [1], [0, 0, 1, 1], [], []>} : vector<288x8xbf16>, vector<8x32xbf16>, vector<288x32xf32> -> vector<288x32xf32>
    %28 = arith.addf %21, %27 : vector<288x32xf32>
    %c0_23 = arith.constant 0 : index
    %c19 = arith.constant 19 : index
    %c0_24 = arith.constant 0 : index
    %29 = vector.load %arg1[%c0_23, %c19, %c0_24] : memref<1x342x8xf32, #tpu.memory_space<vmem>>, vector<1x288x8xf32>
    %30 = vector.shape_cast %29 : vector<1x288x8xf32> to vector<288x8xf32>
    %31 = arith.truncf %30 : vector<288x8xf32> to vector<288x8xbf16>
    %c4 = arith.constant 4 : index
    %c0_25 = arith.constant 0 : index
    %c0_26 = arith.constant 0 : index
    %32 = vector.load %arg2[%c4, %c0_25, %c0_26] : memref<9x8x32xbf16, #tpu.memory_space<vmem>>, vector<1x8x32xbf16>
    %33 = vector.shape_cast %32 : vector<1x8x32xbf16> to vector<8x32xbf16>
    %cst_27 = arith.constant dense<0.000000e+00> : vector<288x32xf32>
    %34 = tpu.matmul %31, %33, %cst_27 {dimension_numbers = #tpu.dot_dimension_numbers<[1], [0], [0], [1], [0, 0, 1, 1], [], []>} : vector<288x8xbf16>, vector<8x32xbf16>, vector<288x32xf32> -> vector<288x32xf32>
    %35 = arith.addf %28, %34 : vector<288x32xf32>
    %c0_28 = arith.constant 0 : index
    %c20 = arith.constant 20 : index
    %c0_29 = arith.constant 0 : index
    %36 = vector.load %arg1[%c0_28, %c20, %c0_29] : memref<1x342x8xf32, #tpu.memory_space<vmem>>, vector<1x288x8xf32>
    %37 = vector.shape_cast %36 : vector<1x288x8xf32> to vector<288x8xf32>
    %38 = arith.truncf %37 : vector<288x8xf32> to vector<288x8xbf16>
    %c5 = arith.constant 5 : index
    %c0_30 = arith.constant 0 : index
    %c0_31 = arith.constant 0 : index
    %39 = vector.load %arg2[%c5, %c0_30, %c0_31] : memref<9x8x32xbf16, #tpu.memory_space<vmem>>, vector<1x8x32xbf16>
    %40 = vector.shape_cast %39 : vector<1x8x32xbf16> to vector<8x32xbf16>
    %cst_32 = arith.constant dense<0.000000e+00> : vector<288x32xf32>
    %41 = tpu.matmul %38, %40, %cst_32 {dimension_numbers = #tpu.dot_dimension_numbers<[1], [0], [0], [1], [0, 0, 1, 1], [], []>} : vector<288x8xbf16>, vector<8x32xbf16>, vector<288x32xf32> -> vector<288x32xf32>
    %42 = arith.addf %35, %41 : vector<288x32xf32>
    %c0_33 = arith.constant 0 : index
    %c36 = arith.constant 36 : index
    %c0_34 = arith.constant 0 : index
    %43 = vector.load %arg1[%c0_33, %c36, %c0_34] : memref<1x342x8xf32, #tpu.memory_space<vmem>>, vector<1x288x8xf32>
    %44 = vector.shape_cast %43 : vector<1x288x8xf32> to vector<288x8xf32>
    %45 = arith.truncf %44 : vector<288x8xf32> to vector<288x8xbf16>
    %c6 = arith.constant 6 : index
    %c0_35 = arith.constant 0 : index
    %c0_36 = arith.constant 0 : index
    %46 = vector.load %arg2[%c6, %c0_35, %c0_36] : memref<9x8x32xbf16, #tpu.memory_space<vmem>>, vector<1x8x32xbf16>
    %47 = vector.shape_cast %46 : vector<1x8x32xbf16> to vector<8x32xbf16>
    %cst_37 = arith.constant dense<0.000000e+00> : vector<288x32xf32>
    %48 = tpu.matmul %45, %47, %cst_37 {dimension_numbers = #tpu.dot_dimension_numbers<[1], [0], [0], [1], [0, 0, 1, 1], [], []>} : vector<288x8xbf16>, vector<8x32xbf16>, vector<288x32xf32> -> vector<288x32xf32>
    %49 = arith.addf %42, %48 : vector<288x32xf32>
    %c0_38 = arith.constant 0 : index
    %c37 = arith.constant 37 : index
    %c0_39 = arith.constant 0 : index
    %50 = vector.load %arg1[%c0_38, %c37, %c0_39] : memref<1x342x8xf32, #tpu.memory_space<vmem>>, vector<1x288x8xf32>
    %51 = vector.shape_cast %50 : vector<1x288x8xf32> to vector<288x8xf32>
    %52 = arith.truncf %51 : vector<288x8xf32> to vector<288x8xbf16>
    %c7 = arith.constant 7 : index
    %c0_40 = arith.constant 0 : index
    %c0_41 = arith.constant 0 : index
    %53 = vector.load %arg2[%c7, %c0_40, %c0_41] : memref<9x8x32xbf16, #tpu.memory_space<vmem>>, vector<1x8x32xbf16>
    %54 = vector.shape_cast %53 : vector<1x8x32xbf16> to vector<8x32xbf16>
    %cst_42 = arith.constant dense<0.000000e+00> : vector<288x32xf32>
    %55 = tpu.matmul %52, %54, %cst_42 {dimension_numbers = #tpu.dot_dimension_numbers<[1], [0], [0], [1], [0, 0, 1, 1], [], []>} : vector<288x8xbf16>, vector<8x32xbf16>, vector<288x32xf32> -> vector<288x32xf32>
    %56 = arith.addf %49, %55 : vector<288x32xf32>
    %c0_43 = arith.constant 0 : index
    %c38 = arith.constant 38 : index
    %c0_44 = arith.constant 0 : index
    %57 = vector.load %arg1[%c0_43, %c38, %c0_44] : memref<1x342x8xf32, #tpu.memory_space<vmem>>, vector<1x288x8xf32>
    %58 = vector.shape_cast %57 : vector<1x288x8xf32> to vector<288x8xf32>
    %59 = arith.truncf %58 : vector<288x8xf32> to vector<288x8xbf16>
    %c8 = arith.constant 8 : index
    %c0_45 = arith.constant 0 : index
    %c0_46 = arith.constant 0 : index
    %60 = vector.load %arg2[%c8, %c0_45, %c0_46] : memref<9x8x32xbf16, #tpu.memory_space<vmem>>, vector<1x8x32xbf16>
    %61 = vector.shape_cast %60 : vector<1x8x32xbf16> to vector<8x32xbf16>
    %cst_47 = arith.constant dense<0.000000e+00> : vector<288x32xf32>
    %62 = tpu.matmul %59, %61, %cst_47 {dimension_numbers = #tpu.dot_dimension_numbers<[1], [0], [0], [1], [0, 0, 1, 1], [], []>} : vector<288x8xbf16>, vector<8x32xbf16>, vector<288x32xf32> -> vector<288x32xf32>
    %63 = arith.addf %56, %62 : vector<288x32xf32>
    %c0_48 = arith.constant 0 : index
    %c0_49 = arith.constant 0 : index
    %64 = vector.load %arg9[%c0_48, %c0_49] : memref<288x32xf32, #tpu.memory_space<vmem>>, vector<288x32xf32>
    tpu.vector_store %arg9[%c0_48, %c0_49], %63 {strides = array<i32>} : memref<288x32xf32, #tpu.memory_space<vmem>>, vector<288x32xf32>,
    %c0_50 = arith.constant 0 : index
    %c0_51 = arith.constant 0 : index
    %65 = vector.load %arg9[%c0_50, %c0_51] : memref<288x32xf32, #tpu.memory_space<vmem>>, vector<269x32xf32>
    %c1_52 = arith.constant 1 : index
    %c0_53 = arith.constant 0 : index
    %66 = vector.load %arg9[%c1_52, %c0_53] : memref<288x32xf32, #tpu.memory_space<vmem>>, vector<269x32xf32>
    %67 = arith.maximumf %65, %66 : vector<269x32xf32>
    %c18_54 = arith.constant 18 : index
    %c0_55 = arith.constant 0 : index
    %68 = vector.load %arg9[%c18_54, %c0_55] : memref<288x32xf32, #tpu.memory_space<vmem>>, vector<269x32xf32>
    %c19_56 = arith.constant 19 : index
    %c0_57 = arith.constant 0 : index
    %69 = vector.load %arg9[%c19_56, %c0_57] : memref<288x32xf32, #tpu.memory_space<vmem>>, vector<269x32xf32>
    %70 = arith.maximumf %68, %69 : vector<269x32xf32>
    %71 = arith.maximumf %67, %70 : vector<269x32xf32>
    %c0_58 = arith.constant 0 : index
    %c0_59 = arith.constant 0 : index
    %72 = vector.load %arg3[%c0_58, %c0_59] : memref<1x32xf32, #tpu.memory_space<vmem>>, vector<1x32xf32>
    %73 = vector.broadcast %72 : vector<1x32xf32> to vector<269x32xf32>
    %74 = arith.addf %71, %73 : vector<269x32xf32>
    %cst_60 = arith.constant 0.000000e+00 : f32
    %75 = vector.broadcast %cst_60 : f32 to vector<269x32xf32>
    %76 = arith.maximumf %74, %75 : vector<269x32xf32>
    %77 = arith.truncf %76 : vector<269x32xf32> to vector<269x32xbf16>
    %c0_61 = arith.constant 0 : index
    %c0_62 = arith.constant 0 : index
    %78 = vector.load %arg6[%c0_61, %c0_62] : memref<104x269xbf16, #tpu.memory_space<vmem>>, vector<104x269xbf16>
    %cst_63 = arith.constant dense<0.000000e+00> : vector<104x32xf32>
    %79 = tpu.matmul %78, %77, %cst_63 {dimension_numbers = #tpu.dot_dimension_numbers<[1], [0], [0], [1], [0, 0, 1, 1], [], []>} : vector<104x269xbf16>, vector<269x32xbf16>, vector<104x32xf32> -> vector<104x32xf32>
    %c0_64 = arith.constant 0 : index
    %c0_65 = arith.constant 0 : index
    %80 = vector.load %arg10[%c0_64, %c0_65] : memref<104x32xf32, #tpu.memory_space<vmem>>, vector<104x32xf32>
    tpu.vector_store %arg10[%c0_64, %c0_65], %79 {strides = array<i32>} : memref<104x32xf32, #tpu.memory_space<vmem>>, vector<104x32xf32>,
    %cst_66 = arith.constant 0.000000e+00 : f32
    %81 = vector.broadcast %cst_66 : f32 to vector<80x64xf32>
    %c0_67 = arith.constant 0 : index
    %c0_68 = arith.constant 0 : index
    %82 = vector.load %arg10[%c0_67, %c0_68] : memref<104x32xf32, #tpu.memory_space<vmem>>, vector<80x32xf32>
    %83 = arith.truncf %82 : vector<80x32xf32> to vector<80x32xbf16>
    %c0_69 = arith.constant 0 : index
    %c0_70 = arith.constant 0 : index
    %c0_71 = arith.constant 0 : index
    %84 = vector.load %arg4[%c0_69, %c0_70, %c0_71] : memref<9x32x64xbf16, #tpu.memory_space<vmem>>, vector<1x32x64xbf16>
    %85 = vector.shape_cast %84 : vector<1x32x64xbf16> to vector<32x64xbf16>
    %cst_72 = arith.constant dense<0.000000e+00> : vector<80x64xf32>
    %86 = tpu.matmul %83, %85, %cst_72 {dimension_numbers = #tpu.dot_dimension_numbers<[1], [0], [0], [1], [0, 0, 1, 1], [], []>} : vector<80x32xbf16>, vector<32x64xbf16>, vector<80x64xf32> -> vector<80x64xf32>
    %87 = arith.addf %81, %86 : vector<80x64xf32>
    %c1_73 = arith.constant 1 : index
    %c0_74 = arith.constant 0 : index
    %88 = vector.load %arg10[%c1_73, %c0_74] : memref<104x32xf32, #tpu.memory_space<vmem>>, vector<80x32xf32>
    %89 = arith.truncf %88 : vector<80x32xf32> to vector<80x32xbf16>
    %c1_75 = arith.constant 1 : index
    %c0_76 = arith.constant 0 : index
    %c0_77 = arith.constant 0 : index
    %90 = vector.load %arg4[%c1_75, %c0_76, %c0_77] : memref<9x32x64xbf16, #tpu.memory_space<vmem>>, vector<1x32x64xbf16>
    %91 = vector.shape_cast %90 : vector<1x32x64xbf16> to vector<32x64xbf16>
    %cst_78 = arith.constant dense<0.000000e+00> : vector<80x64xf32>
    %92 = tpu.matmul %89, %91, %cst_78 {dimension_numbers = #tpu.dot_dimension_numbers<[1], [0], [0], [1], [0, 0, 1, 1], [], []>} : vector<80x32xbf16>, vector<32x64xbf16>, vector<80x64xf32> -> vector<80x64xf32>
    %93 = arith.addf %87, %92 : vector<80x64xf32>
    %c2_79 = arith.constant 2 : index
    %c0_80 = arith.constant 0 : index
    %94 = vector.load %arg10[%c2_79, %c0_80] : memref<104x32xf32, #tpu.memory_space<vmem>>, vector<80x32xf32>
    %95 = arith.truncf %94 : vector<80x32xf32> to vector<80x32xbf16>
    %c2_81 = arith.constant 2 : index
    %c0_82 = arith.constant 0 : index
    %c0_83 = arith.constant 0 : index
    %96 = vector.load %arg4[%c2_81, %c0_82, %c0_83] : memref<9x32x64xbf16, #tpu.memory_space<vmem>>, vector<1x32x64xbf16>
    %97 = vector.shape_cast %96 : vector<1x32x64xbf16> to vector<32x64xbf16>
    %cst_84 = arith.constant dense<0.000000e+00> : vector<80x64xf32>
    %98 = tpu.matmul %95, %97, %cst_84 {dimension_numbers = #tpu.dot_dimension_numbers<[1], [0], [0], [1], [0, 0, 1, 1], [], []>} : vector<80x32xbf16>, vector<32x64xbf16>, vector<80x64xf32> -> vector<80x64xf32>
    %99 = arith.addf %93, %98 : vector<80x64xf32>
    %c10 = arith.constant 10 : index
    %c0_85 = arith.constant 0 : index
    %100 = vector.load %arg10[%c10, %c0_85] : memref<104x32xf32, #tpu.memory_space<vmem>>, vector<80x32xf32>
    %101 = arith.truncf %100 : vector<80x32xf32> to vector<80x32xbf16>
    %c3_86 = arith.constant 3 : index
    %c0_87 = arith.constant 0 : index
    %c0_88 = arith.constant 0 : index
    %102 = vector.load %arg4[%c3_86, %c0_87, %c0_88] : memref<9x32x64xbf16, #tpu.memory_space<vmem>>, vector<1x32x64xbf16>
    %103 = vector.shape_cast %102 : vector<1x32x64xbf16> to vector<32x64xbf16>
    %cst_89 = arith.constant dense<0.000000e+00> : vector<80x64xf32>
    %104 = tpu.matmul %101, %103, %cst_89 {dimension_numbers = #tpu.dot_dimension_numbers<[1], [0], [0], [1], [0, 0, 1, 1], [], []>} : vector<80x32xbf16>, vector<32x64xbf16>, vector<80x64xf32> -> vector<80x64xf32>
    %105 = arith.addf %99, %104 : vector<80x64xf32>
    %c11 = arith.constant 11 : index
    %c0_90 = arith.constant 0 : index
    %106 = vector.load %arg10[%c11, %c0_90] : memref<104x32xf32, #tpu.memory_space<vmem>>, vector<80x32xf32>
    %107 = arith.truncf %106 : vector<80x32xf32> to vector<80x32xbf16>
    %c4_91 = arith.constant 4 : index
    %c0_92 = arith.constant 0 : index
    %c0_93 = arith.constant 0 : index
    %108 = vector.load %arg4[%c4_91, %c0_92, %c0_93] : memref<9x32x64xbf16, #tpu.memory_space<vmem>>, vector<1x32x64xbf16>
    %109 = vector.shape_cast %108 : vector<1x32x64xbf16> to vector<32x64xbf16>
    %cst_94 = arith.constant dense<0.000000e+00> : vector<80x64xf32>
    %110 = tpu.matmul %107, %109, %cst_94 {dimension_numbers = #tpu.dot_dimension_numbers<[1], [0], [0], [1], [0, 0, 1, 1], [], []>} : vector<80x32xbf16>, vector<32x64xbf16>, vector<80x64xf32> -> vector<80x64xf32>
    %111 = arith.addf %105, %110 : vector<80x64xf32>
    %c12 = arith.constant 12 : index
    %c0_95 = arith.constant 0 : index
    %112 = vector.load %arg10[%c12, %c0_95] : memref<104x32xf32, #tpu.memory_space<vmem>>, vector<80x32xf32>
    %113 = arith.truncf %112 : vector<80x32xf32> to vector<80x32xbf16>
    %c5_96 = arith.constant 5 : index
    %c0_97 = arith.constant 0 : index
    %c0_98 = arith.constant 0 : index
    %114 = vector.load %arg4[%c5_96, %c0_97, %c0_98] : memref<9x32x64xbf16, #tpu.memory_space<vmem>>, vector<1x32x64xbf16>
    %115 = vector.shape_cast %114 : vector<1x32x64xbf16> to vector<32x64xbf16>
    %cst_99 = arith.constant dense<0.000000e+00> : vector<80x64xf32>
    %116 = tpu.matmul %113, %115, %cst_99 {dimension_numbers = #tpu.dot_dimension_numbers<[1], [0], [0], [1], [0, 0, 1, 1], [], []>} : vector<80x32xbf16>, vector<32x64xbf16>, vector<80x64xf32> -> vector<80x64xf32>
    %117 = arith.addf %111, %116 : vector<80x64xf32>
    %c20_100 = arith.constant 20 : index
    %c0_101 = arith.constant 0 : index
    %118 = vector.load %arg10[%c20_100, %c0_101] : memref<104x32xf32, #tpu.memory_space<vmem>>, vector<80x32xf32>
    %119 = arith.truncf %118 : vector<80x32xf32> to vector<80x32xbf16>
    %c6_102 = arith.constant 6 : index
    %c0_103 = arith.constant 0 : index
    %c0_104 = arith.constant 0 : index
    %120 = vector.load %arg4[%c6_102, %c0_103, %c0_104] : memref<9x32x64xbf16, #tpu.memory_space<vmem>>, vector<1x32x64xbf16>
    %121 = vector.shape_cast %120 : vector<1x32x64xbf16> to vector<32x64xbf16>
    %cst_105 = arith.constant dense<0.000000e+00> : vector<80x64xf32>
    %122 = tpu.matmul %119, %121, %cst_105 {dimension_numbers = #tpu.dot_dimension_numbers<[1], [0], [0], [1], [0, 0, 1, 1], [], []>} : vector<80x32xbf16>, vector<32x64xbf16>, vector<80x64xf32> -> vector<80x64xf32>
    %123 = arith.addf %117, %122 : vector<80x64xf32>
    %c21 = arith.constant 21 : index
    %c0_106 = arith.constant 0 : index
    %124 = vector.load %arg10[%c21, %c0_106] : memref<104x32xf32, #tpu.memory_space<vmem>>, vector<80x32xf32>
    %125 = arith.truncf %124 : vector<80x32xf32> to vector<80x32xbf16>
    %c7_107 = arith.constant 7 : index
    %c0_108 = arith.constant 0 : index
    %c0_109 = arith.constant 0 : index
    %126 = vector.load %arg4[%c7_107, %c0_108, %c0_109] : memref<9x32x64xbf16, #tpu.memory_space<vmem>>, vector<1x32x64xbf16>
    %127 = vector.shape_cast %126 : vector<1x32x64xbf16> to vector<32x64xbf16>
    %cst_110 = arith.constant dense<0.000000e+00> : vector<80x64xf32>
    %128 = tpu.matmul %125, %127, %cst_110 {dimension_numbers = #tpu.dot_dimension_numbers<[1], [0], [0], [1], [0, 0, 1, 1], [], []>} : vector<80x32xbf16>, vector<32x64xbf16>, vector<80x64xf32> -> vector<80x64xf32>
    %129 = arith.addf %123, %128 : vector<80x64xf32>
    %c22 = arith.constant 22 : index
    %c0_111 = arith.constant 0 : index
    %130 = vector.load %arg10[%c22, %c0_111] : memref<104x32xf32, #tpu.memory_space<vmem>>, vector<80x32xf32>
    %131 = arith.truncf %130 : vector<80x32xf32> to vector<80x32xbf16>
    %c8_112 = arith.constant 8 : index
    %c0_113 = arith.constant 0 : index
    %c0_114 = arith.constant 0 : index
    %132 = vector.load %arg4[%c8_112, %c0_113, %c0_114] : memref<9x32x64xbf16, #tpu.memory_space<vmem>>, vector<1x32x64xbf16>
    %133 = vector.shape_cast %132 : vector<1x32x64xbf16> to vector<32x64xbf16>
    %cst_115 = arith.constant dense<0.000000e+00> : vector<80x64xf32>
    %134 = tpu.matmul %131, %133, %cst_115 {dimension_numbers = #tpu.dot_dimension_numbers<[1], [0], [0], [1], [0, 0, 1, 1], [], []>} : vector<80x32xbf16>, vector<32x64xbf16>, vector<80x64xf32> -> vector<80x64xf32>
    %135 = arith.addf %129, %134 : vector<80x64xf32>
    %c0_116 = arith.constant 0 : index
    %c0_117 = arith.constant 0 : index
    %136 = vector.load %arg11[%c0_116, %c0_117] : memref<80x64xf32, #tpu.memory_space<vmem>>, vector<80x64xf32>
    tpu.vector_store %arg11[%c0_116, %c0_117], %135 {strides = array<i32>} : memref<80x64xf32, #tpu.memory_space<vmem>>, vector<80x64xf32>,
    %c0_118 = arith.constant 0 : index
    %c0_119 = arith.constant 0 : index
    %137 = vector.load %arg11[%c0_118, %c0_119] : memref<80x64xf32, #tpu.memory_space<vmem>>, vector<69x64xf32>
    %c1_120 = arith.constant 1 : index
    %c0_121 = arith.constant 0 : index
    %138 = vector.load %arg11[%c1_120, %c0_121] : memref<80x64xf32, #tpu.memory_space<vmem>>, vector<69x64xf32>
    %139 = arith.maximumf %137, %138 : vector<69x64xf32>
    %c10_122 = arith.constant 10 : index
    %c0_123 = arith.constant 0 : index
    %140 = vector.load %arg11[%c10_122, %c0_123] : memref<80x64xf32, #tpu.memory_space<vmem>>, vector<69x64xf32>
    %c11_124 = arith.constant 11 : index
    %c0_125 = arith.constant 0 : index
    %141 = vector.load %arg11[%c11_124, %c0_125] : memref<80x64xf32, #tpu.memory_space<vmem>>, vector<69x64xf32>
    %142 = arith.maximumf %140, %141 : vector<69x64xf32>
    %143 = arith.maximumf %139, %142 : vector<69x64xf32>
    %c0_126 = arith.constant 0 : index
    %c0_127 = arith.constant 0 : index
    %144 = vector.load %arg5[%c0_126, %c0_127] : memref<1x64xf32, #tpu.memory_space<vmem>>, vector<1x64xf32>
    %145 = vector.broadcast %144 : vector<1x64xf32> to vector<69x64xf32>
    %146 = arith.addf %143, %145 : vector<69x64xf32>
    %cst_128 = arith.constant 0.000000e+00 : f32
    %147 = vector.broadcast %cst_128 : f32 to vector<69x64xf32>
    %148 = arith.maximumf %146, %147 : vector<69x64xf32>
    %149 = arith.truncf %148 : vector<69x64xf32> to vector<69x64xbf16>
    %c0_129 = arith.constant 0 : index
    %c0_130 = arith.constant 0 : index
    %150 = vector.load %arg7[%c0_129, %c0_130] : memref<16x69xbf16, #tpu.memory_space<vmem>>, vector<16x69xbf16>
    %cst_131 = arith.constant dense<0.000000e+00> : vector<16x64xf32>
    %151 = tpu.matmul %150, %149, %cst_131 {dimension_numbers = #tpu.dot_dimension_numbers<[1], [0], [0], [1], [0, 0, 1, 1], [], []>} : vector<16x69xbf16>, vector<69x64xbf16>, vector<16x64xf32> -> vector<16x64xf32>
    %c0_132 = arith.constant 0 : index
    %c0_133 = arith.constant 0 : index
    %c0_134 = arith.constant 0 : index
    %152 = vector.load %arg8[%c0_132, %c0_133, %c0_134] : memref<1x16x64xf32, #tpu.memory_space<vmem>>, vector<1x16x64xf32>
    %153 = vector.shape_cast %152 : vector<1x16x64xf32> to vector<16x64xf32>
    %154 = vector.shape_cast %151 : vector<16x64xf32> to vector<1x16x64xf32>
    tpu.vector_store %arg8[%c0_132, %c0_133, %c0_134], %154 {strides = array<i32>} : memref<1x16x64xf32, #tpu.memory_space<vmem>>, vector<1x16x64xf32>,
    return
  }
  func.func @transform_0(%arg0: i32) -> (i32, i32, i32) {
    %c0_i32 = arith.constant 0 : i32
    %c0_i32_0 = arith.constant 0 : i32
    %c0_i32_1 = arith.constant 0 : i32
    return %arg0, %c0_i32, %c0_i32_0 : i32, i32, i32
  }
  func.func @transform_1(%arg0: i32) -> (i32, i32, i32) {
    %c0_i32 = arith.constant 0 : i32
    %c0_i32_0 = arith.constant 0 : i32
    %c0_i32_1 = arith.constant 0 : i32
    %c0_i32_2 = arith.constant 0 : i32
    return %c0_i32, %c0_i32_0, %c0_i32_1 : i32, i32, i32
  }
  func.func @transform_2(%arg0: i32) -> (i32, i32) {
    %c0_i32 = arith.constant 0 : i32
    %c0_i32_0 = arith.constant 0 : i32
    %c0_i32_1 = arith.constant 0 : i32
    return %c0_i32, %c0_i32_0 : i32, i32
  }
  func.func @transform_3(%arg0: i32) -> (i32, i32, i32) {
    %c0_i32 = arith.constant 0 : i32
    %c0_i32_0 = arith.constant 0 : i32
    %c0_i32_1 = arith.constant 0 : i32
    %c0_i32_2 = arith.constant 0 : i32
    return %c0_i32, %c0_i32_0, %c0_i32_1 : i32, i32, i32
  }
  func.func @transform_4(%arg0: i32) -> (i32, i32) {
    %c0_i32 = arith.constant 0 : i32
    %c0_i32_0 = arith.constant 0 : i32
    %c0_i32_1 = arith.constant 0 : i32
    return %c0_i32, %c0_i32_0 : i32, i32
  }
  func.func @transform_5(%arg0: i32) -> (i32, i32) {
    %c0_i32 = arith.constant 0 : i32
    %c0_i32_0 = arith.constant 0 : i32
    %c0_i32_1 = arith.constant 0 : i32
    return %c0_i32, %c0_i32_0 : i32, i32
  }
  func.func @transform_6(%arg0: i32) -> (i32, i32) {
    %c0_i32 = arith.constant 0 : i32
    %c0_i32_0 = arith.constant 0 : i32
    %c0_i32_1 = arith.constant 0 : i32
    return %c0_i32, %c0_i32_0 : i32, i32
  }
  func.func @transform_7(%arg0: i32) -> (i32, i32, i32) {
    %c0_i32 = arith.constant 0 : i32
    %c0_i32_0 = arith.constant 0 : i32
    %c0_i32_1 = arith.constant 0 : i32
    return %arg0, %c0_i32, %c0_i32_0 : i32, i32, i32
  }
}

</mosaic_0001>

<bundles_post_ra>
// kernel: alexnet_down_cifar.1
= control target key start
LH: loop header
LB: loop body
LE: loop exit
PB: predicated region body
PF: predicated region fallthrough
CT: control target
= control target key end

     0   :  { %12 = vsyncpa [#allocation6], 0  ;;  %s6046_s0 = inlined_call_operand.vmem [shape: f32[2,342,8], index: 0, kind: input, shape index: {}]   ;;  %s6047_s1 = inlined_call_operand.vmem [shape: bf16[9,8,32], index: 1, kind: input, shape index: {}]   ;;  %s6048_s2 = inlined_call_operand.vmem [shape: f32[1,32], index: 2, kind: input, shape index: {}]   ;;  %s6049_s3 = inlined_call_operand.vmem [shape: bf16[9,32,64], index: 3, kind: input, shape index: {}]   ;;  %s6050_s4 = inlined_call_operand.vmem [shape: f32[1,64], index: 4, kind: input, shape index: {}]   ;;  %s6051_s5 = inlined_call_operand.vmem [shape: bf16[104,269], index: 5, kind: input, shape index: {}]   ;;  %s6052_s6 = inlined_call_operand.vmem [shape: bf16[16,69], index: 6, kind: input, shape index: {}]   ;;  %s6053_s7 = inlined_call_operand.hbm [shape: f32[2,16,64], index: 7, kind: output, shape index: {}]  }
   0x1   :  { %14 = vsyncpa [#allocation6 + $0x1], 0  ;;  %s4715_s24 = smov 0   ;;  %s4717_s25 = smov 0  }
   0x2   :  { %s4719_s26 = smov 0   ;;  %s4721_s27 = smov 0  }
   0x3 LB: > { %s4736_s28 = sadd.s32 4294967295, %s4670_s27   ;;  %s4111_s29 = sadd.s32 4294967294, %s4670_s27   ;;  %s4670_s27 = sphi %s4721_s27, %s6059_s27   ;;  %s4666_s26 = sphi %s4719_s26, %s6058_s26   ;;  %s4662_s25 = sphi %s4717_s25, %s6057_s25   ;;  %s4658_s24 = sphi %s4715_s24, %s6056_s24  }
   0x4   : > { %s4740_s30 = sadd.s32 1, %s4670_s27   ;;  %s179_s8 = sadd.s32 1, %s4666_s26 }
   0x5   : > { %s176_s9 = ssub.s32 %s4670_s27, %s4740_s30  ;;  %p189_p0 = scmp.ne.s32.totalorder %s4666_s26, %s4662_s25 }
   0x6   : > { %p177_p1 = scmp.eq.s32.totalorder %s176_s9, 0  ;;  %p190_p2 = scmp.eq.s32.totalorder %s4736_s28, 1 }
   0x7   : > { %p195_p3 = scmp.ne.s32.totalorder %s4662_s25, %s4658_s24  ;;  %p196_p4 = scmp.eq.s32.totalorder %s4111_s29, 1 }
   0x8   : > { %s4751_s10 = scalar_select %p177_p1, %s4666_s26, %s179_s8  }
   0x9   : > { %p4753_p5 = por %p190_p2, %p189_p0  ;;  %p4757_p6 = por %p196_p4, %p195_p3 }
   0xa   : > { %p4114_p7 = scmp.ge.s32.totalorder %s4670_s27, 1  ;;  %p240_p8 = scmp.lt.s32.totalorder %s4670_s27, 3 }
   0xc   : > { %p241_p9 = pnand %p4114_p7, %p240_p8 }
   0xd   : > { %p272_p10 = scmp.lt.s32.totalorder (!%p241_p9), %s4736_s28, 1  ;;  %s269_s14 = sand.u32 (!%p241_p9), 1, %s4662_s25  }
   0xe   : > { %244 = sbr.rel (%p241_p9) target bundleno = 1760 (0x6e0), region = 48  ;;  %s4115_s15 = sshll.u32 (!%p241_p9), %s269_s14, 4 }
   0xf   : > { %s4562_s16 = sshll.u32 (!%p241_p9), %s4736_s28, 4  ;;  %s271_s17 = scalar_lea.vmem (!%p241_p9), [#allocation5], %s4115_s15 }
  0x10   : > { %s4045_s20 = scalar_lea.hbm (!%p241_p9), %s6053_s7, %s4562_s16  ;;  %s4034_s23 = scalar_lea.sflag (!%p241_p9), [#allocation6], %s269_s14 }
  0x11   : > { %s4628_s13 = scalar_lea.hbm (!%p241_p9), %s6053_s7, 32 }
  0x13   : > { %v4117_v0 = vld [vmem:[%s6047_s1 + $0x4] sm:$0xf]  ;;  %vm444_vm0 = vcmask 1043456   ;;  %v332_v1 = vld [vmem:[%s6047_s1] sm:$0xf]  ;;  %s273_s21 = scalar_select %p272_p10, %s4736_s28, 1 }
  0x14   : > { %v446_v2 = vsel %vm444_vm0, %v4117_v0, 0  ;;  %v602_v3 = vsel %vm444_vm0, %v332_v1, 0  ;;  %v4154_v4 = vld [vmem:[%s6047_s1 + $0x8] sm:$0xf]  ;;  %v4173_v5 = vld [vmem:[%s6047_s1 + $0xc] sm:$0xf] }
  0x15   : > { %455 = vmatpush.bf16.msra.mxu0 %v446_v2  ;;  %611 = vmatpush.bf16.msra.mxu1 %v602_v3  ;;  %v814_v6 = vsel %vm444_vm0, %v4154_v4, 0  ;;  %v1062_v7 = vsel %vm444_vm0, %v4173_v5, 0  ;;  %s4563_s22 = smul.u32 344, %s273_s21  ;;  %vm389_vm1 = vcmask 64512   ;;  %vm2439_vm2 = vcmask 261120   ;;  %s4046_s21 = sshll.u32 %s271_s17, 4  ;;  %s4047_s21 = int_to_ptr.vmem [resolvable:$true] %s4046_s21 }
  0x16   : > { %823 = vmatpush.bf16.msra.mxu2 %v814_v6  ;;  %1071 = vmatpush.bf16.msra.mxu3 %v1062_v7  ;;  %vm2951_vm3 = vcmask 1045504   ;;  %vm2952_vm4 = vcmask 1046528   ;;  %vm2929_vm5 = vcmask 105472   ;;  %vm3898_vm6 = vcmask 523264  }
  0x17   : > { %s4784_s8 = scalar_lea.vmem %s6046_s0, %s4563_s22  ;;  %vm4010_vm7 = vcmask 1041408   ;;  %vm4011_vm8 = vcmask 1042432   ;;  %vm4006_vm9 = vcmask 564224   ;;  %s4048_s22 = sshll.u32 %s4045_s20, 4  ;;  %s4049_s22 = int_to_ptr.hbm [resolvable:$true] %s4048_s22 }
  0x18   : > { %v333_v8 = vld [vmem:[%s4784_s8 + $0x1] sm:$0xff]  ;;  %v334_v9 = vld [vmem:[%s4784_s8 + $0x9] sm:$0xff]  ;;  %v951_v17 = vld [vmem:[%s4784_s8 + $0x12] sm:$0xff]  ;;  %s4622_s29 = sshra.s32 %s4049_s22, 4  ;;  %s4623_s29 = int_to_ptr.hbm [resolvable:$true] %s4622_s29 }
  0x19   : > { %v278_v10 = vld [vmem:[%s4784_s8] sm:$0xff]  ;;  %v369_v11 = vpack.c.bf16 %v334_v9, %v333_v8  ;;  %v279_v12 = vld [vmem:[%s4784_s8 + $0x8] sm:$0xff]  ;;  %v335_v20 = vld [vmem:[%s4784_s8 + $0x11] sm:$0xff]  ;;  %s4624_s28 = scalar_lea.hbm %s4623_s29, 16  ;;  %p4629_p0 = scmp.lt.s32.totalorder %s4623_s29, %s6053_s7 }
  0x1a   : > { %v703_v13 = vld [vmem:[%s4784_s8 + $0x2] sm:$0xff]  ;;  %v704_v14 = vld [vmem:[%s4784_s8 + $0xa] sm:$0xff]  ;;  %v314_v15 = vpack.c.bf16 %v279_v12, %v278_v10  ;;  %v952_v18 = vld [vmem:[%s4784_s8 + $0x1a] sm:$0xff]  ;;  %p4625_p11 = scmp.ne.s32.totalorder %s4623_s29, %s4624_s28  ;;  %p4630_p1 = scmp.lt.s32.totalorder %s4628_s13, %s4624_s28 }
  0x1b   : > { %v739_v16 = vpack.c.bf16 %v704_v14, %v703_v13  ;;  %4118 = vmatmul.msk.bf16.vlgmr.msra.gmra.mxu0 %vm389_vm1, %v369_v11  ;;  %v987_v19 = vpack.c.bf16 %v952_v18, %v951_v17  ;;  %v336_v21 = vld [vmem:[%s4784_s8 + $0x19] sm:$0xff]  ;;  %v280_v22 = vld [vmem:[%s4784_s8 + $0x10] sm:$0xff]  ;;  %v953_v24 = vld [vmem:[%s4784_s8 + $0x22] sm:$0xff] }
  0x1c   : > { %4136 = vmatmul.msk.bf16.vlgmr.msra.gmra.mxu1 %vm389_vm1, %v314_v15  ;;  %v281_v23 = vld [vmem:[%s4784_s8 + $0x18] sm:$0xff]  ;;  %v954_v25 = vld [vmem:[%s4784_s8 + $0x2a] sm:$0xff]  ;;  %v370_v26 = vpack.c.bf16 %v336_v21, %v335_v20  ;;  %v337_v29 = vld [vmem:[%s4784_s8 + $0x21] sm:$0xff]  ;;  %p4626_p12 = pnand %p4625_p11, %p4753_p5  ;;  %p4631_p2 = por %p4630_p1, %p4629_p0 }
  0x1d   : > { %4155 = vmatmul.msk.bf16.vlgmr.msra.gmra.mxu2 %vm389_vm1, %v739_v16  ;;  %4174 = vmatmul.msk.bf16.vlgmr.msra.gmra.mxu3 %vm389_vm1, %v987_v19  ;;  %v315_v27 = vpack.c.bf16 %v281_v23, %v280_v22  ;;  %v988_v28 = vpack.c.bf16 %v954_v25, %v953_v24  ;;  %v338_v30 = vld [vmem:[%s4784_s8 + $0x29] sm:$0xff]  ;;  %v282_v31 = vld [vmem:[%s4784_s8 + $0x20] sm:$0xff]  ;;  %v955_v33 = vld [vmem:[%s4784_s8 + $0x32] sm:$0xff] }
  0x1e   : > { %v283_v32 = vld [vmem:[%s4784_s8 + $0x28] sm:$0xff]  ;;  %v956_v34 = vld [vmem:[%s4784_s8 + $0x3a] sm:$0xff]  ;;  %v371_v35 = vpack.c.bf16 %v338_v30, %v337_v29  ;;  %v339_v38 = vld [vmem:[%s4784_s8 + $0x31] sm:$0xff]  ;;  %p4627_p13 = pneg %p4626_p12 }
  0x1f   : > { %v316_v36 = vpack.c.bf16 %v283_v32, %v282_v31  ;;  %v989_v37 = vpack.c.bf16 %v956_v34, %v955_v33  ;;  %v340_v39 = vld [vmem:[%s4784_s8 + $0x39] sm:$0xff]  ;;  %v284_v40 = vld [vmem:[%s4784_s8 + $0x30] sm:$0xff]  ;;  %v957_v42 = vld [vmem:[%s4784_s8 + $0x42] sm:$0xff] }
  0x20   : > { %v285_v41 = vld [vmem:[%s4784_s8 + $0x38] sm:$0xff]  ;;  %v958_v43 = vld [vmem:[%s4784_s8 + $0x4a] sm:$0xff]  ;;  %v372_v44 = vpack.c.bf16 %v340_v39, %v339_v38  ;;  %v341_v47 = vld [vmem:[%s4784_s8 + $0x41] sm:$0xff]  ;;  %p4632_p3 = pnand %p4631_p2, %p4627_p13 }
  0x21   : > { %v317_v45 = vpack.c.bf16 %v285_v41, %v284_v40  ;;  %v990_v46 = vpack.c.bf16 %v958_v43, %v957_v42  ;;  %v342_v48 = vld [vmem:[%s4784_s8 + $0x49] sm:$0xff]  ;;  %v286_v49 = vld [vmem:[%s4784_s8 + $0x40] sm:$0xff]  ;;  %v959_v51 = vld [vmem:[%s4784_s8 + $0x52] sm:$0xff] }
  0x22   : > { %v287_v50 = vld [vmem:[%s4784_s8 + $0x48] sm:$0xff]  ;;  %v960_v52 = vld [vmem:[%s4784_s8 + $0x5a] sm:$0xff]  ;;  %v373_v53 = vpack.c.bf16 %v342_v48, %v341_v47  ;;  %v343_v56 = vld [vmem:[%s4784_s8 + $0x51] sm:$0xff] }
  0x23   : > { %v318_v54 = vpack.c.bf16 %v287_v50, %v286_v49  ;;  %v991_v55 = vpack.c.bf16 %v960_v52, %v959_v51  ;;  %v344_v57 = vld [vmem:[%s4784_s8 + $0x59] sm:$0xff]  ;;  %v288_v58 = vld [vmem:[%s4784_s8 + $0x50] sm:$0xff]  ;;  %v961_v60 = vld [vmem:[%s4784_s8 + $0x62] sm:$0xff] }
  0x24   : > { %v289_v59 = vld [vmem:[%s4784_s8 + $0x58] sm:$0xff]  ;;  %v962_v61 = vld [vmem:[%s4784_s8 + $0x6a] sm:$0xff]  ;;  %v374_v62 = vpack.c.bf16 %v344_v57, %v343_v56  ;;  %v345_v1 = vld [vmem:[%s4784_s8 + $0x61] sm:$0xff] }
  0x25   : > { %v319_v63 = vpack.c.bf16 %v289_v59, %v288_v58  ;;  %v992_v0 = vpack.c.bf16 %v962_v61, %v961_v60  ;;  %v346_v2 = vld [vmem:[%s4784_s8 + $0x69] sm:$0xff]  ;;  %v290_v3 = vld [vmem:[%s4784_s8 + $0x60] sm:$0xff]  ;;  %v963_v5 = vld [vmem:[%s4784_s8 + $0x72] sm:$0xff] }
  0x26   : > { %v291_v4 = vld [vmem:[%s4784_s8 + $0x68] sm:$0xff]  ;;  %v964_v6 = vld [vmem:[%s4784_s8 + $0x7a] sm:$0xff]  ;;  %v375_v7 = vpack.c.bf16 %v346_v2, %v345_v1  ;;  %v347_v10 = vld [vmem:[%s4784_s8 + $0x71] sm:$0xff] }
  0x27   : > { %v320_v8 = vpack.c.bf16 %v291_v4, %v290_v3  ;;  %v993_v9 = vpack.c.bf16 %v964_v6, %v963_v5  ;;  %v348_v11 = vld [vmem:[%s4784_s8 + $0x79] sm:$0xff]  ;;  %v292_v12 = vld [vmem:[%s4784_s8 + $0x70] sm:$0xff]  ;;  %v965_v14 = vld [vmem:[%s4784_s8 + $0x82] sm:$0xff] }
  0x28   : > { %v293_v13 = vld [vmem:[%s4784_s8 + $0x78] sm:$0xff]  ;;  %v966_v15 = vld [vmem:[%s4784_s8 + $0x8a] sm:$0xff]  ;;  %v376_v16 = vpack.c.bf16 %v348_v11, %v347_v10  ;;  %v294_v21 = vld [vmem:[%s4784_s8 + $0x80] sm:$0xff] }
  0x29   : > { %v321_v17 = vpack.c.bf16 %v293_v13, %v292_v12  ;;  %v994_v18 = vpack.c.bf16 %v966_v15, %v965_v14  ;;  %v350_v20 = vld [vmem:[%s4784_s8 + $0x89] sm:$0xff]  ;;  %v967_v23 = vld [vmem:[%s4784_s8 + $0x92] sm:$0xff]  ;;  %v968_v24 = vld [vmem:[%s4784_s8 + $0x9a] sm:$0xff] }
  0x2a   : > { %v295_v22 = vld [vmem:[%s4784_s8 + $0x88] sm:$0xff]  ;;  %v995_v29 = vpack.c.bf16 %v968_v24, %v967_v23  ;;  %v351_v38 = vld [vmem:[%s4784_s8 + $0x91] sm:$0xff]  ;;  %v352_v39 = vld [vmem:[%s4784_s8 + $0x99] sm:$0xff] }
  0x2b   : > { %4119 = vmatmul.msk.bf16.gmra.mxu0 %vm389_vm1, %v370_v26  ;;  %v296_v40 = vld [vmem:[%s4784_s8 + $0x90] sm:$0xff]  ;;  %v297_v41 = vld [vmem:[%s4784_s8 + $0x98] sm:$0xff]  ;;  %v969_v42 = vld [vmem:[%s4784_s8 + $0xa2] sm:$0xff] }
  0x2c   : > { %4137 = vmatmul.msk.bf16.gmra.mxu1 %vm389_vm1, %v315_v27  ;;  %v322_v27 = vpack.c.bf16 %v295_v22, %v294_v21  ;;  %v970_v43 = vld [vmem:[%s4784_s8 + $0xaa] sm:$0xff]  ;;  %v323_v49 = vpack.c.bf16 %v297_v41, %v296_v40  ;;  %v353_v61 = vld [vmem:[%s4784_s8 + $0xa1] sm:$0xff]  ;;  %v971_v1 = vld [vmem:[%s4784_s8 + $0xb2] sm:$0xff] }
  0x2d   : > { %4156 = vmatmul.msk.bf16.gmra.mxu2 %vm389_vm1, %v987_v19  ;;  %4175 = vmatmul.msk.bf16.gmra.mxu3 %vm389_vm1, %v988_v28  ;;  %v349_v19 = vld [vmem:[%s4784_s8 + $0x81] sm:$0xff]  ;;  %v996_v51 = vpack.c.bf16 %v970_v43, %v969_v42  ;;  %v356_v21 = vld [vmem:[%s4784_s8 + $0xb9] sm:$0xff]  ;;  %v300_v22 = vld [vmem:[%s4784_s8 + $0xb0] sm:$0xff] }
  0x2e   : > { %v377_v25 = vpack.c.bf16 %v350_v20, %v349_v19  ;;  %v972_v2 = vld [vmem:[%s4784_s8 + $0xba] sm:$0xff]  ;;  %v355_v20 = vld [vmem:[%s4784_s8 + $0xb1] sm:$0xff]  ;;  %v973_v24 = vld [vmem:[%s4784_s8 + $0xc2] sm:$0xff] }
  0x2f   : > { %v997_v10 = vpack.c.bf16 %v972_v2, %v971_v1  ;;  %v301_v23 = vld [vmem:[%s4784_s8 + $0xb8] sm:$0xff] }
  0x3b   : > { %4120 = vmatmul.msk.bf16.gmra.mxu0 %vm389_vm1, %v371_v35 }
  0x3c   : > { %4138 = vmatmul.msk.bf16.gmra.mxu1 %vm389_vm1, %v316_v36 }
  0x3d   : > { %4157 = vmatmul.msk.bf16.gmra.mxu2 %vm389_vm1, %v988_v28  ;;  %4176 = vmatmul.msk.bf16.gmra.mxu3 %vm389_vm1, %v989_v37 }
  0x4b   : > { %4121 = vmatmul.msk.bf16.gmra.mxu0 %vm389_vm1, %v372_v44 }
  0x4c   : > { %4139 = vmatmul.msk.bf16.gmra.mxu1 %vm389_vm1, %v317_v45  ;;  %v378_v45 = vpack.c.bf16 %v352_v39, %v351_v38 }
  0x4d   : > { %4158 = vmatmul.msk.bf16.gmra.mxu2 %vm389_vm1, %v989_v37  ;;  %4177 = vmatmul.msk.bf16.gmra.mxu3 %vm389_vm1, %v990_v46 }
  0x5b   : > { %4122 = vmatmul.msk.bf16.gmra.mxu0 %vm389_vm1, %v373_v53 }
  0x5c   : > { %4140 = vmatmul.msk.bf16.gmra.mxu1 %vm389_vm1, %v318_v54 }
  0x5d   : > { %4159 = vmatmul.msk.bf16.gmra.mxu2 %vm389_vm1, %v990_v46  ;;  %4178 = vmatmul.msk.bf16.gmra.mxu3 %vm389_vm1, %v991_v55 }
  0x6b   : > { %4123 = vmatmul.msk.bf16.gmra.mxu0 %vm389_vm1, %v374_v62  ;;  %v354_v62 = vld [vmem:[%s4784_s8 + $0xa9] sm:$0xff] }
  0x6c   : > { %4141 = vmatmul.msk.bf16.gmra.mxu1 %vm389_vm1, %v319_v63  ;;  %v298_v63 = vld [vmem:[%s4784_s8 + $0xa0] sm:$0xff]  ;;  %v379_v4 = vpack.c.bf16 %v354_v62, %v353_v61 }
  0x6d   : > { %4160 = vmatmul.msk.bf16.gmra.mxu2 %vm389_vm1, %v991_v55  ;;  %4179 = vmatmul.msk.bf16.gmra.mxu3 %vm389_vm1, %v992_v0 }
  0x7b   : > { %4124 = vmatmul.msk.bf16.gmra.mxu0 %vm389_vm1, %v375_v7 }
  0x7c   : > { %4142 = vmatmul.msk.bf16.gmra.mxu1 %vm389_vm1, %v320_v8 }
  0x7d   : > { %4161 = vmatmul.msk.bf16.gmra.mxu2 %vm389_vm1, %v992_v0  ;;  %4180 = vmatmul.msk.bf16.gmra.mxu3 %vm389_vm1, %v993_v9  ;;  %v299_v0 = vld [vmem:[%s4784_s8 + $0xa8] sm:$0xff] }
  0x7e   : > { %v324_v8 = vpack.c.bf16 %v299_v0, %v298_v63 }
  0x8b   : > { %4125 = vmatmul.msk.bf16.gmra.mxu0 %vm389_vm1, %v376_v16 }
  0x8c   : > { %4143 = vmatmul.msk.bf16.gmra.mxu1 %vm389_vm1, %v321_v17 }
  0x8d   : > { %4162 = vmatmul.msk.bf16.gmra.mxu2 %vm389_vm1, %v993_v9  ;;  %4181 = vmatmul.msk.bf16.gmra.mxu3 %vm389_vm1, %v994_v18 }
  0x98   : > { %v457_v26 = vpop.f32.mrf.mxu0 }
  0x99   : > { %v613_v28 = vpop.f32.mrf.mxu1 }
  0x9a   : > { %v614_v30 = vadd.f32 %v613_v28, %v457_v26 }
  0x9b   : > { %4126 = vmatmul.msk.bf16.gmra.mxu0 %vm389_vm1, %v377_v25  ;;  %v974_v25 = vld [vmem:[%s4784_s8 + $0xca] sm:$0xff] }
  0x9c   : > { %4144 = vmatmul.msk.bf16.gmra.mxu1 %vm389_vm1, %v322_v27  ;;  %v380_v27 = vpack.c.bf16 %v356_v21, %v355_v20 }
  0x9d   : > { %4163 = vmatmul.msk.bf16.gmra.mxu2 %vm389_vm1, %v994_v18  ;;  %4182 = vmatmul.msk.bf16.gmra.mxu3 %vm389_vm1, %v995_v29 }
  0xa0   : > { %v825_v31 = vpop.f32.mrf.mxu2  ;;  %v459_v33 = vpop.f32.mrf.mxu0 }
  0xa1   : > { %v915_v32 = vadd.f32 %v825_v31, %v614_v30  ;;  %v1073_v34 = vpop.f32.mrf.mxu3  ;;  %v615_v35 = vpop.f32.mrf.mxu1  ;;  %v325_v31 = vpack.c.bf16 %v301_v23, %v300_v22 }
  0xa2   : > { %v616_v36 = vadd.f32 %v615_v35, %v459_v33  ;;  %v998_v33 = vpack.c.bf16 %v974_v25, %v973_v24 }
  0xa3   : > { %v4878_v37 = vadd.f32 %v1073_v34, %v915_v32 }
  0xa8   : > { %v827_v44 = vpop.f32.mrf.mxu2  ;;  %v462_v47 = vpop.f32.mrf.mxu0 }
  0xa9   : > { %v916_v46 = vadd.f32 %v827_v44, %v616_v36  ;;  %v1075_v48 = vpop.f32.mrf.mxu3  ;;  %v618_v50 = vpop.f32.mrf.mxu1  ;;  %v357_v44 = vld [vmem:[%s4784_s8 + $0xc1] sm:$0xff] }
  0xaa   : > { %v619_v52 = vadd.f32 %v618_v50, %v462_v47  ;;  %v303_v47 = vld [vmem:[%s4784_s8 + $0xc8] sm:$0xff] }
  0xab   : > { %v4886_v53 = vadd.f32 %v1075_v48, %v916_v46  ;;  %4127 = vmatmul.msk.bf16.gmra.mxu0 %vm389_vm1, %v378_v45  ;;  %v358_v45 = vld [vmem:[%s4784_s8 + $0xc9] sm:$0xff]  ;;  %v302_v46 = vld [vmem:[%s4784_s8 + $0xc0] sm:$0xff]  ;;  %v975_v48 = vld [vmem:[%s4784_s8 + $0xd2] sm:$0xff] }
  0xac   : > { %4145 = vmatmul.msk.bf16.gmra.mxu1 %vm389_vm1, %v323_v49  ;;  %v976_v49 = vld [vmem:[%s4784_s8 + $0xda] sm:$0xff] }
  0xad   : > { %4164 = vmatmul.msk.bf16.gmra.mxu2 %vm389_vm1, %v995_v29  ;;  %4183 = vmatmul.msk.bf16.gmra.mxu3 %vm389_vm1, %v996_v51 }
  0xb0   : > { %v830_v54 = vpop.f32.mrf.mxu2  ;;  %v464_v56 = vpop.f32.mrf.mxu0 }
  0xb1   : > { %v917_v55 = vadd.f32 %v830_v54, %v619_v52  ;;  %v1078_v57 = vpop.f32.mrf.mxu3  ;;  %v620_v58 = vpop.f32.mrf.mxu1 }
  0xb2   : > { %v621_v59 = vadd.f32 %v620_v58, %v464_v56  ;;  %v326_v56 = vpack.c.bf16 %v303_v47, %v302_v46  ;;  %v999_v58 = vpack.c.bf16 %v976_v49, %v975_v48 }
  0xb3   : > { %v4892_v60 = vadd.f32 %v1078_v57, %v917_v55 }
  0xb8   : > { %v832_v3 = vpop.f32.mrf.mxu2  ;;  %v467_v6 = vpop.f32.mrf.mxu0 }
  0xb9   : > { %v918_v5 = vadd.f32 %v832_v3, %v621_v59  ;;  %v1080_v7 = vpop.f32.mrf.mxu3  ;;  %v623_v9 = vpop.f32.mrf.mxu1 }
  0xba   : > { %v624_v11 = vadd.f32 %v623_v9, %v467_v6  ;;  %v360_v6 = vld [vmem:[%s4784_s8 + $0xd9] sm:$0xff]  ;;  %v977_v9 = vld [vmem:[%s4784_s8 + $0xe2] sm:$0xff] }
  0xbb   : > { %v4900_v12 = vadd.f32 %v1080_v7, %v918_v5  ;;  %4128 = vmatmul.msk.bf16.gmra.mxu0 %vm389_vm1, %v379_v4  ;;  %v359_v5 = vld [vmem:[%s4784_s8 + $0xd1] sm:$0xff] }
  0xbc   : > { %4146 = vmatmul.msk.bf16.gmra.mxu1 %vm389_vm1, %v324_v8  ;;  %v304_v7 = vld [vmem:[%s4784_s8 + $0xd0] sm:$0xff]  ;;  %v305_v8 = vld [vmem:[%s4784_s8 + $0xd8] sm:$0xff] }
  0xbd   : > { %4165 = vmatmul.msk.bf16.gmra.mxu2 %vm389_vm1, %v996_v51  ;;  %4184 = vmatmul.msk.bf16.gmra.mxu3 %vm389_vm1, %v997_v10  ;;  %v381_v51 = vpack.c.bf16 %v358_v45, %v357_v44 }
  0xc0   : > { %v835_v13 = vpop.f32.mrf.mxu2  ;;  %v469_v15 = vpop.f32.mrf.mxu0 }
  0xc1   : > { %v919_v14 = vadd.f32 %v835_v13, %v624_v11  ;;  %v1083_v16 = vpop.f32.mrf.mxu3  ;;  %v625_v17 = vpop.f32.mrf.mxu1  ;;  %v382_v13 = vpack.c.bf16 %v360_v6, %v359_v5 }
  0xc2   : > { %v626_v18 = vadd.f32 %v625_v17, %v469_v15  ;;  %v327_v17 = vpack.c.bf16 %v305_v8, %v304_v7 }
  0xc3   : > { %v4906_v19 = vadd.f32 %v1083_v16, %v919_v14 }
  0xc8   : > { %v837_v26 = vpop.f32.mrf.mxu2  ;;  %v472_v29 = vpop.f32.mrf.mxu0 }
  0xc9   : > { %v920_v28 = vadd.f32 %v837_v26, %v626_v18  ;;  %v1085_v30 = vpop.f32.mrf.mxu3  ;;  %v628_v32 = vpop.f32.mrf.mxu1 }
  0xca   : > { %v629_v34 = vadd.f32 %v628_v32, %v472_v29  ;;  %v306_v32 = vld [vmem:[%s4784_s8 + $0xe0] sm:$0xff] }
  0xcb   : > { %v4914_v35 = vadd.f32 %v1085_v30, %v920_v28  ;;  %4129 = vmatmul.msk.bf16.gmra.mxu0 %vm389_vm1, %v380_v27  ;;  %v361_v30 = vld [vmem:[%s4784_s8 + $0xe1] sm:$0xff] }
  0xcc   : > { %4147 = vmatmul.msk.bf16.gmra.mxu1 %vm389_vm1, %v325_v31  ;;  %v362_v31 = vld [vmem:[%s4784_s8 + $0xe9] sm:$0xff] }
  0xcd   : > { %4166 = vmatmul.msk.bf16.gmra.mxu2 %vm389_vm1, %v997_v10  ;;  %4185 = vmatmul.msk.bf16.gmra.mxu3 %vm389_vm1, %v998_v33  ;;  %v978_v10 = vld [vmem:[%s4784_s8 + $0xea] sm:$0xff] }
  0xce   : > { %v1000_v20 = vpack.c.bf16 %v978_v10, %v977_v9 }
  0xd0   : > { %v840_v36 = vpop.f32.mrf.mxu2  ;;  %v474_v39 = vpop.f32.mrf.mxu0 }
  0xd1   : > { %v921_v38 = vadd.f32 %v840_v36, %v629_v34  ;;  %v1088_v40 = vpop.f32.mrf.mxu3  ;;  %v630_v41 = vpop.f32.mrf.mxu1  ;;  %v979_v34 = vld [vmem:[%s4784_s8 + $0xf2] sm:$0xff]  ;;  %v980_v36 = vld [vmem:[%s4784_s8 + $0xfa] sm:$0xff] }
  0xd2   : > { %v631_v42 = vadd.f32 %v630_v41, %v474_v39  ;;  %v383_v39 = vpack.c.bf16 %v362_v31, %v361_v30  ;;  %v1001_v46 = vpack.c.bf16 %v980_v36, %v979_v34  ;;  %v984_v30 = vld [vmem:[%s4784_s8 + $0x11a] sm:$0xff] }
  0xd3   : > { %v4920_v43 = vadd.f32 %v1088_v40, %v921_v38 }
  0xd8   : > { %v842_v50 = vpop.f32.mrf.mxu2  ;;  %v477_v54 = vpop.f32.mrf.mxu0 }
  0xd9   : > { %v922_v52 = vadd.f32 %v842_v50, %v631_v42  ;;  %v1090_v55 = vpop.f32.mrf.mxu3  ;;  %v633_v57 = vpop.f32.mrf.mxu1 }
  0xda   : > { %v634_v59 = vadd.f32 %v633_v57, %v477_v54  ;;  %v363_v57 = vld [vmem:[%s4784_s8 + $0xf1] sm:$0xff] }
  0xdb   : > { %v4928_v61 = vadd.f32 %v1090_v55, %v922_v52  ;;  %4130 = vmatmul.msk.bf16.gmra.mxu0 %vm389_vm1, %v381_v51 }
  0xdc   : > { %4148 = vmatmul.msk.bf16.gmra.mxu1 %vm389_vm1, %v326_v56 }
  0xdd   : > { %4167 = vmatmul.msk.bf16.gmra.mxu2 %vm389_vm1, %v998_v33  ;;  %4186 = vmatmul.msk.bf16.gmra.mxu3 %vm389_vm1, %v999_v58  ;;  %v307_v33 = vld [vmem:[%s4784_s8 + $0xe8] sm:$0xff] }
  0xde   : > { %v328_v44 = vpack.c.bf16 %v307_v33, %v306_v32  ;;  %v4230_v33 = vld [vmem:[%s6047_s1 + $0x18] sm:$0xf] }
  0xe0   : > { %v845_v62 = vpop.f32.mrf.mxu2  ;;  %v479_v0 = vpop.f32.mrf.mxu0 }
  0xe1   : > { %v923_v63 = vadd.f32 %v845_v62, %v634_v59  ;;  %v1093_v1 = vpop.f32.mrf.mxu3  ;;  %v635_v2 = vpop.f32.mrf.mxu1  ;;  %v308_v59 = vld [vmem:[%s4784_s8 + $0xf0] sm:$0xff]  ;;  %v309_v62 = vld [vmem:[%s4784_s8 + $0xf8] sm:$0xff] }
  0xe2   : > { %v636_v3 = vadd.f32 %v635_v2, %v479_v0  ;;  %v982_v0 = vld [vmem:[%s4784_s8 + $0x10a] sm:$0xff]  ;;  %v329_v7 = vpack.c.bf16 %v309_v62, %v308_v59 }
  0xe3   : > { %v4934_v4 = vadd.f32 %v1093_v1, %v923_v63  ;;  %v981_v63 = vld [vmem:[%s4784_s8 + $0x102] sm:$0xff]  ;;  %v367_v62 = vld [vmem:[%s4784_s8 + $0x111] sm:$0xff] }
  0xe4   : > { %v1002_v9 = vpack.c.bf16 %v982_v0, %v981_v63  ;;  %v368_v63 = vld [vmem:[%s4784_s8 + $0x119] sm:$0xff]  ;;  %v312_v0 = vld [vmem:[%s4784_s8 + $0x110] sm:$0xff] }
  0xe8   : > { %v847_v11 = vpop.f32.mrf.mxu2  ;;  %v482_v15 = vpop.f32.mrf.mxu0 }
  0xe9   : > { %v924_v14 = vadd.f32 %v847_v11, %v636_v3  ;;  %v1095_v16 = vpop.f32.mrf.mxu3  ;;  %v638_v18 = vpop.f32.mrf.mxu1 }
  0xea   : > { %v639_v21 = vadd.f32 %v638_v18, %v482_v15 }
  0xeb   : > { %v4942_v22 = vadd.f32 %v1095_v16, %v924_v14  ;;  %4131 = vmatmul.msk.bf16.gmra.mxu0 %vm389_vm1, %v382_v13  ;;  %v4192_v13 = vld [vmem:[%s6047_s1 + $0x10] sm:$0xf] }
  0xec   : > { %4149 = vmatmul.msk.bf16.gmra.mxu1 %vm389_vm1, %v327_v17  ;;  %v1310_v14 = vsel %vm444_vm0, %v4192_v13, 0 }
  0xed   : > { %4168 = vmatmul.msk.bf16.gmra.mxu2 %vm389_vm1, %v999_v58  ;;  %4187 = vmatmul.msk.bf16.gmra.mxu3 %vm389_vm1, %v1000_v20  ;;  %v364_v58 = vld [vmem:[%s4784_s8 + $0xf9] sm:$0xff] }
  0xee   : > { %v384_v2 = vpack.c.bf16 %v364_v58, %v363_v57  ;;  %1319 = vmatpush.bf16.msrb.mxu0 %v1310_v14 }
  0xf0   : > { %v850_v23 = vpop.f32.mrf.mxu2  ;;  %v484_v25 = vpop.f32.mrf.mxu0 }
  0xf1   : > { %v925_v24 = vadd.f32 %v850_v23, %v639_v21  ;;  %v1098_v26 = vpop.f32.mrf.mxu3  ;;  %v640_v27 = vpop.f32.mrf.mxu1 }
  0xf2   : > { %v641_v28 = vadd.f32 %v640_v27, %v484_v25  ;;  %v366_v25 = vld [vmem:[%s4784_s8 + $0x109] sm:$0xff] }
  0xf3   : > { %v4948_v29 = vadd.f32 %v1098_v26, %v925_v24  ;;  %v365_v24 = vld [vmem:[%s4784_s8 + $0x101] sm:$0xff] }
  0xf4   : > { %v310_v26 = vld [vmem:[%s4784_s8 + $0x100] sm:$0xff]  ;;  %v311_v27 = vld [vmem:[%s4784_s8 + $0x108] sm:$0xff]  ;;  %v385_v32 = vpack.c.bf16 %v366_v25, %v365_v24 }
  0xf8   : > { %v852_v38 = vpop.f32.mrf.mxu2  ;;  %v487_v41 = vpop.f32.mrf.mxu0 }
  0xf9   : > { %v926_v40 = vadd.f32 %v852_v38, %v641_v28  ;;  %v1100_v42 = vpop.f32.mrf.mxu3  ;;  %v643_v45 = vpop.f32.mrf.mxu1  ;;  %v983_v28 = vld [vmem:[%s4784_s8 + $0x112] sm:$0xff] }
  0xfa   : > { %v644_v47 = vadd.f32 %v643_v45, %v487_v41  ;;  %v4249_v45 = vld [vmem:[%s6047_s1 + $0x1c] sm:$0xf] }
  0xfb   : > { %v4956_v48 = vadd.f32 %v1100_v42, %v926_v40  ;;  %4132 = vmatmul.msk.bf16.gmra.mxu0 %vm389_vm1, %v383_v39  ;;  %v330_v39 = vpack.c.bf16 %v311_v27, %v310_v26  ;;  %v1806_v40 = vsel %vm444_vm0, %v4230_v33, 0  ;;  %v1003_v42 = vpack.c.bf16 %v984_v30, %v983_v28  ;;  %v1199_v27 = vld [vmem:[%s4784_s8 + $0x13] sm:$0xff]  ;;  %v1200_v28 = vld [vmem:[%s4784_s8 + $0x1b] sm:$0xff]  ;;  %v1695_v30 = vld [vmem:[%s4784_s8 + $0x24] sm:$0xff] }
  0xfc   : > { %4150 = vmatmul.msk.bf16.gmra.mxu1 %vm389_vm1, %v328_v44  ;;  %1815 = vmatpush.bf16.msrb.mxu2 %v1806_v40  ;;  %v4211_v44 = vld [vmem:[%s6047_s1 + $0x14] sm:$0xf]  ;;  %v1448_v33 = vld [vmem:[%s4784_s8 + $0x1c] sm:$0xff] }
  0xfd   : > { %4169 = vmatmul.msk.bf16.gmra.mxu2 %vm389_vm1, %v1000_v20  ;;  %4188 = vmatmul.msk.bf16.gmra.mxu3 %vm389_vm1, %v1001_v46 }
 0x100   : > { %v855_v49 = vpop.f32.mrf.mxu2  ;;  %v489_v51 = vpop.f32.mrf.mxu0 }
 0x101   : > { %v927_v50 = vadd.f32 %v855_v49, %v644_v47  ;;  %v1103_v52 = vpop.f32.mrf.mxu3  ;;  %v645_v54 = vpop.f32.mrf.mxu1  ;;  %v1558_v49 = vsel %vm444_vm0, %v4211_v44, 0 }
 0x102   : > { %v646_v55 = vadd.f32 %v645_v54, %v489_v51  ;;  %1567 = vmatpush.bf16.msrb.mxu1 %v1558_v49 }
 0x103   : > { %v4962_v56 = vadd.f32 %v1103_v52, %v927_v50  ;;  %v2054_v50 = vsel %vm444_vm0, %v4249_v45, 0 }
 0x104   : > { %2063 = vmatpush.bf16.msrb.mxu3 %v2054_v50 }
 0x108   : > { %v857_v1 = vpop.f32.mrf.mxu2  ;;  %v492_v5 = vpop.f32.mrf.mxu0 }
 0x109   : > { %v928_v3 = vadd.f32 %v857_v1, %v646_v55  ;;  %v1105_v6 = vpop.f32.mrf.mxu3  ;;  %v648_v8 = vpop.f32.mrf.mxu1  ;;  %v313_v1 = vld [vmem:[%s4784_s8 + $0x118] sm:$0xff] }
 0x10a   : > { %v649_v10 = vadd.f32 %v648_v8, %v492_v5 }
 0x10b   : > { %v4970_v11 = vadd.f32 %v1105_v6, %v928_v3  ;;  %4133 = vmatmul.msk.bf16.gmra.mxu0 %vm389_vm1, %v384_v2  ;;  %v985_v2 = vld [vmem:[%s4784_s8 + $0x122] sm:$0xff]  ;;  %v986_v3 = vld [vmem:[%s4784_s8 + $0x12a] sm:$0xff]  ;;  %v386_v6 = vpack.c.bf16 %v368_v63, %v367_v62 }
 0x10c   : > { %4151 = vmatmul.msk.bf16.gmra.mxu1 %vm389_vm1, %v329_v7  ;;  %v1004_v14 = vpack.c.bf16 %v986_v3, %v985_v2  ;;  %v1697_v2 = vld [vmem:[%s4784_s8 + $0x34] sm:$0xff]  ;;  %v1698_v3 = vld [vmem:[%s4784_s8 + $0x3c] sm:$0xff] }
 0x10d   : > { %4170 = vmatmul.msk.bf16.gmra.mxu2 %vm389_vm1, %v1001_v46  ;;  %4189 = vmatmul.msk.bf16.gmra.mxu3 %vm389_vm1, %v1002_v9 }
 0x110   : > { %v860_v15 = vpop.f32.mrf.mxu2  ;;  %v494_v17 = vpop.f32.mrf.mxu0 }
 0x111   : > { %v929_v16 = vadd.f32 %v860_v15, %v649_v10  ;;  %v1108_v18 = vpop.f32.mrf.mxu3  ;;  %v650_v20 = vpop.f32.mrf.mxu1  ;;  %v331_v10 = vpack.c.bf16 %v313_v1, %v312_v0  ;;  %v1201_v0 = vld [vmem:[%s4784_s8 + $0x23] sm:$0xff]  ;;  %v1202_v1 = vld [vmem:[%s4784_s8 + $0x2b] sm:$0xff] }
 0x112   : > { %v651_v21 = vadd.f32 %v650_v20, %v494_v17 }
 0x113   : > { %v4980_v23 = vadd.f32 %v1108_v18, %v929_v16 }
 0x118   : > { %v862_v31 = vpop.f32.mrf.mxu2  ;;  %v497_v36 = vpop.f32.mrf.mxu0 }
 0x119   : > { %v930_v34 = vadd.f32 %v862_v31, %v651_v21  ;;  %v1110_v38 = vpop.f32.mrf.mxu3  ;;  %v653_v41 = vpop.f32.mrf.mxu1  ;;  %v1696_v31 = vld [vmem:[%s4784_s8 + $0x2c] sm:$0xff] }
 0x11a   : > { %v654_v46 = vadd.f32 %v653_v41, %v497_v36  ;;  %v1944_v36 = vld [vmem:[%s4784_s8 + $0x2d] sm:$0xff]  ;;  %v1731_v44 = vpack.c.bf16 %v1696_v31, %v1695_v30 }
 0x11b   : > { %v4998_v47 = vadd.f32 %v1110_v38, %v930_v34  ;;  %4134 = vmatmul.msk.bf16.gmra.mxu0 %vm389_vm1, %v385_v32  ;;  %v1447_v32 = vld [vmem:[%s4784_s8 + $0x14] sm:$0xff]  ;;  %v1943_v34 = vld [vmem:[%s4784_s8 + $0x25] sm:$0xff] }
 0x11c   : > { %4152 = vmatmul.msk.bf16.gmra.mxu1 %vm389_vm1, %v330_v39  ;;  %v1235_v39 = vpack.c.bf16 %v1200_v28, %v1199_v27  ;;  %v1483_v45 = vpack.c.bf16 %v1448_v33, %v1447_v32  ;;  %v1979_v49 = vpack.c.bf16 %v1944_v36, %v1943_v34  ;;  %v1203_v32 = vld [vmem:[%s4784_s8 + $0x33] sm:$0xff]  ;;  %v1204_v33 = vld [vmem:[%s4784_s8 + $0x3b] sm:$0xff]  ;;  %v1699_v34 = vld [vmem:[%s4784_s8 + $0x44] sm:$0xff] }
 0x11d   : > { %4171 = vmatmul.msk.bf16.gmra.mxu2 %vm389_vm1, %v1002_v9  ;;  %4190 = vmatmul.msk.bf16.gmra.mxu3 %vm389_vm1, %v1003_v42  ;;  %v1700_v36 = vld [vmem:[%s4784_s8 + $0x4c] sm:$0xff] }
 0x120   : > { %v865_v51 = vpop.f32.mrf.mxu2  ;;  %v499_v54 = vpop.f32.mrf.mxu0 }
 0x121   : > { %v931_v52 = vadd.f32 %v865_v51, %v654_v46  ;;  %v1113_v55 = vpop.f32.mrf.mxu3  ;;  %v655_v57 = vpop.f32.mrf.mxu1 }
 0x122   : > { %v656_v58 = vadd.f32 %v655_v57, %v499_v54 }
 0x123   : > { %v5006_v59 = vadd.f32 %v1113_v55, %v931_v52 }
 0x128   : > { %v867_v5 = vpop.f32.mrf.mxu2  ;;  %v502_v8 = vpop.f32.mrf.mxu0 }
 0x129   : > { %v932_v7 = vadd.f32 %v867_v5, %v656_v58  ;;  %v1115_v9 = vpop.f32.mrf.mxu3  ;;  %v658_v13 = vpop.f32.mrf.mxu1  ;;  %v1945_v5 = vld [vmem:[%s4784_s8 + $0x35] sm:$0xff] }
 0x12a   : > { %v659_v15 = vadd.f32 %v658_v13, %v502_v8  ;;  %v1236_v8 = vpack.c.bf16 %v1202_v1, %v1201_v0 }
 0x12b   : > { %v5014_v16 = vadd.f32 %v1115_v9, %v932_v7  ;;  %4135 = vmatmul.msk.bf16.gmra.mxu0 %vm389_vm1, %v386_v6  ;;  %v1946_v6 = vld [vmem:[%s4784_s8 + $0x3d] sm:$0xff] }
 0x12c   : > { %4153 = vmatmul.msk.bf16.gmra.mxu1 %vm389_vm1, %v331_v10 }
 0x12d   : > { %4172 = vmatmul.msk.bf16.gmra.mxu2 %vm389_vm1, %v1003_v42  ;;  %4191 = vmatmul.msk.bf16.gmra.mxu3 %vm389_vm1, %v1004_v14  ;;  %v1732_v14 = vpack.c.bf16 %v1698_v3, %v1697_v2  ;;  %v1205_v3 = vld [vmem:[%s4784_s8 + $0x43] sm:$0xff] }
 0x130   : > { %v870_v17 = vpop.f32.mrf.mxu2  ;;  %v504_v20 = vpop.f32.mrf.mxu0 }
 0x131   : > { %v933_v18 = vadd.f32 %v870_v17, %v659_v15  ;;  %v1118_v21 = vpop.f32.mrf.mxu3  ;;  %v660_v24 = vpop.f32.mrf.mxu1  ;;  %v1980_v17 = vpack.c.bf16 %v1946_v6, %v1945_v5  ;;  %v1206_v5 = vld [vmem:[%s4784_s8 + $0x4b] sm:$0xff]  ;;  %v1701_v6 = vld [vmem:[%s4784_s8 + $0x54] sm:$0xff] }
 0x132   : > { %v661_v25 = vadd.f32 %v660_v24, %v504_v20 }
 0x133   : > { %v5020_v26 = vadd.f32 %v1118_v21, %v933_v18 }
 0x138   : > { %v872_v38 = vpop.f32.mrf.mxu2  ;;  %v507_v41 = vpop.f32.mrf.mxu0 }
 0x139   : > { %v934_v40 = vadd.f32 %v872_v38, %v661_v25  ;;  %v1120_v42 = vpop.f32.mrf.mxu3  ;;  %v663_v46 = vpop.f32.mrf.mxu1  ;;  %v1947_v38 = vld [vmem:[%s4784_s8 + $0x45] sm:$0xff] }
 0x13a   : > { %v664_v50 = vadd.f32 %v663_v46, %v507_v41  ;;  %v1237_v41 = vpack.c.bf16 %v1204_v33, %v1203_v32  ;;  %v1733_v46 = vpack.c.bf16 %v1700_v36, %v1699_v34 }
 0x13b   : > { %v5030_v51 = vadd.f32 %v1120_v42, %v934_v40  ;;  %4193 = vmatmul.msk.bf16.vlgmr.msrb.gmra.mxu0 %vm389_vm1, %v1235_v39  ;;  %v1948_v39 = vld [vmem:[%s4784_s8 + $0x4d] sm:$0xff] }
 0x13c   : > { %4212 = vmatmul.msk.bf16.vlgmr.msrb.gmra.mxu1 %vm389_vm1, %v1483_v45 }
 0x13d   : > { %4231 = vmatmul.msk.bf16.vlgmr.msrb.gmra.mxu2 %vm389_vm1, %v1731_v44  ;;  %4250 = vmatmul.msk.bf16.vlgmr.msrb.gmra.mxu3 %vm389_vm1, %v1979_v49 }
 0x140   : > { %v875_v52 = vpop.f32.mrf.mxu2  ;;  %v509_v55 = vpop.f32.mrf.mxu0 }
 0x141   : > { %v935_v54 = vadd.f32 %v875_v52, %v664_v50  ;;  %v1123_v57 = vpop.f32.mrf.mxu3  ;;  %v665_v58 = vpop.f32.mrf.mxu1  ;;  %v1981_v50 = vpack.c.bf16 %v1948_v39, %v1947_v38  ;;  %v1207_v39 = vld [vmem:[%s4784_s8 + $0x53] sm:$0xff] }
 0x142   : > { %v666_v62 = vadd.f32 %v665_v58, %v509_v55 }
 0x143   : > { %v5036_v63 = vadd.f32 %v1123_v57, %v935_v54 }
 0x148   : > { %v877_v7 = vpop.f32.mrf.mxu2  ;;  %v512_v10 = vpop.f32.mrf.mxu0 }
 0x149   : > { %v936_v9 = vadd.f32 %v877_v7, %v666_v62  ;;  %v1125_v13 = vpop.f32.mrf.mxu3  ;;  %v668_v15 = vpop.f32.mrf.mxu1  ;;  %v1702_v7 = vld [vmem:[%s4784_s8 + $0x5c] sm:$0xff] }
 0x14a   : > { %v669_v18 = vadd.f32 %v668_v15, %v512_v10 }
 0x14b   : > { %v5044_v20 = vadd.f32 %v1125_v13, %v936_v9  ;;  %4194 = vmatmul.msk.bf16.gmra.mxu0 %vm389_vm1, %v1236_v8  ;;  %v1949_v8 = vld [vmem:[%s4784_s8 + $0x55] sm:$0xff]  ;;  %v1950_v9 = vld [vmem:[%s4784_s8 + $0x5d] sm:$0xff]  ;;  %v1238_v13 = vpack.c.bf16 %v1206_v5, %v1205_v3 }
 0x14c   : > { %4213 = vmatmul.msk.bf16.gmra.mxu1 %vm389_vm1, %v1731_v44 }
 0x14d   : > { %4232 = vmatmul.msk.bf16.gmra.mxu2 %vm389_vm1, %v1732_v14  ;;  %4251 = vmatmul.msk.bf16.gmra.mxu3 %vm389_vm1, %v1980_v17 }
 0x150   : > { %v880_v21 = vpop.f32.mrf.mxu2  ;;  %v514_v25 = vpop.f32.mrf.mxu0 }
 0x151   : > { %v937_v24 = vadd.f32 %v880_v21, %v669_v18  ;;  %v1128_v27 = vpop.f32.mrf.mxu3  ;;  %v670_v28 = vpop.f32.mrf.mxu1  ;;  %v1734_v18 = vpack.c.bf16 %v1702_v7, %v1701_v6 }
 0x152   : > { %v671_v30 = vadd.f32 %v670_v28, %v514_v25 }
 0x153   : > { %v5050_v31 = vadd.f32 %v1128_v27, %v937_v24  ;;  %v1982_v24 = vpack.c.bf16 %v1950_v9, %v1949_v8 }
 0x158   : > { %v882_v40 = vpop.f32.mrf.mxu2  ;;  %v517_v44 = vpop.f32.mrf.mxu0 }
 0x159   : > { %v938_v42 = vadd.f32 %v882_v40, %v671_v30  ;;  %v1130_v45 = vpop.f32.mrf.mxu3  ;;  %v673_v49 = vpop.f32.mrf.mxu1  ;;  %v1208_v40 = vld [vmem:[%s4784_s8 + $0x5b] sm:$0xff] }
 0x15a   : > { %v674_v52 = vadd.f32 %v673_v49, %v517_v44  ;;  %v1951_v44 = vld [vmem:[%s4784_s8 + $0x65] sm:$0xff] }
 0x15b   : > { %v5058_v54 = vadd.f32 %v1130_v45, %v938_v42  ;;  %4195 = vmatmul.msk.bf16.gmra.mxu0 %vm389_vm1, %v1237_v41  ;;  %v1703_v41 = vld [vmem:[%s4784_s8 + $0x64] sm:$0xff]  ;;  %v1704_v42 = vld [vmem:[%s4784_s8 + $0x6c] sm:$0xff] }
 0x15c   : > { %4214 = vmatmul.msk.bf16.gmra.mxu1 %vm389_vm1, %v1732_v14  ;;  %v1952_v45 = vld [vmem:[%s4784_s8 + $0x6d] sm:$0xff] }
 0x15d   : > { %4233 = vmatmul.msk.bf16.gmra.mxu2 %vm389_vm1, %v1733_v46  ;;  %4252 = vmatmul.msk.bf16.gmra.mxu3 %vm389_vm1, %v1981_v50  ;;  %v1239_v50 = vpack.c.bf16 %v1208_v40, %v1207_v39 }
 0x160   : > { %v885_v55 = vpop.f32.mrf.mxu2  ;;  %v519_v58 = vpop.f32.mrf.mxu0 }
 0x161   : > { %v939_v57 = vadd.f32 %v885_v55, %v674_v52  ;;  %v1133_v62 = vpop.f32.mrf.mxu3  ;;  %v675_v0 = vpop.f32.mrf.mxu1 }
 0x162   : > { %v676_v1 = vadd.f32 %v675_v0, %v519_v58 }
 0x163   : > { %v5064_v2 = vadd.f32 %v1133_v62, %v939_v57  ;;  %v1735_v57 = vpack.c.bf16 %v1704_v42, %v1703_v41  ;;  %v1983_v62 = vpack.c.bf16 %v1952_v45, %v1951_v44 }
 0x168   : > { %v887_v10 = vpop.f32.mrf.mxu2  ;;  %v522_v14 = vpop.f32.mrf.mxu0 }
 0x169   : > { %v940_v15 = vadd.f32 %v887_v10, %v676_v1  ;;  %v1135_v17 = vpop.f32.mrf.mxu3  ;;  %v678_v21 = vpop.f32.mrf.mxu1 }
 0x16a   : > { %v679_v25 = vadd.f32 %v678_v21, %v522_v14  ;;  %v1705_v14 = vld [vmem:[%s4784_s8 + $0x74] sm:$0xff] }
 0x16b   : > { %v5072_v27 = vadd.f32 %v1135_v17, %v940_v15  ;;  %4196 = vmatmul.msk.bf16.gmra.mxu0 %vm389_vm1, %v1238_v13  ;;  %v1209_v13 = vld [vmem:[%s4784_s8 + $0x63] sm:$0xff]  ;;  %v1210_v15 = vld [vmem:[%s4784_s8 + $0x6b] sm:$0xff]  ;;  %v1953_v21 = vld [vmem:[%s4784_s8 + $0x75] sm:$0xff] }
 0x16c   : > { %4215 = vmatmul.msk.bf16.gmra.mxu1 %vm389_vm1, %v1733_v46  ;;  %v1706_v17 = vld [vmem:[%s4784_s8 + $0x7c] sm:$0xff] }
 0x16d   : > { %4234 = vmatmul.msk.bf16.gmra.mxu2 %vm389_vm1, %v1734_v18  ;;  %4253 = vmatmul.msk.bf16.gmra.mxu3 %vm389_vm1, %v1982_v24  ;;  %v1954_v24 = vld [vmem:[%s4784_s8 + $0x7d] sm:$0xff] }
 0x170   : > { %v890_v28 = vpop.f32.mrf.mxu2  ;;  %v524_v32 = vpop.f32.mrf.mxu0 }
 0x171   : > { %v941_v30 = vadd.f32 %v890_v28, %v679_v25  ;;  %v1138_v33 = vpop.f32.mrf.mxu3  ;;  %v680_v34 = vpop.f32.mrf.mxu1  ;;  %v1240_v28 = vpack.c.bf16 %v1210_v15, %v1209_v13 }
 0x172   : > { %v681_v36 = vadd.f32 %v680_v34, %v524_v32 }
 0x173   : > { %v5078_v38 = vadd.f32 %v1138_v33, %v941_v30  ;;  %v1736_v33 = vpack.c.bf16 %v1706_v17, %v1705_v14 }
 0x178   : > { %v892_v49 = vpop.f32.mrf.mxu2  ;;  %v527_v46 = vpop.f32.mrf.mxu0 }
 0x179   : > { %v942_v52 = vadd.f32 %v892_v49, %v681_v36  ;;  %v1140_v55 = vpop.f32.mrf.mxu3  ;;  %v683_v58 = vpop.f32.mrf.mxu1  ;;  %v1984_v36 = vpack.c.bf16 %v1954_v24, %v1953_v21 }
 0x17a   : > { %v684_v0 = vadd.f32 %v683_v58, %v527_v46  ;;  %v1211_v46 = vld [vmem:[%s4784_s8 + $0x73] sm:$0xff]  ;;  %v1707_v58 = vld [vmem:[%s4784_s8 + $0x84] sm:$0xff] }
 0x17b   : > { %v5086_v1 = vadd.f32 %v1140_v55, %v942_v52  ;;  %4197 = vmatmul.msk.bf16.gmra.mxu0 %vm389_vm1, %v1239_v50  ;;  %v1212_v55 = vld [vmem:[%s4784_s8 + $0x7b] sm:$0xff] }
 0x17c   : > { %4216 = vmatmul.msk.bf16.gmra.mxu1 %vm389_vm1, %v1734_v18 }
 0x17d   : > { %4235 = vmatmul.msk.bf16.gmra.mxu2 %vm389_vm1, %v1735_v57  ;;  %4254 = vmatmul.msk.bf16.gmra.mxu3 %vm389_vm1, %v1983_v62  ;;  %v1708_v62 = vld [vmem:[%s4784_s8 + $0x8c] sm:$0xff] }
 0x180   : > { %v895_v3 = vpop.f32.mrf.mxu2  ;;  %v529_v6 = vpop.f32.mrf.mxu0 }
 0x181   : > { %v943_v5 = vadd.f32 %v895_v3, %v684_v0  ;;  %v1143_v7 = vpop.f32.mrf.mxu3  ;;  %v685_v8 = vpop.f32.mrf.mxu1  ;;  %v1955_v0 = vld [vmem:[%s4784_s8 + $0x85] sm:$0xff]  ;;  %v1956_v3 = vld [vmem:[%s4784_s8 + $0x8d] sm:$0xff] }
 0x182   : > { %v686_v9 = vadd.f32 %v685_v8, %v529_v6  ;;  %v1241_v6 = vpack.c.bf16 %v1212_v55, %v1211_v46  ;;  %v1985_v15 = vpack.c.bf16 %v1956_v3, %v1955_v0 }
 0x183   : > { %v5092_v10 = vadd.f32 %v1143_v7, %v943_v5 }
 0x188   : > { %v897_v25 = vpop.f32.mrf.mxu2  ;;  %v532_v18 = vpop.f32.mrf.mxu0 }
 0x189   : > { %v944_v30 = vadd.f32 %v897_v25, %v686_v9  ;;  %v1145_v32 = vpop.f32.mrf.mxu3  ;;  %v688_v34 = vpop.f32.mrf.mxu1  ;;  %v1737_v9 = vpack.c.bf16 %v1708_v62, %v1707_v58 }
 0x18a   : > { %v689_v39 = vadd.f32 %v688_v34, %v532_v18  ;;  %v1213_v34 = vld [vmem:[%s4784_s8 + $0x83] sm:$0xff] }
 0x18b   : > { %v5100_v40 = vadd.f32 %v1145_v32, %v944_v30  ;;  %4198 = vmatmul.msk.bf16.gmra.mxu0 %vm389_vm1, %v1240_v28 }
 0x18c   : > { %4217 = vmatmul.msk.bf16.gmra.mxu1 %vm389_vm1, %v1735_v57 }
 0x18d   : > { %4236 = vmatmul.msk.bf16.gmra.mxu2 %vm389_vm1, %v1736_v33  ;;  %4255 = vmatmul.msk.bf16.gmra.mxu3 %vm389_vm1, %v1984_v36  ;;  %v1214_v36 = vld [vmem:[%s4784_s8 + $0x8b] sm:$0xff] }
 0x190   : > { %v900_v41 = vpop.f32.mrf.mxu2  ;;  %v534_v44 = vpop.f32.mrf.mxu0 }
 0x191   : > { %v945_v42 = vadd.f32 %v900_v41, %v689_v39  ;;  %v1148_v45 = vpop.f32.mrf.mxu3  ;;  %v690_v49 = vpop.f32.mrf.mxu1  ;;  %v1709_v39 = vld [vmem:[%s4784_s8 + $0x94] sm:$0xff]  ;;  %v1710_v41 = vld [vmem:[%s4784_s8 + $0x9c] sm:$0xff] }
 0x192   : > { %v691_v50 = vadd.f32 %v690_v49, %v534_v44  ;;  %v1958_v44 = vld [vmem:[%s4784_s8 + $0x9d] sm:$0xff]  ;;  %v1242_v49 = vpack.c.bf16 %v1214_v36, %v1213_v34  ;;  %v1738_v55 = vpack.c.bf16 %v1710_v41, %v1709_v39 }
 0x193   : > { %v5106_v52 = vadd.f32 %v1148_v45, %v945_v42  ;;  %v1957_v42 = vld [vmem:[%s4784_s8 + $0x95] sm:$0xff] }
 0x194   : > { %v1986_v62 = vpack.c.bf16 %v1958_v44, %v1957_v42 }
 0x198   : > { %v902_v5 = vpop.f32.mrf.mxu2  ;;  %v537_v57 = vpop.f32.mrf.mxu0 }
 0x199   : > { %v946_v7 = vadd.f32 %v902_v5, %v691_v50  ;;  %v1150_v8 = vpop.f32.mrf.mxu3  ;;  %v693_v13 = vpop.f32.mrf.mxu1 }
 0x19a   : > { %v694_v14 = vadd.f32 %v693_v13, %v537_v57 }
 0x19b   : > { %v5114_v17 = vadd.f32 %v1150_v8, %v946_v7  ;;  %4199 = vmatmul.msk.bf16.gmra.mxu0 %vm389_vm1, %v1241_v6 }
 0x19c   : > { %4218 = vmatmul.msk.bf16.gmra.mxu1 %vm389_vm1, %v1736_v33 }
 0x19d   : > { %4237 = vmatmul.msk.bf16.gmra.mxu2 %vm389_vm1, %v1737_v9  ;;  %4256 = vmatmul.msk.bf16.gmra.mxu3 %vm389_vm1, %v1985_v15 }
 0x1a0   : > { %v905_v21 = vpop.f32.mrf.mxu2  ;;  %v539_v25 = vpop.f32.mrf.mxu0 }
 0x1a1   : > { %v947_v24 = vadd.f32 %v905_v21, %v694_v14  ;;  %v1153_v28 = vpop.f32.mrf.mxu3  ;;  %v695_v30 = vpop.f32.mrf.mxu1  ;;  %v1215_v14 = vld [vmem:[%s4784_s8 + $0x93] sm:$0xff]  ;;  %v1216_v21 = vld [vmem:[%s4784_s8 + $0x9b] sm:$0xff] }
 0x1a2   : > { %v696_v18 = vadd.f32 %v695_v30, %v539_v25  ;;  %v1712_v25 = vld [vmem:[%s4784_s8 + $0xac] sm:$0xff]  ;;  %v1243_v34 = vpack.c.bf16 %v1216_v21, %v1215_v14  ;;  %v1961_v14 = vld [vmem:[%s4784_s8 + $0xb5] sm:$0xff]  ;;  %v1962_v21 = vld [vmem:[%s4784_s8 + $0xbd] sm:$0xff] }
 0x1a3   : > { %v5120_v32 = vadd.f32 %v1153_v28, %v947_v24  ;;  %v1711_v24 = vld [vmem:[%s4784_s8 + $0xa4] sm:$0xff]  ;;  %v1960_v30 = vld [vmem:[%s4784_s8 + $0xad] sm:$0xff] }
 0x1a4   : > { %v1959_v28 = vld [vmem:[%s4784_s8 + $0xa5] sm:$0xff]  ;;  %v1739_v41 = vpack.c.bf16 %v1712_v25, %v1711_v24 }
 0x1a8   : > { %v907_v45 = vpop.f32.mrf.mxu2  ;;  %v542_v33 = vpop.f32.mrf.mxu0 }
 0x1a9   : > { %v948_v50 = vadd.f32 %v907_v45, %v696_v18  ;;  %v1155_v46 = vpop.f32.mrf.mxu3  ;;  %v698_v58 = vpop.f32.mrf.mxu1  ;;  %v1987_v45 = vpack.c.bf16 %v1960_v30, %v1959_v28 }
 0x1aa   : > { %v699_v0 = vadd.f32 %v698_v58, %v542_v33 }
 0x1ab   : > { %v5128_v3 = vadd.f32 %v1155_v46, %v948_v50  ;;  %4200 = vmatmul.msk.bf16.gmra.mxu0 %vm389_vm1, %v1242_v49 }
 0x1ac   : > { %4219 = vmatmul.msk.bf16.gmra.mxu1 %vm389_vm1, %v1737_v9 }
 0x1ad   : > { %4238 = vmatmul.msk.bf16.gmra.mxu2 %vm389_vm1, %v1738_v55  ;;  %4257 = vmatmul.msk.bf16.gmra.mxu3 %vm389_vm1, %v1986_v62 }
 0x1b0   : > { %v910_v5 = vpop.f32.mrf.mxu2  ;;  %v544_v7 = vpop.f32.mrf.mxu0 }
 0x1b1   : > { %v949_v6 = vadd.f32 %v910_v5, %v699_v0  ;;  %v1158_v57 = vpop.f32.mrf.mxu3  ;;  %v700_v8 = vpop.f32.mrf.mxu1 }
 0x1b2   : > { %v701_v13 = vadd.f32 %v700_v8, %v544_v7  ;;  %v1217_v7 = vld [vmem:[%s4784_s8 + $0xa3] sm:$0xff]  ;;  %v1713_v8 = vld [vmem:[%s4784_s8 + $0xb4] sm:$0xff] }
 0x1b3   : > { %v5134_v15 = vadd.f32 %v1158_v57, %v949_v6  ;;  %v1218_v57 = vld [vmem:[%s4784_s8 + $0xab] sm:$0xff] }
 0x1b8   : > { %v912_v18 = vpop.f32.mrf.mxu2  ;;  %v1321_v39 = vpop.f32.mrf.mxu0 }
 0x1b9   : > { %v950_v36 = vadd.f32 %v912_v18, %v701_v13  ;;  %v1160_v9 = vpop.f32.mrf.mxu3  ;;  %v1411_v42 = vadd.f32 %v1321_v39, %v4878_v37  ;;  %v1569_v44 = vpop.f32.mrf.mxu1  ;;  %v1714_v13 = vld [vmem:[%s4784_s8 + $0xbc] sm:$0xff] }
 0x1ba   : > { %v1740_v18 = vpack.c.bf16 %v1714_v13, %v1713_v8 }
 0x1bb   : > { %v5143_v49 = vadd.f32 %v1160_v9, %v950_v36  ;;  %v1659_v50 = vadd.f32 %v1569_v44, %v1411_v42  ;;  %4201 = vmatmul.msk.bf16.gmra.mxu0 %vm389_vm1, %v1243_v34 }
 0x1bc   : > { %4220 = vmatmul.msk.bf16.gmra.mxu1 %vm389_vm1, %v1738_v55  ;;  %v1244_v55 = vpack.c.bf16 %v1218_v57, %v1217_v7  ;;  %v1963_v7 = vld [vmem:[%s4784_s8 + $0xc5] sm:$0xff]  ;;  %v1964_v57 = vld [vmem:[%s4784_s8 + $0xcd] sm:$0xff] }
 0x1bd   : > { %4239 = vmatmul.msk.bf16.gmra.mxu2 %vm389_vm1, %v1739_v41  ;;  %4258 = vmatmul.msk.bf16.gmra.mxu3 %vm389_vm1, %v1987_v45 }
 0x1c0   : > { %v1817_v37 = vpop.f32.mrf.mxu2  ;;  %v1323_v46 = vpop.f32.mrf.mxu0 }
 0x1c1   : > { %v1907_v33 = vadd.f32 %v1817_v37, %v1659_v50  ;;  %v2065_v58 = vpop.f32.mrf.mxu3  ;;  %v1412_v62 = vadd.f32 %v1323_v46, %v4886_v53  ;;  %v1571_v0 = vpop.f32.mrf.mxu1  ;;  %v1988_v53 = vpack.c.bf16 %v1962_v21, %v1961_v14 }
 0x1c3   : > { %v5150_v5 = vadd.f32 %v2065_v58, %v1907_v33  ;;  %v1660_v6 = vadd.f32 %v1571_v0, %v1412_v62  ;;  %v1219_v58 = vld [vmem:[%s4784_s8 + $0xb3] sm:$0xff]  ;;  %v1220_v62 = vld [vmem:[%s4784_s8 + $0xbb] sm:$0xff]  ;;  %v1715_v0 = vld [vmem:[%s4784_s8 + $0xc4] sm:$0xff] }
 0x1c8   : > { %v1819_v24 = vpop.f32.mrf.mxu2  ;;  %v1326_v28 = vpop.f32.mrf.mxu0 }
 0x1c9   : > { %v1908_v25 = vadd.f32 %v1819_v24, %v1660_v6  ;;  %v2067_v30 = vpop.f32.mrf.mxu3  ;;  %v1413_v34 = vadd.f32 %v1326_v28, %v4892_v60  ;;  %v1574_v36 = vpop.f32.mrf.mxu1  ;;  %v1716_v6 = vld [vmem:[%s4784_s8 + $0xcc] sm:$0xff] }
 0x1ca   : > { %v1741_v24 = vpack.c.bf16 %v1716_v6, %v1715_v0 }
 0x1cb   : > { %v5159_v9 = vadd.f32 %v2067_v30, %v1908_v25  ;;  %v1661_v39 = vadd.f32 %v1574_v36, %v1413_v34  ;;  %4202 = vmatmul.msk.bf16.gmra.mxu0 %vm389_vm1, %v1244_v55 }
 0x1cc   : > { %4221 = vmatmul.msk.bf16.gmra.mxu1 %vm389_vm1, %v1739_v41  ;;  %v1245_v41 = vpack.c.bf16 %v1220_v62, %v1219_v58  ;;  %v1965_v58 = vld [vmem:[%s4784_s8 + $0xd5] sm:$0xff]  ;;  %v1966_v62 = vld [vmem:[%s4784_s8 + $0xdd] sm:$0xff] }
 0x1cd   : > { %4240 = vmatmul.msk.bf16.gmra.mxu2 %vm389_vm1, %v1740_v18  ;;  %4259 = vmatmul.msk.bf16.gmra.mxu3 %vm389_vm1, %v1988_v53 }
 0x1d0   : > { %v1822_v60 = vpop.f32.mrf.mxu2  ;;  %v1328_v44 = vpop.f32.mrf.mxu0 }
 0x1d1   : > { %v1909_v42 = vadd.f32 %v1822_v60, %v1661_v39  ;;  %v2070_v45 = vpop.f32.mrf.mxu3  ;;  %v1414_v50 = vadd.f32 %v1328_v44, %v4900_v12  ;;  %v1576_v37 = vpop.f32.mrf.mxu1  ;;  %v1989_v12 = vpack.c.bf16 %v1964_v57, %v1963_v7 }
 0x1d3   : > { %v5166_v33 = vadd.f32 %v2070_v45, %v1909_v42  ;;  %v1662_v46 = vadd.f32 %v1576_v37, %v1414_v50  ;;  %v1221_v45 = vld [vmem:[%s4784_s8 + $0xc3] sm:$0xff]  ;;  %v1222_v50 = vld [vmem:[%s4784_s8 + $0xcb] sm:$0xff]  ;;  %v1717_v37 = vld [vmem:[%s4784_s8 + $0xd4] sm:$0xff] }
 0x1d8   : > { %v1824_v8 = vpop.f32.mrf.mxu2  ;;  %v1331_v14 = vpop.f32.mrf.mxu0 }
 0x1d9   : > { %v1910_v13 = vadd.f32 %v1824_v8, %v1662_v46  ;;  %v2072_v21 = vpop.f32.mrf.mxu3  ;;  %v1415_v55 = vadd.f32 %v1331_v14, %v4906_v19  ;;  %v1579_v25 = vpop.f32.mrf.mxu1  ;;  %v1718_v46 = vld [vmem:[%s4784_s8 + $0xdc] sm:$0xff] }
 0x1da   : > { %v1742_v8 = vpack.c.bf16 %v1718_v46, %v1717_v37 }
 0x1db   : > { %v5175_v28 = vadd.f32 %v2072_v21, %v1910_v13  ;;  %v1663_v30 = vadd.f32 %v1579_v25, %v1415_v55  ;;  %4203 = vmatmul.msk.bf16.gmra.mxu0 %vm389_vm1, %v1245_v41 }
 0x1dc   : > { %4222 = vmatmul.msk.bf16.gmra.mxu1 %vm389_vm1, %v1740_v18  ;;  %v1246_v18 = vpack.c.bf16 %v1222_v50, %v1221_v45  ;;  %v1967_v45 = vld [vmem:[%s4784_s8 + $0xe5] sm:$0xff]  ;;  %v1968_v50 = vld [vmem:[%s4784_s8 + $0xed] sm:$0xff] }
 0x1dd   : > { %4241 = vmatmul.msk.bf16.gmra.mxu2 %vm389_vm1, %v1741_v24  ;;  %4260 = vmatmul.msk.bf16.gmra.mxu3 %vm389_vm1, %v1989_v12 }
 0x1e0   : > { %v1827_v19 = vpop.f32.mrf.mxu2  ;;  %v1333_v36 = vpop.f32.mrf.mxu0 }
 0x1e1   : > { %v1911_v34 = vadd.f32 %v1827_v19, %v1663_v30  ;;  %v2075_v53 = vpop.f32.mrf.mxu3  ;;  %v1416_v39 = vadd.f32 %v1333_v36, %v4914_v35  ;;  %v1581_v60 = vpop.f32.mrf.mxu1  ;;  %v1990_v35 = vpack.c.bf16 %v1966_v62, %v1965_v58 }
 0x1e3   : > { %v5182_v42 = vadd.f32 %v2075_v53, %v1911_v34  ;;  %v1664_v44 = vadd.f32 %v1581_v60, %v1416_v39  ;;  %v1223_v53 = vld [vmem:[%s4784_s8 + $0xd3] sm:$0xff]  ;;  %v1224_v39 = vld [vmem:[%s4784_s8 + $0xdb] sm:$0xff]  ;;  %v1719_v60 = vld [vmem:[%s4784_s8 + $0xe4] sm:$0xff] }
 0x1e8   : > { %v1829_v0 = vpop.f32.mrf.mxu2  ;;  %v1336_v7 = vpop.f32.mrf.mxu0 }
 0x1e9   : > { %v1912_v6 = vadd.f32 %v1829_v0, %v1664_v44  ;;  %v2077_v57 = vpop.f32.mrf.mxu3  ;;  %v1417_v41 = vadd.f32 %v1336_v7, %v4920_v43  ;;  %v1584_v13 = vpop.f32.mrf.mxu1  ;;  %v1720_v44 = vld [vmem:[%s4784_s8 + $0xec] sm:$0xff] }
 0x1ea   : > { %v1743_v0 = vpack.c.bf16 %v1720_v44, %v1719_v60 }
 0x1eb   : > { %v5191_v14 = vadd.f32 %v2077_v57, %v1912_v6  ;;  %v1665_v21 = vadd.f32 %v1584_v13, %v1417_v41  ;;  %4204 = vmatmul.msk.bf16.gmra.mxu0 %vm389_vm1, %v1246_v18 }
 0x1ec   : > { %4223 = vmatmul.msk.bf16.gmra.mxu1 %vm389_vm1, %v1741_v24  ;;  %v1247_v24 = vpack.c.bf16 %v1224_v39, %v1223_v53  ;;  %v1969_v53 = vld [vmem:[%s4784_s8 + $0xf5] sm:$0xff]  ;;  %v1970_v39 = vld [vmem:[%s4784_s8 + $0xfd] sm:$0xff] }
 0x1ed   : > { %4242 = vmatmul.msk.bf16.gmra.mxu2 %vm389_vm1, %v1742_v8  ;;  %4261 = vmatmul.msk.bf16.gmra.mxu3 %vm389_vm1, %v1990_v35 }
 0x1f0   : > { %v1832_v43 = vpop.f32.mrf.mxu2  ;;  %v1338_v25 = vpop.f32.mrf.mxu0 }
 0x1f1   : > { %v1913_v55 = vadd.f32 %v1832_v43, %v1665_v21  ;;  %v2080_v12 = vpop.f32.mrf.mxu3  ;;  %v1418_v30 = vadd.f32 %v1338_v25, %v4928_v61  ;;  %v1586_v19 = vpop.f32.mrf.mxu1  ;;  %v1991_v61 = vpack.c.bf16 %v1968_v50, %v1967_v45 }
 0x1f3   : > { %v5198_v34 = vadd.f32 %v2080_v12, %v1913_v55  ;;  %v1666_v36 = vadd.f32 %v1586_v19, %v1418_v30  ;;  %v1225_v12 = vld [vmem:[%s4784_s8 + $0xe3] sm:$0xff]  ;;  %v1226_v30 = vld [vmem:[%s4784_s8 + $0xeb] sm:$0xff]  ;;  %v1721_v19 = vld [vmem:[%s4784_s8 + $0xf4] sm:$0xff] }
 0x1f8   : > { %v1834_v37 = vpop.f32.mrf.mxu2  ;;  %v1341_v58 = vpop.f32.mrf.mxu0 }
 0x1f9   : > { %v1914_v46 = vadd.f32 %v1834_v37, %v1666_v36  ;;  %v2082_v62 = vpop.f32.mrf.mxu3  ;;  %v1419_v18 = vadd.f32 %v1341_v58, %v4934_v4  ;;  %v1589_v6 = vpop.f32.mrf.mxu1  ;;  %v1722_v36 = vld [vmem:[%s4784_s8 + $0xfc] sm:$0xff] }
 0x1fa   : > { %v1744_v37 = vpack.c.bf16 %v1722_v36, %v1721_v19 }
 0x1fb   : > { %v5207_v7 = vadd.f32 %v2082_v62, %v1914_v46  ;;  %v1667_v57 = vadd.f32 %v1589_v6, %v1419_v18  ;;  %4205 = vmatmul.msk.bf16.gmra.mxu0 %vm389_vm1, %v1247_v24 }
 0x1fc   : > { %4224 = vmatmul.msk.bf16.gmra.mxu1 %vm389_vm1, %v1742_v8  ;;  %v1248_v8 = vpack.c.bf16 %v1226_v30, %v1225_v12  ;;  %v1971_v12 = vld [vmem:[%s4784_s8 + $0x105] sm:$0xff]  ;;  %v1972_v30 = vld [vmem:[%s4784_s8 + $0x10d] sm:$0xff] }
 0x1fd   : > { %4243 = vmatmul.msk.bf16.gmra.mxu2 %vm389_vm1, %v1743_v0  ;;  %4262 = vmatmul.msk.bf16.gmra.mxu3 %vm389_vm1, %v1991_v61 }
 0x200   : > { %v1837_v4 = vpop.f32.mrf.mxu2  ;;  %v1343_v13 = vpop.f32.mrf.mxu0 }
 0x201   : > { %v1915_v41 = vadd.f32 %v1837_v4, %v1667_v57  ;;  %v2085_v35 = vpop.f32.mrf.mxu3  ;;  %v1420_v21 = vadd.f32 %v1343_v13, %v4942_v22  ;;  %v1591_v43 = vpop.f32.mrf.mxu1  ;;  %v1992_v22 = vpack.c.bf16 %v1970_v39, %v1969_v53 }
 0x203   : > { %v5214_v55 = vadd.f32 %v2085_v35, %v1915_v41  ;;  %v1668_v25 = vadd.f32 %v1591_v43, %v1420_v21  ;;  %v1227_v35 = vld [vmem:[%s4784_s8 + $0xf3] sm:$0xff]  ;;  %v1228_v21 = vld [vmem:[%s4784_s8 + $0xfb] sm:$0xff]  ;;  %v1723_v43 = vld [vmem:[%s4784_s8 + $0x104] sm:$0xff] }
 0x204   : > { %v1249_v19 = vpack.c.bf16 %v1228_v21, %v1227_v35  ;;  %v1231_v35 = vld [vmem:[%s4784_s8 + $0x113] sm:$0xff]  ;;  %v1232_v21 = vld [vmem:[%s4784_s8 + $0x11b] sm:$0xff] }
 0x208   : > { %v1839_v60 = vpop.f32.mrf.mxu2  ;;  %v1346_v45 = vpop.f32.mrf.mxu0 }
 0x209   : > { %v1916_v44 = vadd.f32 %v1839_v60, %v1668_v25  ;;  %v2087_v50 = vpop.f32.mrf.mxu3  ;;  %v1421_v24 = vadd.f32 %v1346_v45, %v4948_v29  ;;  %v1594_v46 = vpop.f32.mrf.mxu1  ;;  %v1724_v25 = vld [vmem:[%s4784_s8 + $0x10c] sm:$0xff] }
 0x20a   : > { %v1745_v39 = vpack.c.bf16 %v1724_v25, %v1723_v43  ;;  %v1727_v43 = vld [vmem:[%s4784_s8 + $0x124] sm:$0xff]  ;;  %v1728_v25 = vld [vmem:[%s4784_s8 + $0x12c] sm:$0xff] }
 0x20b   : > { %v5223_v58 = vadd.f32 %v2087_v50, %v1916_v44  ;;  %v1669_v62 = vadd.f32 %v1594_v46, %v1421_v24  ;;  %4206 = vmatmul.msk.bf16.gmra.mxu0 %vm389_vm1, %v1248_v8  ;;  %v1993_v8 = vpack.c.bf16 %v1972_v30, %v1971_v12  ;;  %v1229_v24 = vld [vmem:[%s4784_s8 + $0x103] sm:$0xff]  ;;  %v1230_v46 = vld [vmem:[%s4784_s8 + $0x10b] sm:$0xff] }
 0x20c   : > { %4225 = vmatmul.msk.bf16.gmra.mxu1 %vm389_vm1, %v1743_v0  ;;  %v1975_v12 = vld [vmem:[%s4784_s8 + $0x125] sm:$0xff]  ;;  %v1976_v30 = vld [vmem:[%s4784_s8 + $0x12d] sm:$0xff] }
 0x20d   : > { %4244 = vmatmul.msk.bf16.gmra.mxu2 %vm389_vm1, %v1744_v37  ;;  %4263 = vmatmul.msk.bf16.gmra.mxu3 %vm389_vm1, %v1992_v22  ;;  %v1725_v22 = vld [vmem:[%s4784_s8 + $0x114] sm:$0xff] }
 0x210   : > { %v1842_v29 = vpop.f32.mrf.mxu2  ;;  %v1348_v6 = vpop.f32.mrf.mxu0 }
 0x211   : > { %v1917_v18 = vadd.f32 %v1842_v29, %v1669_v62  ;;  %v2090_v61 = vpop.f32.mrf.mxu3  ;;  %v1422_v57 = vadd.f32 %v1348_v6, %v4956_v48  ;;  %v1596_v4 = vpop.f32.mrf.mxu1  ;;  %v1973_v62 = vld [vmem:[%s4784_s8 + $0x115] sm:$0xff]  ;;  %v1974_v29 = vld [vmem:[%s4784_s8 + $0x11d] sm:$0xff] }
 0x213   : > { %v5230_v41 = vadd.f32 %v2090_v61, %v1917_v18  ;;  %v1670_v13 = vadd.f32 %v1596_v4, %v1422_v57  ;;  %v1250_v18 = vpack.c.bf16 %v1230_v46, %v1229_v24  ;;  %v4268_v57 = vld [vmem:[%s6047_s1 + $0x20] sm:$0xf]  ;;  %v1729_v24 = vld [vmem:[%s4784_s8 + $0x134] sm:$0xff] }
 0x214   : > { %v2302_v4 = vsel %vm444_vm0, %v4268_v57, 0  ;;  %v1977_v46 = vld [vmem:[%s4784_s8 + $0x135] sm:$0xff] }
 0x215   : > { %2311 = vmatpush.bf16.msra.mxu0 %v2302_v4  ;;  %v2192_v57 = vld [vmem:[%s4784_s8 + $0x2e] sm:$0xff] }
 0x218   : > { %v1844_v0 = vpop.f32.mrf.mxu2  ;;  %v1351_v53 = vpop.f32.mrf.mxu0 }
 0x219   : > { %v1918_v36 = vadd.f32 %v1844_v0, %v1670_v13  ;;  %v2092_v48 = vpop.f32.mrf.mxu3  ;;  %v5239_v60 = vadd.f32 %v1351_v53, %v4962_v56  ;;  %v1726_v56 = vld [vmem:[%s4784_s8 + $0x11c] sm:$0xff]  ;;  %v1251_v0 = vpack.c.bf16 %v1232_v21, %v1231_v35 }
 0x21a   : > { %v1746_v61 = vpack.c.bf16 %v1726_v56, %v1725_v22  ;;  %v1978_v22 = vld [vmem:[%s4784_s8 + $0x13d] sm:$0xff] }
 0x21b   : > { %v5241_v44 = vadd.f32 %v2092_v48, %v1918_v36  ;;  %4207 = vmatmul.msk.bf16.gmra.mxu0 %vm389_vm1, %v1249_v19  ;;  %v1747_v36 = vpack.c.bf16 %v1728_v25, %v1727_v43  ;;  %v2193_v43 = vld [vmem:[%s4784_s8 + $0x36] sm:$0xff]  ;;  %v2194_v25 = vld [vmem:[%s4784_s8 + $0x3e] sm:$0xff] }
 0x21c   : > { %4226 = vmatmul.msk.bf16.gmra.mxu1 %vm389_vm1, %v1744_v37 }
 0x21d   : > { %4245 = vmatmul.msk.bf16.gmra.mxu2 %vm389_vm1, %v1745_v39  ;;  %4264 = vmatmul.msk.bf16.gmra.mxu3 %vm389_vm1, %v1993_v8  ;;  %v1233_v8 = vld [vmem:[%s4784_s8 + $0x123] sm:$0xff] }
 0x220   : > { %v1353_v45 = vpop.f32.mrf.mxu0 }
 0x221   : > { %v5248_v50 = vadd.f32 %v1353_v45, %v4970_v11  ;;  %v1994_v11 = vpack.c.bf16 %v1974_v29, %v1973_v62  ;;  %v1234_v45 = vld [vmem:[%s4784_s8 + $0x12b] sm:$0xff] }
 0x222   : > { %v1252_v56 = vpack.c.bf16 %v1234_v45, %v1233_v8  ;;  %v2197_v45 = vld [vmem:[%s4784_s8 + $0x56] sm:$0xff] }
 0x228   : > { %v1356_v6 = vpop.f32.mrf.mxu0 }
 0x229   : > { %v5257_v37 = vadd.f32 %v1356_v6, %v4980_v23  ;;  %v1996_v6 = vpack.c.bf16 %v1978_v22, %v1977_v46 }
 0x22b   : > { %4208 = vmatmul.msk.bf16.gmra.mxu0 %vm389_vm1, %v1250_v18 }
 0x22c   : > { %4227 = vmatmul.msk.bf16.gmra.mxu1 %vm389_vm1, %v1745_v39 }
 0x22d   : > { %4246 = vmatmul.msk.bf16.gmra.mxu2 %vm389_vm1, %v1746_v61  ;;  %4265 = vmatmul.msk.bf16.gmra.mxu3 %vm389_vm1, %v1994_v11  ;;  %v2191_v11 = vld [vmem:[%s4784_s8 + $0x26] sm:$0xff] }
 0x230   : > { %v1358_v13 = vpop.f32.mrf.mxu0 }
 0x231   : > { %v5268_v23 = vadd.f32 %v1358_v13, %v4998_v47  ;;  %v1995_v47 = vpack.c.bf16 %v1976_v30, %v1975_v12 }
 0x238   : > { %v1361_v19 = vpop.f32.mrf.mxu0 }
 0x239   : > { %v5277_v53 = vadd.f32 %v1361_v19, %v5006_v59  ;;  %v1730_v59 = vld [vmem:[%s4784_s8 + $0x13c] sm:$0xff]  ;;  %v2195_v19 = vld [vmem:[%s4784_s8 + $0x46] sm:$0xff] }
 0x23a   : > { %v1748_v29 = vpack.c.bf16 %v1730_v59, %v1729_v24  ;;  %v2198_v24 = vld [vmem:[%s4784_s8 + $0x5e] sm:$0xff] }
 0x23b   : > { %4209 = vmatmul.msk.bf16.gmra.mxu0 %vm389_vm1, %v1251_v0 }
 0x23c   : > { %4228 = vmatmul.msk.bf16.gmra.mxu1 %vm389_vm1, %v1746_v61 }
 0x23d   : > { %4247 = vmatmul.msk.bf16.gmra.mxu2 %vm389_vm1, %v1747_v36  ;;  %4266 = vmatmul.msk.bf16.gmra.mxu3 %vm389_vm1, %v1995_v47 }
 0x240   : > { %v1363_v48 = vpop.f32.mrf.mxu0 }
 0x241   : > { %v5284_v39 = vadd.f32 %v1363_v48, %v5014_v16 }
 0x248   : > { %v1366_v62 = vpop.f32.mrf.mxu0 }
 0x249   : > { %v5293_v18 = vadd.f32 %v1366_v62, %v5020_v26  ;;  %v2227_v26 = vpack.c.bf16 %v2192_v57, %v2191_v11  ;;  %v2200_v62 = vld [vmem:[%s4784_s8 + $0x6e] sm:$0xff]  ;;  %v2201_v11 = vld [vmem:[%s4784_s8 + $0x76] sm:$0xff]  ;;  %v2202_v57 = vld [vmem:[%s4784_s8 + $0x7e] sm:$0xff] }
 0x24b   : > { %4210 = vmatmul.msk.bf16.gmra.mxu0 %vm389_vm1, %v1252_v56  ;;  %v2199_v56 = vld [vmem:[%s4784_s8 + $0x66] sm:$0xff] }
 0x24c   : > { %4229 = vmatmul.msk.bf16.gmra.mxu1 %vm389_vm1, %v1747_v36  ;;  %v2196_v36 = vld [vmem:[%s4784_s8 + $0x4e] sm:$0xff] }
 0x24d   : > { %4248 = vmatmul.msk.bf16.gmra.mxu2 %vm389_vm1, %v1748_v29  ;;  %4267 = vmatmul.msk.bf16.gmra.mxu3 %vm389_vm1, %v1996_v6 }
 0x250   : > { %v1368_v16 = vpop.f32.mrf.mxu0 }
 0x251   : > { %v5300_v61 = vadd.f32 %v1368_v16, %v5030_v51  ;;  %v2228_v51 = vpack.c.bf16 %v2194_v25, %v2193_v43  ;;  %v2203_v43 = vld [vmem:[%s4784_s8 + $0x86] sm:$0xff]  ;;  %v2204_v25 = vld [vmem:[%s4784_s8 + $0x8e] sm:$0xff] }
 0x258   : > { %v1371_v4 = vpop.f32.mrf.mxu0 }
 0x259   : > { %v5305_v13 = vadd.f32 %v1371_v4, %v5036_v63 }
 0x25b   : > { %4269 = vmatmul.msk.bf16.vlgmr.msra.gmra.mxu0 %vm389_vm1, %v2227_v26 }
 0x260   : > { %v1373_v35 = vpop.f32.mrf.mxu0 }
 0x261   : > { %v5309_v21 = vadd.f32 %v1373_v35, %v5044_v20  ;;  %v2229_v20 = vpack.c.bf16 %v2196_v36, %v2195_v19  ;;  %v2205_v19 = vld [vmem:[%s4784_s8 + $0x96] sm:$0xff]  ;;  %v2206_v36 = vld [vmem:[%s4784_s8 + $0x9e] sm:$0xff] }
 0x268   : > { %v1376_v12 = vpop.f32.mrf.mxu0 }
 0x269   : > { %v5314_v30 = vadd.f32 %v1376_v12, %v5050_v31 }
 0x26b   : > { %4270 = vmatmul.msk.bf16.gmra.mxu0 %vm389_vm1, %v2228_v51 }
 0x270   : > { %v1378_v0 = vpop.f32.mrf.mxu0 }
 0x271   : > { %v5318_v63 = vadd.f32 %v1378_v0, %v5058_v54  ;;  %v2230_v54 = vpack.c.bf16 %v2198_v24, %v2197_v45  ;;  %v2207_v45 = vld [vmem:[%s4784_s8 + $0xa6] sm:$0xff]  ;;  %v2208_v24 = vld [vmem:[%s4784_s8 + $0xae] sm:$0xff] }
 0x278   : > { %v1381_v47 = vpop.f32.mrf.mxu0 }
 0x279   : > { %v5323_v48 = vadd.f32 %v1381_v47, %v5064_v2 }
 0x27b   : > { %4271 = vmatmul.msk.bf16.gmra.mxu0 %vm389_vm1, %v2229_v20  ;;  %v2234_v20 = vpack.c.bf16 %v2206_v36, %v2205_v19 }
 0x280   : > { %v1383_v8 = vpop.f32.mrf.mxu0 }
 0x281   : > { %v5327_v31 = vadd.f32 %v1383_v8, %v5072_v27  ;;  %v2231_v27 = vpack.c.bf16 %v2200_v62, %v2199_v56  ;;  %v2210_v56 = vld [vmem:[%s4784_s8 + $0xbe] sm:$0xff] }
 0x288   : > { %v1386_v59 = vpop.f32.mrf.mxu0 }
 0x289   : > { %v5332_v46 = vadd.f32 %v1386_v59, %v5078_v38 }
 0x28b   : > { %4272 = vmatmul.msk.bf16.gmra.mxu0 %vm389_vm1, %v2230_v54  ;;  %v2235_v54 = vpack.c.bf16 %v2208_v24, %v2207_v45  ;;  %v2215_v24 = vld [vmem:[%s4784_s8 + $0xe6] sm:$0xff] }
 0x290   : > { %v1388_v22 = vpop.f32.mrf.mxu0 }
 0x291   : > { %v5336_v2 = vadd.f32 %v1388_v22, %v5086_v1  ;;  %v2232_v1 = vpack.c.bf16 %v2202_v57, %v2201_v11  ;;  %v2212_v11 = vld [vmem:[%s4784_s8 + $0xce] sm:$0xff] }
 0x298   : > { %v1391_v29 = vpop.f32.mrf.mxu0 }
 0x299   : > { %v5341_v6 = vadd.f32 %v1391_v29, %v5092_v10 }
 0x29b   : > { %4273 = vmatmul.msk.bf16.gmra.mxu0 %vm389_vm1, %v2231_v27 }
 0x2a0   : > { %v1393_v16 = vpop.f32.mrf.mxu0 }
 0x2a1   : > { %v5345_v38 = vadd.f32 %v1393_v16, %v5100_v40  ;;  %v2233_v40 = vpack.c.bf16 %v2204_v25, %v2203_v43  ;;  %v1847_v25 = vpop.f32.mrf.mxu2 }
 0x2a8   : > { %v1396_v26 = vpop.f32.mrf.mxu0 }
 0x2a9   : > { %v5350_v4 = vadd.f32 %v1396_v26, %v5106_v52 }
 0x2ab   : > { %4274 = vmatmul.msk.bf16.gmra.mxu0 %vm389_vm1, %v2232_v1 }
 0x2b0   : > { %v1398_v35 = vpop.f32.mrf.mxu0 }
 0x2b1   : > { %v5354_v10 = vadd.f32 %v1398_v35, %v5114_v17 }
 0x2b8   : > { %v1401_v51 = vpop.f32.mrf.mxu0 }
 0x2b9   : > { %v5359_v12 = vadd.f32 %v1401_v51, %v5120_v32  ;;  %v2095_v51 = vpop.f32.mrf.mxu3 }
 0x2bb   : > { %4275 = vmatmul.msk.bf16.gmra.mxu0 %vm389_vm1, %v2233_v40  ;;  %v2214_v40 = vld [vmem:[%s4784_s8 + $0xde] sm:$0xff] }
 0x2c0   : > { %v1403_v0 = vpop.f32.mrf.mxu0 }
 0x2c1   : > { %v5363_v52 = vadd.f32 %v1403_v0, %v5128_v3 }
 0x2c8   : > { %v1406_v17 = vpop.f32.mrf.mxu0 }
 0x2c9   : > { %v5368_v47 = vadd.f32 %v1406_v17, %v5134_v15  ;;  %v2097_v17 = vpop.f32.mrf.mxu3 }
 0x2cb   : > { %4276 = vmatmul.msk.bf16.gmra.mxu0 %vm389_vm1, %v2234_v20  ;;  %v1849_v20 = vpop.f32.mrf.mxu2 }
 0x2d0   : > { %v1408_v8 = vpop.f32.mrf.mxu0 }
 0x2d1   : > { %v5372_v32 = vadd.f32 %v1408_v8, %v5143_v49  ;;  %v2209_v49 = vld [vmem:[%s4784_s8 + $0xb6] sm:$0xff] }
 0x2d2   : > { %v2236_v62 = vpack.c.bf16 %v2210_v56, %v2209_v49 }
 0x2d8   : > { %v2313_v3 = vpop.f32.mrf.mxu0 }
 0x2d9   : > { %v2403_v59 = vadd.f32 %v2313_v3, %v5150_v5  ;;  %v1852_v3 = vpop.f32.mrf.mxu2 }
 0x2db   : > { %2440 = vst.msk [vmem:[#allocation2] sm:$0xff] %vm2439_vm2, %v2403_v59  ;;  %4277 = vmatmul.msk.bf16.gmra.mxu0 %vm389_vm1, %v2235_v54  ;;  %v2216_v54 = vld [vmem:[%s4784_s8 + $0xee] sm:$0xff] }
 0x2dc   : > { %v2239_v59 = vpack.c.bf16 %v2216_v54, %v2215_v24 }
 0x2e0   : > { %v2315_v15 = vpop.f32.mrf.mxu0 }
 0x2e1   : > { %v2404_v22 = vadd.f32 %v2315_v15, %v5159_v9  ;;  %v2211_v9 = vld [vmem:[%s4784_s8 + $0xc6] sm:$0xff]  ;;  %v1854_v56 = vpop.f32.mrf.mxu2 }
 0x2e2   : > { %v2237_v57 = vpack.c.bf16 %v2212_v11, %v2211_v9 }
 0x2e3   : > { %2441 = vst.msk [vmem:[#allocation2 + $0x8] sm:$0xff] %vm2439_vm2, %v2404_v22  ;;  %v2100_v22 = vpop.f32.mrf.mxu3 }
 0x2e8   : > { %v2318_v27 = vpop.f32.mrf.mxu0 }
 0x2e9   : > { %v2405_v29 = vadd.f32 %v2318_v27, %v5166_v33  ;;  %v1599_v33 = vpop.f32.mrf.mxu1 }
 0x2eb   : > { %2442 = vst.msk [vmem:[#allocation2 + $0x10] sm:$0xff] %vm2439_vm2, %v2405_v29  ;;  %4278 = vmatmul.msk.bf16.gmra.mxu0 %vm389_vm1, %v2236_v62  ;;  %v2102_v27 = vpop.f32.mrf.mxu3  ;;  %v2217_v29 = vld [vmem:[%s4784_s8 + $0xf6] sm:$0xff] }
 0x2f0   : > { %v2320_v5 = vpop.f32.mrf.mxu0 }
 0x2f1   : > { %v2406_v16 = vadd.f32 %v2320_v5, %v5175_v28  ;;  %v2213_v28 = vld [vmem:[%s4784_s8 + $0xd6] sm:$0xff]  ;;  %v1601_v36 = vpop.f32.mrf.mxu1  ;;  %v2218_v5 = vld [vmem:[%s4784_s8 + $0xfe] sm:$0xff] }
 0x2f2   : > { %v2238_v0 = vpack.c.bf16 %v2214_v40, %v2213_v28  ;;  %v1672_v24 = vadd.f32 %v1601_v36, %v5248_v50 }
 0x2f3   : > { %2443 = vst.msk [vmem:[#allocation2 + $0x18] sm:$0xff] %vm2439_vm2, %v2406_v16  ;;  %v2240_v16 = vpack.c.bf16 %v2218_v5, %v2217_v29  ;;  %v2222_v29 = vld [vmem:[%s4784_s8 + $0x11e] sm:$0xff] }
 0x2f8   : > { %v2323_v1 = vpop.f32.mrf.mxu0 }
 0x2f9   : > { %v2407_v26 = vadd.f32 %v2323_v1, %v5182_v42  ;;  %v1604_v45 = vpop.f32.mrf.mxu1  ;;  %v2105_v1 = vpop.f32.mrf.mxu3 }
 0x2fb   : > { %2444 = vst.msk [vmem:[#allocation2 + $0x20] sm:$0xff] %vm2439_vm2, %v2407_v26  ;;  %4279 = vmatmul.msk.bf16.gmra.mxu0 %vm389_vm1, %v2237_v57  ;;  %v1857_v57 = vpop.f32.mrf.mxu2 }
 0x300   : > { %v2325_v35 = vpop.f32.mrf.mxu0 }
 0x301   : > { %v2408_v43 = vadd.f32 %v2325_v35, %v5191_v14  ;;  %v1606_v49 = vpop.f32.mrf.mxu1 }
 0x303   : > { %2445 = vst.msk [vmem:[#allocation2 + $0x28] sm:$0xff] %vm2439_vm2, %v2408_v43  ;;  %v1859_v40 = vpop.f32.mrf.mxu2 }
 0x308   : > { %v2328_v19 = vpop.f32.mrf.mxu0 }
 0x309   : > { %v2409_v42 = vadd.f32 %v2328_v19, %v5198_v34  ;;  %v1609_v9 = vpop.f32.mrf.mxu1  ;;  %v2220_v19 = vld [vmem:[%s4784_s8 + $0x10e] sm:$0xff] }
 0x30b   : > { %2446 = vst.msk [vmem:[#allocation2 + $0x30] sm:$0xff] %vm2439_vm2, %v2409_v42  ;;  %4280 = vmatmul.msk.bf16.gmra.mxu0 %vm389_vm1, %v2238_v0  ;;  %v2219_v0 = vld [vmem:[%s4784_s8 + $0x106] sm:$0xff] }
 0x310   : > { %v2330_v14 = vpop.f32.mrf.mxu0 }
 0x311   : > { %v2410_v8 = vadd.f32 %v2330_v14, %v5207_v7  ;;  %v1611_v43 = vpop.f32.mrf.mxu1  ;;  %v2107_v14 = vpop.f32.mrf.mxu3 }
 0x313   : > { %2447 = vst.msk [vmem:[#allocation2 + $0x38] sm:$0xff] %vm2439_vm2, %v2410_v8 }
 0x318   : > { %v2333_v34 = vpop.f32.mrf.mxu0 }
 0x319   : > { %v2411_v15 = vadd.f32 %v2333_v34, %v5214_v55  ;;  %v1673_v34 = vadd.f32 %v1604_v45, %v5257_v37 }
 0x31b   : > { %2448 = vst.msk [vmem:[#allocation2 + $0x40] sm:$0xff] %vm2439_vm2, %v2411_v15  ;;  %4281 = vmatmul.msk.bf16.gmra.mxu0 %vm389_vm1, %v2239_v59  ;;  %v1920_v59 = vadd.f32 %v1849_v20, %v1672_v24  ;;  %v2110_v15 = vpop.f32.mrf.mxu3 }
 0x320   : > { %v2335_v7 = vpop.f32.mrf.mxu0 }
 0x321   : > { %v2412_v62 = vadd.f32 %v2335_v7, %v5223_v58  ;;  %v1671_v58 = vadd.f32 %v1599_v33, %v5239_v60  ;;  %v1614_v60 = vpop.f32.mrf.mxu1  ;;  %v2168_v33 = vadd.f32 %v2097_v17, %v1920_v59  ;;  %v1921_v7 = vadd.f32 %v1852_v3, %v1673_v34 }
 0x323   : > { %2449 = vst.msk [vmem:[#allocation2 + $0x48] sm:$0xff] %vm2439_vm2, %v2412_v62  ;;  %v1919_v28 = vadd.f32 %v1847_v25, %v1671_v58  ;;  %v2221_v62 = vld [vmem:[%s4784_s8 + $0x116] sm:$0xff]  ;;  %v2169_v36 = vadd.f32 %v2100_v22, %v1921_v7  ;;  %v2112_v37 = vpop.f32.mrf.mxu3  ;;  %v1675_v58 = vadd.f32 %v1609_v9, %v5277_v53 }
 0x324   : > { %v2242_v20 = vpack.c.bf16 %v2222_v29, %v2221_v62 }
 0x325   : > { %v2167_v42 = vadd.f32 %v2095_v51, %v1919_v28  ;;  %v1923_v28 = vadd.f32 %v1857_v57, %v1675_v58 }
 0x328   : > { %v2338_v55 = vpop.f32.mrf.mxu0 }
 0x329   : > { %v2413_v11 = vadd.f32 %v2338_v55, %v5230_v41  ;;  %v2241_v41 = vpack.c.bf16 %v2220_v19, %v2219_v0  ;;  %v1616_v50 = vpop.f32.mrf.mxu1  ;;  %v1674_v55 = vadd.f32 %v1606_v49, %v5268_v23  ;;  %v2223_v0 = vld [vmem:[%s4784_s8 + $0x126] sm:$0xff]  ;;  %v2224_v23 = vld [vmem:[%s4784_s8 + $0x12e] sm:$0xff] }
 0x32a   : > { %v2243_v19 = vpack.c.bf16 %v2224_v23, %v2223_v0 }
 0x32b   : > { %2450 = vst.msk [vmem:[#allocation2 + $0x50] sm:$0xff] %vm2439_vm2, %v2413_v11  ;;  %4282 = vmatmul.msk.bf16.gmra.mxu0 %vm389_vm1, %v2240_v16  ;;  %v1922_v11 = vadd.f32 %v1854_v56, %v1674_v55  ;;  %v5435_v49 = vpop.f32.mrf.mxu3  ;;  %v2171_v56 = vadd.f32 %v2105_v1, %v1923_v28 }
 0x32d   : > { %v2170_v45 = vadd.f32 %v2102_v27, %v1922_v11  ;;  %v1676_v27 = vadd.f32 %v1611_v43, %v5284_v39  ;;  %v2225_v43 = vld [vmem:[%s4784_s8 + $0x136] sm:$0xff] }
 0x32f   : > { %v1924_v53 = vadd.f32 %v1859_v40, %v1676_v27  ;;  %v2226_v40 = vld [vmem:[%s4784_s8 + $0x13e] sm:$0xff] }
 0x330   : > { %v2340_v26 = vpop.f32.mrf.mxu0 }
 0x331   : > { %v2414_v35 = vadd.f32 %v2340_v26, %v5241_v44  ;;  %v1862_v44 = vpop.f32.mrf.mxu2  ;;  %v1619_v3 = vpop.f32.mrf.mxu1  ;;  %v2172_v57 = vadd.f32 %v2107_v14, %v1924_v53  ;;  %v1678_v14 = vadd.f32 %v1616_v50, %v5300_v61 }
 0x332   : > { %v1679_v0 = vadd.f32 %v1619_v3, %v5305_v13 }
 0x333   : > { %2451 = vst.msk [vmem:[#allocation2 + $0x58] sm:$0xff] %vm2439_vm2, %v2414_v35  ;;  %v5444_v24 = vpop.f32.mrf.mxu3 }
 0x338   : > { %v2343_v8 = vpop.f32.mrf.mxu0 }
 0x339   : > { %v2415_v54 = vadd.f32 %v2343_v8, %v2167_v42  ;;  %v1864_v5 = vpop.f32.mrf.mxu2  ;;  %v5438_v8 = vpop.f32.mrf.mxu1 }
 0x33b   : > { %2452 = vst.msk [vmem:[#allocation2 + $0x60] sm:$0xff] %vm2439_vm2, %v2415_v54  ;;  %4283 = vmatmul.msk.bf16.gmra.mxu0 %vm389_vm1, %v2241_v41  ;;  %v1677_v54 = vadd.f32 %v1614_v60, %v5293_v18  ;;  %v5455_v29 = vpop.f32.mrf.mxu3  ;;  %v1926_v60 = vadd.f32 %v1864_v5, %v1678_v14 }
 0x33d   : > { %v2174_v50 = vadd.f32 %v2112_v37, %v1926_v60 }
 0x340   : > { %v2345_v25 = vpop.f32.mrf.mxu0 }
 0x341   : > { %v2416_v51 = vadd.f32 %v2345_v25, %v2168_v33  ;;  %v5430_v35 = vpop.f32.mrf.mxu2  ;;  %v1925_v33 = vadd.f32 %v1862_v44, %v1677_v54  ;;  %v5448_v39 = vpop.f32.mrf.mxu1 }
 0x342   : > { %v2488_v58 = vld [vmem:[#allocation2 + $0x60] sm:$0xff] }
 0x343   : > { %2453 = vst.msk [vmem:[#allocation2 + $0x68] sm:$0xff] %vm2439_vm2, %v2416_v51  ;;  %v2173_v34 = vadd.f32 %v2110_v15, %v1925_v33  ;;  %v2244_v51 = vpack.c.bf16 %v2226_v40, %v2225_v43  ;;  %v2521_v54 = vld [vmem:[#allocation2 + $0x59] sm:$0xff]  ;;  %v1927_v33 = vadd.f32 %v5430_v35, %v1679_v0  ;;  %v5471_v60 = vpop.f32.mrf.mxu3 }
 0x344   : > { %v2487_v35 = vld [vmem:[#allocation2 + $0x58] sm:$0xff] }
 0x348   : > { %v2348_v16 = vpop.f32.mrf.mxu0 }
 0x349   : > { %v2417_v17 = vadd.f32 %v2348_v16, %v2169_v36  ;;  %v5442_v9 = vpop.f32.mrf.mxu2  ;;  %v5459_v15 = vpop.f32.mrf.mxu1 }
 0x34a   : > { %v2522_v28 = vld [vmem:[#allocation2 + $0x61] sm:$0xff] }
 0x34b   : > { %2454 = vst.msk [vmem:[#allocation2 + $0x70] sm:$0xff] %vm2439_vm2, %v2417_v17  ;;  %4284 = vmatmul.msk.bf16.gmra.mxu0 %vm389_vm1, %v2242_v20  ;;  %v2622_v37 = vld [vmem:[#allocation2 + $0x63] sm:$0xff] }
 0x350   : > { %v2350_v26 = vpop.f32.mrf.mxu0 }
 0x351   : > { %v2418_v22 = vadd.f32 %v2350_v26, %v2170_v45  ;;  %v5452_v25 = vpop.f32.mrf.mxu2 }
 0x352   : > { %v2490_v55 = vld [vmem:[#allocation2 + $0x70] sm:$0xff] }
 0x353   : > { %2455 = vst.msk [vmem:[#allocation2 + $0x78] sm:$0xff] %vm2439_vm2, %v2418_v22  ;;  %v2523_v11 = vld [vmem:[#allocation2 + $0x69] sm:$0xff] }
 0x354   : > { %v2489_v22 = vld [vmem:[#allocation2 + $0x68] sm:$0xff] }
 0x355   : > { %v2623_v27 = vld [vmem:[#allocation2 + $0x6b] sm:$0xff] }
 0x358   : > { %v2353_v42 = vpop.f32.mrf.mxu0 }
 0x359   : > { %v2419_v41 = vadd.f32 %v2353_v42, %v2171_v56  ;;  %v5462_v23 = vpop.f32.mrf.mxu2  ;;  %v2589_v42 = vld [vmem:[#allocation2 + $0x6a] sm:$0xff] }
 0x35a   : > { %v2524_v44 = vld [vmem:[#allocation2 + $0x71] sm:$0xff] }
 0x35b   : > { %2456 = vst.msk [vmem:[#allocation2 + $0x80] sm:$0xff] %vm2439_vm2, %v2419_v41  ;;  %4285 = vmatmul.msk.bf16.gmra.mxu0 %vm389_vm1, %v2243_v19  ;;  %v2590_v45 = vld [vmem:[#allocation2 + $0x72] sm:$0xff]  ;;  %v2558_v26 = vmax.f32 %v2490_v55, %v2524_v44 }
 0x35c   : > { %v2624_v61 = vld [vmem:[#allocation2 + $0x73] sm:$0xff] }
 0x35d   : > { %v2491_v43 = vld [vmem:[#allocation2 + $0x78] sm:$0xff] }
 0x360   : > { %v2355_v1 = vpop.f32.mrf.mxu0 }
 0x361   : > { %v2420_v59 = vadd.f32 %v2355_v1, %v2172_v57  ;;  %v2557_v57 = vmax.f32 %v2489_v22, %v2523_v11  ;;  %v2658_v1 = vmax.f32 %v2590_v45, %v2624_v61  ;;  %v2555_v45 = vmax.f32 %v2487_v35, %v2521_v54  ;;  %v2519_v61 = vld [vmem:[#allocation2 + $0x49] sm:$0xff] }
 0x362   : > { %v2591_v20 = vld [vmem:[#allocation2 + $0x7a] sm:$0xff] }
 0x363   : > { %2457 = vst.msk [vmem:[#allocation2 + $0x88] sm:$0xff] %vm2439_vm2, %v2420_v59  ;;  %v2625_v16 = vld [vmem:[#allocation2 + $0x7b] sm:$0xff] }
 0x364   : > { %v2659_v5 = vmax.f32 %v2591_v20, %v2625_v16  ;;  %v2525_v19 = vld [vmem:[#allocation2 + $0x79] sm:$0xff]  ;;  %v2588_v59 = vld [vmem:[#allocation2 + $0x62] sm:$0xff] }
 0x365   : > { %v2559_v13 = vmax.f32 %v2491_v43, %v2525_v19  ;;  %v2656_v44 = vmax.f32 %v2588_v59, %v2622_v37  ;;  %v2587_v20 = vld [vmem:[#allocation2 + $0x5a] sm:$0xff] }
 0x366   : > { %v2693_v14 = vmax.f32 %v2557_v57, %v2659_v5  ;;  %v2621_v16 = vld [vmem:[#allocation2 + $0x5b] sm:$0xff]  ;;  %v5479_v57 = vpop.f32.mrf.mxu1 }
 0x367   : > { %v2518_v19 = vld [vmem:[#allocation2 + $0x41] sm:$0xff] }
 0x368   : > { %v2358_v7 = vpop.f32.mrf.mxu0 }
 0x369   : > { %v2421_v62 = vadd.f32 %v2358_v7, %v2173_v34  ;;  %v5469_v7 = vld [vmem:[%s6048_s2] ss:$0 sm:$0xff] }
 0x36a   : > { %v2592_v36 = vld [vmem:[#allocation2 + $0x82] sm:$0xff]  ;;  %v2731_v0 = vadd.f32 %v5469_v7, %v2693_v14 }
 0x36b   : > { %v2626_v18 = vld [vmem:[#allocation2 + $0x83] sm:$0xff]  ;;  %2458 = vst.msk [vmem:[#allocation2 + $0x90] sm:$0xff] %vm2439_vm2, %v2421_v62  ;;  %4286 = vmatmul.msk.bf16.gmra.mxu0 %vm389_vm1, %v2244_v51  ;;  %v2556_v51 = vmax.f32 %v2488_v58, %v2522_v28  ;;  %v2486_v62 = vld [vmem:[#allocation2 + $0x50] sm:$0xff]  ;;  %v2175_v58 = vadd.f32 %v5435_v49, %v1927_v33 }
 0x36c   : > { %v2660_v17 = vmax.f32 %v2592_v36, %v2626_v18  ;;  %v2520_v36 = vld [vmem:[#allocation2 + $0x51] sm:$0xff]  ;;  %v2657_v18 = vmax.f32 %v2589_v42, %v2623_v27  ;;  %v2485_v28 = vld [vmem:[#allocation2 + $0x48] sm:$0xff]  ;;  %v2655_v42 = vmax.f32 %v2587_v20, %v2621_v16  ;;  %v2765_v35 = vmax.f32 %v2731_v0, 0.0  ;;  %v5489_v0 = vpop.f32.mrf.mxu3 }
 0x36d   : > { %v2692_v11 = vmax.f32 %v2556_v51, %v2658_v1  ;;  %v2554_v22 = vmax.f32 %v2486_v62, %v2520_v36  ;;  %v2585_v27 = vld [vmem:[#allocation2 + $0x4a] sm:$0xff]  ;;  %v2553_v59 = vmax.f32 %v2485_v28, %v2519_v61  ;;  %v2517_v51 = vld [vmem:[#allocation2 + $0x39] sm:$0xff] }
 0x36e   : > { %v2694_v53 = vmax.f32 %v2558_v26, %v2660_v17  ;;  %v2620_v26 = vld [vmem:[#allocation2 + $0x53] sm:$0xff] }
 0x36f   : > { %v2690_v54 = vmax.f32 %v2554_v22, %v2656_v44  ;;  %v2483_v62 = vld [vmem:[#allocation2 + $0x38] sm:$0xff]  ;;  %v2689_v20 = vmax.f32 %v2553_v59, %v2655_v42  ;;  %v2514_v59 = vld [vmem:[#allocation2 + $0x21] sm:$0xff] }
 0x370   : > { %v2360_v56 = vpop.f32.mrf.mxu0  ;;  %v2732_v17 = vadd.f32 %v5469_v7, %v2694_v53  ;;  %v1680_v53 = vadd.f32 %v5438_v8, %v5309_v21  ;;  %v2584_v21 = vld [vmem:[#allocation2 + $0x42] sm:$0xff]  ;;  %v2516_v16 = vld [vmem:[#allocation2 + $0x31] sm:$0xff] }
 0x371   : > { %v2422_v41 = vadd.f32 %v2360_v56, %v2174_v50  ;;  %v2586_v50 = vld [vmem:[#allocation2 + $0x52] sm:$0xff]  ;;  %v2691_v56 = vmax.f32 %v2555_v45, %v2657_v18  ;;  %v2618_v8 = vld [vmem:[#allocation2 + $0x43] sm:$0xff]  ;;  %v2551_v45 = vmax.f32 %v2483_v62, %v2517_v51  ;;  %v2728_v61 = vadd.f32 %v5469_v7, %v2690_v54 }
 0x372   : > { %v2593_v40 = vld [vmem:[#allocation2 + $0x8a] sm:$0xff]  ;;  %v2654_v49 = vmax.f32 %v2586_v50, %v2620_v26  ;;  %v2766_v33 = vmax.f32 %v2732_v17, 0.0  ;;  %v2617_v17 = vld [vmem:[#allocation2 + $0x3b] sm:$0xff]  ;;  %v2652_v26 = vmax.f32 %v2584_v21, %v2618_v8  ;;  %v2582_v22 = vld [vmem:[#allocation2 + $0x32] sm:$0xff]  ;;  %v5496_v8 = vpop.f32.mrf.mxu1 }
 0x373   : > { %v2627_v34 = vld [vmem:[#allocation2 + $0x8b] sm:$0xff]  ;;  %2459 = vst.msk [vmem:[#allocation2 + $0x98] sm:$0xff] %vm2439_vm2, %v2422_v41  ;;  %v2729_v44 = vadd.f32 %v5469_v7, %v2691_v56  ;;  %v2616_v28 = vld [vmem:[#allocation2 + $0x33] sm:$0xff] }
 0x374   : > { %v2661_v3 = vmax.f32 %v2593_v40, %v2627_v34  ;;  %v2619_v41 = vld [vmem:[#allocation2 + $0x4b] sm:$0xff]  ;;  %v2730_v40 = vadd.f32 %v5469_v7, %v2692_v11  ;;  %v2484_v34 = vld [vmem:[#allocation2 + $0x40] sm:$0xff] }
 0x375   : > { %v2552_v14 = vmax.f32 %v2484_v34, %v2518_v19  ;;  %v2653_v36 = vmax.f32 %v2585_v27, %v2619_v41  ;;  %v2482_v11 = vld [vmem:[#allocation2 + $0x30] sm:$0xff]  ;;  %v2481_v19 = vld [vmem:[#allocation2 + $0x28] sm:$0xff]  ;;  %v2763_v41 = vmax.f32 %v2729_v44, 0.0  ;;  %v2762_v34 = vmax.f32 %v2728_v61, 0.0  ;;  %v2513_v62 = vld [vmem:[#allocation2 + $0x19] sm:$0xff] }
 0x376   : > { %v2695_v55 = vmax.f32 %v2559_v13, %v2661_v3  ;;  %v1928_v13 = vadd.f32 %v5442_v9, %v1680_v53  ;;  %v5483_v3 = vpop.f32.mrf.mxu2  ;;  %v2764_v9 = vmax.f32 %v2730_v40, 0.0  ;;  %v2550_v56 = vmax.f32 %v2482_v11, %v2516_v16  ;;  %v2615_v54 = vld [vmem:[#allocation2 + $0x2b] sm:$0xff]  ;;  %v2614_v44 = vld [vmem:[#allocation2 + $0x23] sm:$0xff]  ;;  %v2579_v11 = vld [vmem:[#allocation2 + $0x1a] sm:$0xff] }
 0x377   : > { %v2688_v50 = vmax.f32 %v2552_v14, %v2654_v49  ;;  %v2727_v53 = vadd.f32 %v5469_v7, %v2689_v20  ;;  %v1681_v49 = vadd.f32 %v5448_v39, %v5314_v30  ;;  %v2650_v40 = vmax.f32 %v2582_v22, %v2616_v28  ;;  %v2480_v14 = vld [vmem:[#allocation2 + $0x20] sm:$0xff]  ;;  %v2511_v28 = vld [vmem:[#allocation2 + $0x9] sm:$0xff] }
 0x378   : > { %v2733_v5 = vadd.f32 %v5469_v7, %v2695_v55  ;;  %v2363_v1 = vpop.f32.mrf.mxu0  ;;  %v2583_v55 = vld [vmem:[#allocation2 + $0x3a] sm:$0xff]  ;;  %v2792_v27 = vpack.c.bf16 %v2765_v35, %v2764_v9  ;;  %v2580_v35 = vld [vmem:[#allocation2 + $0x22] sm:$0xff]  ;;  %v2791_v39 = vpack.c.bf16 %v2763_v41, %v2762_v34 }
 0x379   : > { %v2423_v37 = vadd.f32 %v2363_v1, %v2175_v58  ;;  %v2515_v58 = vld [vmem:[#allocation2 + $0x29] sm:$0xff]  ;;  %v2651_v42 = vmax.f32 %v2583_v55, %v2617_v17  ;;  %v2687_v1 = vmax.f32 %v2551_v45, %v2653_v36  ;;  %v2726_v51 = vadd.f32 %v5469_v7, %v2688_v50  ;;  %v2512_v17 = vld [vmem:[#allocation2 + $0x11] sm:$0xff]  ;;  %v2613_v45 = vld [vmem:[#allocation2 + $0x1b] sm:$0xff] }
 0x37a   : > { %v2767_v43 = vmax.f32 %v2733_v5, 0.0  ;;  %v2176_v5 = vadd.f32 %v5444_v24, %v1928_v13  ;;  %v2686_v13 = vmax.f32 %v2550_v56, %v2652_v26  ;;  %v1929_v21 = vadd.f32 %v5452_v25, %v1681_v49  ;;  %v2478_v25 = vld [vmem:[#allocation2 + $0x10] sm:$0xff] }
 0x37b   : > { %2460 = vst.msk [vmem:[#allocation2 + $0xa0] sm:$0xff] %vm2439_vm2, %v2423_v37  ;;  %v2581_v37 = vld [vmem:[#allocation2 + $0x2a] sm:$0xff]  ;;  %v2548_v36 = vmax.f32 %v2480_v14, %v2514_v59  ;;  %v2761_v20 = vmax.f32 %v2727_v53, 0.0  ;;  %v2725_v16 = vadd.f32 %v5469_v7, %v2687_v1  ;;  %v2760_v50 = vmax.f32 %v2726_v51, 0.0  ;;  %v2612_v56 = vld [vmem:[#allocation2 + $0x13] sm:$0xff]  ;;  %v2476_v14 = vld [vmem:[#allocation2] sm:$0xff] }
 0x37c   : > { %v2793_v18 = vpack.c.bf16 %v2767_v43, %v2766_v33  ;;  %v2549_v43 = vmax.f32 %v2481_v19, %v2515_v58  ;;  %v2649_v30 = vmax.f32 %v2581_v37, %v2615_v54  ;;  %v2724_v26 = vadd.f32 %v5469_v7, %v2686_v13  ;;  %v2477_v37 = vld [vmem:[#allocation2 + $0x8] sm:$0xff] }
 0x37d   : > { %v2684_v58 = vmax.f32 %v2548_v36, %v2650_v40  ;;  %v2648_v22 = vmax.f32 %v2580_v35, %v2614_v44  ;;  %v2177_v19 = vadd.f32 %v5455_v29, %v1929_v21  ;;  %v2790_v41 = vpack.c.bf16 %v2761_v20, %v2760_v50  ;;  %v2510_v54 = vld [vmem:[#allocation2 + $0x1] sm:$0xff]  ;;  %v1634_v35 = vpop.f32.mrf.mxu1 }
 0x37e   : > { %2958 = vmatpush.bf16.msra.mxu1 %v2793_v18  ;;  %v2479_v18 = vld [vmem:[#allocation2 + $0x18] sm:$0xff]  ;;  %v2685_v55 = vmax.f32 %v2549_v43, %v2651_v42  ;;  %v5500_v9 = vpop.f32.mrf.mxu2  ;;  %v2647_v42 = vmax.f32 %v2579_v11, %v2613_v45  ;;  %v2759_v53 = vmax.f32 %v2725_v16, 0.0  ;;  %v1682_v49 = vadd.f32 %v5459_v15, %v5318_v63 }
 0x37f   : > { %v2547_v61 = vmax.f32 %v2479_v18, %v2513_v62  ;;  %v2545_v40 = vmax.f32 %v2477_v37, %v2511_v28  ;;  %v2758_v51 = vmax.f32 %v2724_v26, 0.0  ;;  %v2722_v29 = vadd.f32 %v5469_v7, %v2684_v58 }
 0x380   : > { %v2365_v33 = vpop.f32.mrf.mxu0  ;;  %v2723_v1 = vadd.f32 %v5469_v7, %v2685_v55  ;;  %v1930_v62 = vadd.f32 %v5462_v23, %v1682_v49  ;;  %v2544_v21 = vmax.f32 %v2476_v14, %v2510_v54  ;;  %v1683_v45 = vadd.f32 %v5479_v57, %v5323_v48 }
 0x381   : > { %v2424_v24 = vadd.f32 %v2365_v33, %v2176_v5  ;;  %v2578_v5 = vld [vmem:[#allocation2 + $0x12] sm:$0xff]  ;;  %v2683_v59 = vmax.f32 %v2547_v61, %v2649_v30  ;;  %v2127_v33 = vpop.f32.mrf.mxu3  ;;  %v2789_v36 = vpack.c.bf16 %v2759_v53, %v2758_v51  ;;  %v2681_v15 = vmax.f32 %v2545_v40, %v2647_v42 }
 0x382   : > { %2959 = vmatpush.bf16.msra.mxu1 %v2792_v27  ;;  %v2546_v27 = vmax.f32 %v2478_v25, %v2512_v17  ;;  %v2757_v18 = vmax.f32 %v2723_v1, 0.0  ;;  %v2756_v44 = vmax.f32 %v2722_v29, 0.0  ;;  %v2178_v16 = vadd.f32 %v5471_v60, %v1930_v62 }
 0x383   : > { %2461 = vst.msk [vmem:[#allocation2 + $0xa8] sm:$0xff] %vm2439_vm2, %v2424_v24  ;;  %v2646_v24 = vmax.f32 %v2578_v5, %v2612_v56  ;;  %v2721_v63 = vadd.f32 %v5469_v7, %v2683_v59  ;;  %v2719_v23 = vadd.f32 %v5469_v7, %v2681_v15  ;;  %v1931_v58 = vadd.f32 %v5483_v3, %v1683_v45 }
 0x384   : > { %v2682_v13 = vmax.f32 %v2546_v27, %v2648_v22  ;;  %v2788_v55 = vpack.c.bf16 %v2757_v18, %v2756_v44  ;;  %v1684_v57 = vadd.f32 %v5496_v8, %v5327_v31  ;;  %v1685_v37 = vadd.f32 %v1634_v35, %v5332_v46 }
 0x385   : > { %v2755_v17 = vmax.f32 %v2721_v63, 0.0  ;;  %v2753_v60 = vmax.f32 %v2719_v23, 0.0  ;;  %v1636_v5 = vpop.f32.mrf.mxu1  ;;  %v2179_v56 = vadd.f32 %v5489_v0, %v1931_v58 }
 0x386   : > { %2960 = vmatpush.bf16.msra.mxu1 %v2791_v39  ;;  %v2720_v30 = vadd.f32 %v5469_v7, %v2682_v13  ;;  %v2680_v39 = vmax.f32 %v2544_v21, %v2646_v24  ;;  %v1882_v20 = vpop.f32.mrf.mxu2  ;;  %v1686_v8 = vadd.f32 %v1636_v5, %v5336_v2 }
 0x387   : > { %v1933_v49 = vadd.f32 %v1882_v20, %v1685_v37 }
 0x388   : > { %v2368_v43 = vpop.f32.mrf.mxu0  ;;  %v2754_v61 = vmax.f32 %v2720_v30, 0.0  ;;  %v2718_v50 = vadd.f32 %v5469_v7, %v2680_v39 }
 0x389   : > { %v2425_v34 = vadd.f32 %v2368_v43, %v2177_v19  ;;  %v2130_v26 = vpop.f32.mrf.mxu3 }
 0x38a   : > { %2961 = vmatpush.bf16.msra.mxu1 %v2790_v41  ;;  %v2787_v22 = vpack.c.bf16 %v2755_v17, %v2754_v61  ;;  %v2752_v28 = vmax.f32 %v2718_v50, 0.0  ;;  %v1932_v41 = vadd.f32 %v5500_v9, %v1684_v57  ;;  %v2181_v40 = vadd.f32 %v2130_v26, %v1933_v49 }
 0x38b   : > { %2462 = vst.msk [vmem:[#allocation2 + $0xb0] sm:$0xff] %vm2439_vm2, %v2425_v34 }
 0x38c   : > { %v2786_v19 = vpack.c.bf16 %v2753_v60, %v2752_v28  ;;  %v2180_v53 = vadd.f32 %v2127_v33, %v1932_v41 }
 0x38d   : > { %v1639_v1 = vpop.f32.mrf.mxu1 }
 0x38e   : > { %2962 = vmatpush.bf16.msra.mxu1 %v2789_v36  ;;  %v1884_v27 = vpop.f32.mrf.mxu2  ;;  %v1687_v46 = vadd.f32 %v1639_v1, %v5341_v6 }
 0x38f   : > { %v1934_v34 = vadd.f32 %v1884_v27, %v1686_v8 }
 0x390   : > { %v2370_v11 = vpop.f32.mrf.mxu0 }
 0x391   : > { %v2426_v25 = vadd.f32 %v2370_v11, %v2178_v16  ;;  %v2132_v3 = vpop.f32.mrf.mxu3 }
 0x392   : > { %2963 = vmatpush.bf16.msra.mxu1 %v2788_v55  ;;  %v2182_v51 = vadd.f32 %v2132_v3, %v1934_v34 }
 0x393   : > { %2463 = vst.msk [vmem:[#allocation2 + $0xb8] sm:$0xff] %vm2439_vm2, %v2426_v25 }
 0x395   : > { %v1641_v9 = vpop.f32.mrf.mxu1 }
 0x396   : > { %2964 = vmatpush.bf16.msra.mxu1 %v2787_v22  ;;  %v1887_v0 = vpop.f32.mrf.mxu2  ;;  %v1688_v2 = vadd.f32 %v1641_v9, %v5345_v38 }
 0x397   : > { %v1935_v62 = vadd.f32 %v1887_v0, %v1687_v46 }
 0x398   : > { %v2373_v48 = vpop.f32.mrf.mxu0 }
 0x399   : > { %v2427_v42 = vadd.f32 %v2373_v48, %v2179_v56  ;;  %v2135_v43 = vpop.f32.mrf.mxu3 }
 0x39a   : > { %2965 = vmatpush.bf16.msra.mxu1 %v2786_v19  ;;  %v2183_v18 = vadd.f32 %v2135_v43, %v1935_v62 }
 0x39b   : > { %2464 = vst.msk [vmem:[#allocation2 + $0xc0] sm:$0xff] %vm2439_vm2, %v2427_v42 }
 0x39d   : > { %v1644_v21 = vpop.f32.mrf.mxu1 }
 0x39e   : > { %v1889_v33 = vpop.f32.mrf.mxu2  ;;  %v1689_v6 = vadd.f32 %v1644_v21, %v5350_v4 }
 0x39f   : > { %v1936_v44 = vadd.f32 %v1889_v33, %v1688_v2 }
 0x3a0   : > { %v2375_v59 = vpop.f32.mrf.mxu0 }
 0x3a1   : > { %v2428_v54 = vadd.f32 %v2375_v59, %v2180_v53  ;;  %v2137_v29 = vpop.f32.mrf.mxu3 }
 0x3a2   : > { %v2184_v39 = vadd.f32 %v2137_v29, %v1936_v44 }
 0x3a3   : > { %2465 = vst.msk [vmem:[#allocation2 + $0xc8] sm:$0xff] %vm2439_vm2, %v2428_v54 }
 0x3a5   : > { %v1646_v30 = vpop.f32.mrf.mxu1 }
 0x3a6   : > { %v1892_v36 = vpop.f32.mrf.mxu2  ;;  %v1690_v38 = vadd.f32 %v1646_v30, %v5354_v10 }
 0x3a7   : > { %v1937_v17 = vadd.f32 %v1892_v36, %v1689_v6 }
 0x3a8   : > { %v2378_v31 = vpop.f32.mrf.mxu0 }
 0x3a9   : > { %v2429_v24 = vadd.f32 %v2378_v31, %v2181_v40  ;;  %v2140_v35 = vpop.f32.mrf.mxu3 }
 0x3aa   : > { %v2185_v11 = vadd.f32 %v2140_v35, %v1937_v17 }
 0x3ab   : > { %2466 = vst.msk [vmem:[#allocation2 + $0xd0] sm:$0xff] %vm2439_vm2, %v2429_v24 }
 0x3ad   : > { %v1649_v45 = vpop.f32.mrf.mxu1 }
 0x3ae   : > { %v1894_v20 = vpop.f32.mrf.mxu2  ;;  %v1691_v4 = vadd.f32 %v1649_v45, %v5359_v12 }
 0x3af   : > { %v1938_v26 = vadd.f32 %v1894_v20, %v1690_v38 }
 0x3b0   : > { %v2380_v13 = vpop.f32.mrf.mxu0 }
 0x3b1   : > { %v2430_v14 = vadd.f32 %v2380_v13, %v2182_v51  ;;  %v2142_v23 = vpop.f32.mrf.mxu3 }
 0x3b2   : > { %v2186_v22 = vadd.f32 %v2142_v23, %v1938_v26  ;;  %v5544_v26 = vld [vmem:[#allocation2 + $0xa9] sm:$0xff] }
 0x3b3   : > { %2467 = vst.msk [vmem:[#allocation2 + $0xd8] sm:$0xff] %vm2439_vm2, %v2430_v14 }
 0x3b5   : > { %v1651_v5 = vpop.f32.mrf.mxu1 }
 0x3b6   : > { %v1897_v50 = vpop.f32.mrf.mxu2  ;;  %v1692_v10 = vadd.f32 %v1651_v5, %v5363_v52 }
 0x3b7   : > { %v1939_v56 = vadd.f32 %v1897_v50, %v1691_v4 }
 0x3b8   : > { %v2383_v63 = vpop.f32.mrf.mxu0 }
 0x3b9   : > { %v2431_v15 = vadd.f32 %v2383_v63, %v2183_v18  ;;  %v2145_v58 = vpop.f32.mrf.mxu3 }
 0x3ba   : > { %v2187_v27 = vadd.f32 %v2145_v58, %v1939_v56  ;;  %v2503_v17 = vld [vmem:[#allocation2 + $0xd8] sm:$0xff] }
 0x3bb   : > { %2468 = vst.msk [vmem:[#allocation2 + $0xe0] sm:$0xff] %vm2439_vm2, %v2431_v15 }
 0x3bd   : > { %v1654_v3 = vpop.f32.mrf.mxu1 }
 0x3be   : > { %v1899_v19 = vpop.f32.mrf.mxu2  ;;  %v1693_v12 = vadd.f32 %v1654_v3, %v5368_v47 }
 0x3bf   : > { %v1940_v41 = vadd.f32 %v1899_v19, %v1692_v10  ;;  %v2502_v19 = vld [vmem:[#allocation2 + $0xd0] sm:$0xff]  ;;  %v5547_v10 = vld [vmem:[#allocation2 + $0xb8] sm:$0xff] }
 0x3c0   : > { %v2385_v16 = vpop.f32.mrf.mxu0 }
 0x3c1   : > { %v2432_v55 = vadd.f32 %v2385_v16, %v2184_v39  ;;  %v2147_v48 = vpop.f32.mrf.mxu3 }
 0x3c2   : > { %v2188_v1 = vadd.f32 %v2147_v48, %v1940_v41  ;;  %v2504_v44 = vld [vmem:[#allocation2 + $0xe0] sm:$0xff]  ;;  %v5551_v41 = vld [vmem:[#allocation2 + $0xa8] sm:$0xff] }
 0x3c3   : > { %2469 = vst.msk [vmem:[#allocation2 + $0xe8] sm:$0xff] %vm2439_vm2, %v2432_v55  ;;  %v2537_v23 = vld [vmem:[#allocation2 + $0xd9] sm:$0xff] }
 0x3c4   : > { %v2603_v5 = vld [vmem:[#allocation2 + $0xda] sm:$0xff] }
 0x3c5   : > { %v1656_v49 = vpop.f32.mrf.mxu1  ;;  %v2637_v56 = vld [vmem:[#allocation2 + $0xdb] sm:$0xff] }
 0x3c6   : > { %v1902_v53 = vpop.f32.mrf.mxu2  ;;  %v1694_v52 = vadd.f32 %v1656_v49, %v5372_v32  ;;  %v2500_v49 = vld [vmem:[#allocation2 + $0xc0] sm:$0xff] }
 0x3c7   : > { %v1941_v0 = vadd.f32 %v1902_v53, %v1693_v12  ;;  %v2602_v12 = vld [vmem:[#allocation2 + $0xd2] sm:$0xff] }
 0x3c8   : > { %v2388_v25 = vpop.f32.mrf.mxu0 }
 0x3c9   : > { %v2433_v61 = vadd.f32 %v2388_v25, %v2185_v11  ;;  %v2150_v54 = vpop.f32.mrf.mxu3 }
 0x3ca   : > { %v2189_v43 = vadd.f32 %v2150_v54, %v1941_v0  ;;  %v2505_v30 = vld [vmem:[#allocation2 + $0xe8] sm:$0xff] }
 0x3cb   : > { %2470 = vst.msk [vmem:[#allocation2 + $0xf0] sm:$0xff] %vm2439_vm2, %v2433_v61  ;;  %v2538_v39 = vld [vmem:[#allocation2 + $0xe1] sm:$0xff] }
 0x3cc   : > { %v2604_v11 = vld [vmem:[#allocation2 + $0xe2] sm:$0xff] }
 0x3cd   : > { %v2638_v45 = vld [vmem:[#allocation2 + $0xe3] sm:$0xff] }
 0x3ce   : > { %v1904_v40 = vpop.f32.mrf.mxu2  ;;  %v2672_v48 = vmax.f32 %v2604_v11, %v2638_v45 }
 0x3cf   : > { %v1942_v34 = vadd.f32 %v1904_v40, %v1694_v52  ;;  %v2671_v40 = vmax.f32 %v2603_v5, %v2637_v56  ;;  %v2498_v56 = vld [vmem:[#allocation2 + $0xb0] sm:$0xff] }
 0x3d0   : > { %v2390_v60 = vpop.f32.mrf.mxu0 }
 0x3d1   : > { %v2434_v28 = vadd.f32 %v2390_v60, %v2186_v22  ;;  %v2152_v33 = vpop.f32.mrf.mxu3  ;;  %v2572_v60 = vmax.f32 %v2504_v44, %v2538_v39 }
 0x3d2   : > { %v2506_v13 = vld [vmem:[#allocation2 + $0xf0] sm:$0xff]  ;;  %v2190_v36 = vadd.f32 %v2152_v33, %v1942_v34  ;;  %v5560_v34 = vld [vmem:[#allocation2 + $0xc3] sm:$0xff] }
 0x3d3   : > { %2471 = vst.msk [vmem:[#allocation2 + $0xf8] sm:$0xff] %vm2439_vm2, %v2434_v28  ;;  %v2539_v14 = vld [vmem:[#allocation2 + $0xe9] sm:$0xff]  ;;  %v2536_v28 = vld [vmem:[#allocation2 + $0xd1] sm:$0xff] }
 0x3d4   : > { %v2605_v2 = vld [vmem:[#allocation2 + $0xea] sm:$0xff]  ;;  %v2573_v6 = vmax.f32 %v2505_v30, %v2539_v14  ;;  %v2570_v54 = vmax.f32 %v2502_v19, %v2536_v28  ;;  %v2598_v19 = vld [vmem:[#allocation2 + $0xb2] sm:$0xff] }
 0x3d5   : > { %v2639_v32 = vld [vmem:[#allocation2 + $0xeb] sm:$0xff] }
 0x3d6   : > { %v2673_v50 = vmax.f32 %v2605_v2, %v2639_v32  ;;  %v2635_v33 = vld [vmem:[#allocation2 + $0xcb] sm:$0xff] }
 0x3d8   : > { %v2393_v57 = vpop.f32.mrf.mxu0 }
 0x3d9   : > { %v2435_v42 = vadd.f32 %v2393_v57, %v2187_v27  ;;  %v2571_v27 = vmax.f32 %v2503_v17, %v2537_v23  ;;  %v2534_v57 = vld [vmem:[#allocation2 + $0xc1] sm:$0xff] }
 0x3da   : > { %v2540_v51 = vld [vmem:[#allocation2 + $0xf1] sm:$0xff] }
 0x3db   : > { %2472 = vst.msk [vmem:[#allocation2 + $0x100] sm:$0xff] %vm2439_vm2, %v2435_v42  ;;  %v2606_v62 = vld [vmem:[#allocation2 + $0xf2] sm:$0xff]  ;;  %v2574_v18 = vmax.f32 %v2506_v13, %v2540_v51  ;;  %v2707_v0 = vmax.f32 %v2571_v27, %v2673_v50  ;;  %v2565_v51 = vmax.f32 %v5551_v41, %v5544_v26  ;;  %v2633_v50 = vld [vmem:[#allocation2 + $0xbb] sm:$0xff] }
 0x3dc   : > { %v2640_v21 = vld [vmem:[#allocation2 + $0xf3] sm:$0xff] }
 0x3dd   : > { %v2674_v55 = vmax.f32 %v2606_v62, %v2640_v21  ;;  %v2507_v25 = vld [vmem:[#allocation2 + $0xf8] sm:$0xff]  ;;  %v4289_v21 = vld [vmem:[%s6051_s5] sm:$0xf]  ;;  %v2745_v30 = vadd.f32 %v5469_v7, %v2707_v0  ;;  %v4527_v41 = vld [vmem:[%s6051_s5 + $0x10] sm:$0xf0] }
 0x3de   : > { %v5549_v42 = vld [vmem:[#allocation2 + $0xb9] sm:$0xff] }
 0x3df   : > { %v2632_v27 = vld [vmem:[#allocation2 + $0xb3] sm:$0xff] }
 0x3e0   : > { %v2395_v59 = vpop.f32.mrf.mxu0 }
 0x3e1   : > { %v2436_v37 = vadd.f32 %v2395_v59, %v2188_v1  ;;  %v2708_v1 = vmax.f32 %v2572_v60, %v2674_v55  ;;  %v2535_v59 = vld [vmem:[#allocation2 + $0xc9] sm:$0xff] }
 0x3e2   : > { %v2607_v47 = vld [vmem:[#allocation2 + $0xfa] sm:$0xff] }
 0x3e3   : > { %2473 = vst.msk [vmem:[#allocation2 + $0x108] sm:$0xff] %vm2439_vm2, %v2436_v37  ;;  %v2641_v29 = vld [vmem:[#allocation2 + $0xfb] sm:$0xff]  ;;  %v2636_v37 = vld [vmem:[#allocation2 + $0xd3] sm:$0xff]  ;;  %v2746_v2 = vadd.f32 %v5469_v7, %v2708_v1 }
 0x3e4   : > { %v2675_v63 = vmax.f32 %v2607_v47, %v2641_v29  ;;  %v2541_v35 = vld [vmem:[#allocation2 + $0xf9] sm:$0xff]  ;;  %v2706_v47 = vmax.f32 %v2570_v54, %v2672_v48  ;;  %v2670_v62 = vmax.f32 %v2602_v12, %v2636_v37  ;;  %v2530_v12 = vld [vmem:[#allocation2 + $0xa1] sm:$0xff]  ;;  %v2597_v37 = vld [vmem:[#allocation2 + $0xaa] sm:$0xff] }
 0x3e5   : > { %v2575_v58 = vmax.f32 %v2507_v25, %v2541_v35  ;;  %v2508_v29 = vld [vmem:[#allocation2 + $0x100] sm:$0xff]  ;;  %v2532_v35 = vld [vmem:[#allocation2 + $0xb1] sm:$0xff]  ;;  %v2780_v28 = vmax.f32 %v2746_v2, 0.0 }
 0x3e6   : > { %v2709_v4 = vmax.f32 %v2573_v6, %v2675_v63  ;;  %v2631_v54 = vld [vmem:[#allocation2 + $0xab] sm:$0xff] }
 0x3e8   : > { %v2398_v31 = vpop.f32.mrf.mxu0 }
 0x3e9   : > { %v2437_v8 = vadd.f32 %v2398_v31, %v2189_v43  ;;  %v2501_v43 = vld [vmem:[#allocation2 + $0xc8] sm:$0xff] }
 0x3ea   : > { %v2608_v24 = vld [vmem:[#allocation2 + $0x102] sm:$0xff]  ;;  %v2569_v14 = vmax.f32 %v2501_v43, %v2535_v59 }
 0x3eb   : > { %v2642_v9 = vld [vmem:[#allocation2 + $0x103] sm:$0xff]  ;;  %2474 = vst.msk [vmem:[#allocation2 + $0x110] sm:$0xff] %vm2439_vm2, %v2437_v8  ;;  %v2747_v8 = vadd.f32 %v5469_v7, %v2709_v4 }
 0x3ec   : > { %v2676_v46 = vmax.f32 %v2608_v24, %v2642_v9  ;;  %v5554_v31 = vld [vmem:[#allocation2 + $0xc2] sm:$0xff]  ;;  %v2567_v24 = vmax.f32 %v5547_v10, %v5549_v42  ;;  %v2601_v9 = vld [vmem:[#allocation2 + $0xca] sm:$0xff]  ;;  %v2705_v6 = vmax.f32 %v2569_v14, %v2671_v40  ;;  %v2666_v40 = vmax.f32 %v2598_v19, %v2632_v27  ;;  %v2495_v14 = vld [vmem:[#allocation2 + $0x98] sm:$0xff] }
 0x3ed   : > { %v2542_v13 = vld [vmem:[#allocation2 + $0x101] sm:$0xff]  ;;  %v2668_v55 = vmax.f32 %v5554_v31, %v5560_v34  ;;  %v2669_v17 = vmax.f32 %v2601_v9, %v2635_v33  ;;  %v2781_v11 = vmax.f32 %v2747_v8, 0.0  ;;  %v2494_v34 = vld [vmem:[#allocation2 + $0x90] sm:$0xff] }
 0x3ee   : > { %v2710_v16 = vmax.f32 %v2574_v18, %v2676_v46  ;;  %v2568_v46 = vmax.f32 %v2500_v49, %v2534_v57  ;;  %v2509_v32 = vld [vmem:[#allocation2 + $0x108] sm:$0x1f]  ;;  %v2576_v45 = vmax.f32 %v2508_v29, %v2542_v13  ;;  %v2566_v57 = vmax.f32 %v2498_v56, %v2532_v35  ;;  %v2496_v9 = vld [vmem:[#allocation2 + $0xa0] sm:$0xff]  ;;  %v2528_v33 = vld [vmem:[#allocation2 + $0x91] sm:$0xff] }
 0x3ef   : > { %v2703_v10 = vmax.f32 %v2567_v24, %v2669_v17  ;;  %v2743_v59 = vadd.f32 %v5469_v7, %v2705_v6  ;;  %v4672_v49 = vmov 65535   ;;  %v2564_v13 = vmax.f32 %v2496_v9, %v2530_v12  ;;  %v2595_v35 = vld [vmem:[#allocation2 + $0x9a] sm:$0xff] }
 0x3f0   : > { %v2400_v15 = vpop.f32.mrf.mxu0  ;;  %v2748_v53 = vadd.f32 %v5469_v7, %v2710_v16  ;;  %v2704_v4 = vmax.f32 %v2568_v46, %v2670_v62  ;;  %v2953_v43 = vsel %vm2951_vm3, 4294967295, %v4672_v49  ;;  %v2702_v24 = vmax.f32 %v2566_v57, %v2668_v55  ;;  %v2596_v62 = vld [vmem:[#allocation2 + $0xa2] sm:$0xff] }
 0x3f1   : > { %v2438_v20 = vadd.f32 %v2400_v15, %v2190_v36  ;;  %v4526_v36 = vld [vmem:[%s6051_s5 + $0x8] sm:$0xf0]  ;;  %v2777_v2 = vmax.f32 %v2743_v59, 0.0  ;;  %v2700_v55 = vmax.f32 %v2564_v13, %v2666_v40  ;;  %v2492_v57 = vld [vmem:[#allocation2 + $0x80] sm:$0xff]  ;;  %v4291_v13 = vld [vmem:[%s6051_s5 + $0xc] sm:$0xf0] }
 0x3f2   : > { %v2609_v38 = vld [vmem:[#allocation2 + $0x10a] sm:$0xff]  ;;  %v2782_v18 = vmax.f32 %v2748_v53, 0.0  ;;  %v4290_v44 = vor.u32 %v4526_v36, %v4289_v21  ;;  %v2779_v53 = vmax.f32 %v2745_v30, 0.0  ;;  %v2742_v8 = vadd.f32 %v5469_v7, %v2704_v4  ;;  %v4309_v9 = vld [vmem:[%s6051_s5 + $0x20] sm:$0xf] }
 0x3f3   : > { %v2643_v61 = vld [vmem:[#allocation2 + $0x10b] sm:$0xff]  ;;  %2475 = vst.msk [vmem:[#allocation2 + $0x118] sm:$0xff] %vm2439_vm2, %v2438_v20  ;;  %v2630_v21 = vld [vmem:[#allocation2 + $0xa3] sm:$0xff]  ;;  %v2665_v36 = vmax.f32 %v2597_v37, %v2631_v54  ;;  %v2740_v6 = vadd.f32 %v5469_v7, %v2702_v24  ;;  %v2738_v27 = vadd.f32 %v5469_v7, %v2700_v55 }
 0x3f4   : > { %v2677_v22 = vmax.f32 %v2609_v38, %v2643_v61  ;;  %v2543_v15 = vld [vmem:[#allocation2 + $0x109] sm:$0x1f]  ;;  %v2599_v61 = vld [vmem:[#allocation2 + $0xba] sm:$0xff]  ;;  %2966 = vmatmul.bf16.vlgmr.msra.gmra.mxu1 %v4290_v44  ;;  %v2664_v17 = vmax.f32 %v2596_v62, %v2630_v21 }
 0x3f5   : > { %v2667_v42 = vmax.f32 %v2599_v61, %v2633_v50  ;;  %v2629_v44 = vld [vmem:[#allocation2 + $0x9b] sm:$0xff]  ;;  %v2628_v61 = vld [vmem:[#allocation2 + $0x93] sm:$0xff]  ;;  %v2493_v4 = vld [vmem:[#allocation2 + $0x88] sm:$0xff]  ;;  %v2774_v19 = vmax.f32 %v2740_v6, 0.0  ;;  %v2772_v12 = vmax.f32 %v2738_v27, 0.0 }
 0x3f6   : > { %v2711_v3 = vmax.f32 %v2575_v58, %v2677_v22  ;;  %v2744_v58 = vadd.f32 %v5469_v7, %v2706_v47  ;;  %v2577_v22 = vmax.f32 %v2509_v32, %v2543_v15  ;;  %v2529_v47 = vld [vmem:[#allocation2 + $0x99] sm:$0xff]  ;;  %v2741_v32 = vadd.f32 %v5469_v7, %v2703_v10  ;;  %v4297_v15 = vld [vmem:[%s6051_s5 + $0x8] sm:$0xf]  ;;  %v2827_v27 = vld [vmem:[%s6051_s5 + $0x90] sm:$0xff] }
 0x3f7   : > { %v2701_v46 = vmax.f32 %v2565_v51, %v2667_v42  ;;  %v2563_v26 = vmax.f32 %v2495_v14, %v2529_v47  ;;  %v4301_v51 = vld [vmem:[%s6051_s5 + $0x18] sm:$0xf]  ;;  %v2663_v50 = vmax.f32 %v2595_v35, %v2629_v44  ;;  %v4532_v47 = vld [vmem:[%s6051_s5 + $0x38] sm:$0xf0] }
 0x3f8   : > { %v2749_v52 = vadd.f32 %v5469_v7, %v2711_v3  ;;  %v2800_v3 = vpack.c.bf16 %v2781_v11, %v2780_v28  ;;  %v2778_v31 = vmax.f32 %v2744_v58, 0.0  ;;  %v2526_v28 = vld [vmem:[#allocation2 + $0x81] sm:$0xff] }
 0x3f9   : > { %v2560_v42 = vmax.f32 %v2492_v57, %v2526_v28  ;;  %v4537_v28 = vld [vmem:[%s6051_s5 + $0x64] sm:$0xf] }
 0x3fa   : > { %v2783_v63 = vmax.f32 %v2749_v52, 0.0  ;;  %v2610_v39 = vld [vmem:[#allocation2 + $0x112] sm:$0xff]  ;;  %v2611_v20 = vld [vmem:[#allocation2 + $0x11a] sm:$0x1f] }
 0x3fb   : > { %v2644_v16 = vld [vmem:[#allocation2 + $0x113] sm:$0xff]  ;;  %v2645_v25 = vld [vmem:[#allocation2 + $0x11b] sm:$0x1f] }
 0x3fc   : > { %v2801_v23 = vpack.c.bf16 %v2783_v63, %v2782_v18  ;;  %v2678_v38 = vmax.f32 %v2610_v39, %v2644_v16  ;;  %v2679_v60 = vmax.f32 %v2611_v20, %v2645_v25  ;;  %v2799_v18 = vpack.c.bf16 %v2779_v53, %v2778_v31  ;;  %v4529_v20 = vld [vmem:[%s6051_s5 + $0x20] sm:$0xf0] }
 0x3fd   : > { %v2954_v63 = vsel %vm2952_vm4, %v2953_v43, 0  ;;  %v2562_v39 = vmax.f32 %v2494_v34, %v2528_v33  ;;  %v2776_v16 = vmax.f32 %v2742_v8, 0.0  ;;  %v2699_v25 = vmax.f32 %v2563_v26, %v2665_v36  ;;  %v4530_v34 = vld [vmem:[%s6051_s5 + $0x28] sm:$0xf0]  ;;  %v4313_v33 = vld [vmem:[%s6051_s5 + $0x30] sm:$0xf] }
 0x3fe   : > { %3001 = vmatpush.bf16.msra.mxu2 %v2801_v23  ;;  %v2712_v5 = vmax.f32 %v2576_v45, %v2678_v38  ;;  %v2713_v48 = vmax.f32 %v2577_v22, %v2679_v60  ;;  %v2527_v23 = vld [vmem:[#allocation2 + $0x89] sm:$0xff]  ;;  %v2739_v45 = vadd.f32 %v5469_v7, %v2701_v46  ;;  %v2594_v38 = vld [vmem:[#allocation2 + $0x92] sm:$0xff]  ;;  %v2775_v22 = vmax.f32 %v2741_v32, 0.0  ;;  %v4528_v32 = vld [vmem:[%s6051_s5 + $0x1c] sm:$0xf] }
 0x3ff   : > { %v2798_v58 = vpack.c.bf16 %v2777_v2, %v2776_v16  ;;  %v4298_v60 = vor.u32 %v4527_v41, %v4297_v15  ;;  %v2561_v56 = vmax.f32 %v2493_v4, %v2527_v23  ;;  %v2662_v10 = vmax.f32 %v2594_v38, %v2628_v61  ;;  %v4321_v36 = vld [vmem:[%s6051_s5 + $0x38] sm:$0xf]  ;;  %v4535_v2 = vld [vmem:[%s6051_s5 + $0x50] sm:$0xf0]  ;;  %v4303_v15 = vld [vmem:[%s6051_s5 + $0x24] sm:$0xf0] }
 0x400   : > { %v2750_v1 = vadd.f32 %v5469_v7, %v2712_v5  ;;  %v2751_v0 = vadd.f32 %v5469_v7, %v2713_v48  ;;  %v4302_v5 = vor.u32 %v4529_v20, %v4301_v51  ;;  %v2698_v48 = vmax.f32 %v2562_v39, %v2664_v17  ;;  %v4333_v39 = vld [vmem:[%s6051_s5 + $0x50] sm:$0xf]  ;;  %v4536_v26 = vld [vmem:[%s6051_s5 + $0x58] sm:$0xf0]  ;;  %v4337_v41 = vld [vmem:[%s6051_s5 + $0x60] sm:$0xf] }
 0x401   : > { %v2773_v53 = vmax.f32 %v2739_v45, 0.0  ;;  %v2697_v59 = vmax.f32 %v2561_v56, %v2663_v50  ;;  %v2696_v54 = vmax.f32 %v2560_v42, %v2662_v10  ;;  %v4310_v14 = vor.u32 %v4530_v34, %v4309_v9  ;;  %v4538_v51 = vld [vmem:[%s6051_s5 + $0x68] sm:$0xf0]  ;;  %v4531_v20 = vld [vmem:[%s6051_s5 + $0x34] sm:$0xf]  ;;  %v4546_v9 = vld [vmem:[%s6049_s3 + $0x18] sm:$0xff] }
 0x402   : > { %3002 = vmatpush.bf16.msra.mxu2 %v2800_v3  ;;  %v2784_v52 = vmax.f32 %v2750_v1, 0.0  ;;  %v2785_v29 = vmax.f32 %v2751_v0, 0.0  ;;  %v2797_v3 = vpack.c.bf16 %v2775_v22, %v2774_v19  ;;  %v2737_v1 = vadd.f32 %v5469_v7, %v2699_v25  ;;  %v4315_v16 = vld [vmem:[%s6051_s5 + $0x3c] sm:$0xf0]  ;;  %v4345_v23 = vld [vmem:[%s6051_s5 + $0x68] sm:$0xf]  ;;  %3172 = vmatpush.bf16.msrb.mxu1 %v4546_v9 }
 0x403   : > { %v2736_v37 = vadd.f32 %v5469_v7, %v2698_v48  ;;  %v2796_v0 = vpack.c.bf16 %v2773_v53, %v2772_v12  ;;  %v2735_v40 = vadd.f32 %v5469_v7, %v2697_v59  ;;  %v4314_v62 = vor.u32 %v4532_v47, %v4313_v33  ;;  %v4349_v45 = vld [vmem:[%s6051_s5 + $0x78] sm:$0xf]  ;;  %v4541_v25 = vld [vmem:[%s6051_s5 + $0x80] sm:$0xf0]  ;;  %v4534_v38 = vld [vmem:[%s6051_s5 + $0x4c] sm:$0xf] }
 0x404   : > { %v2802_v30 = vpack.c.bf16 %v2785_v29, %v2784_v52  ;;  %2971 = vmatmul.bf16.gmra.mxu1 %v4302_v5  ;;  %v2771_v43 = vmax.f32 %v2737_v1, 0.0  ;;  %v2734_v52 = vadd.f32 %v5469_v7, %v2696_v54  ;;  %v4525_v29 = vld [vmem:[%s6051_s5 + $0x4] sm:$0xf]  ;;  %v4334_v6 = vor.u32 %v4536_v26, %v4333_v39  ;;  %v4327_v61 = vld [vmem:[%s6051_s5 + $0x54] sm:$0xf0]  ;;  %v4548_v34 = vld [vmem:[%s6049_s3 + $0x28] sm:$0xff] }
 0x405   : > { %v2770_v31 = vmax.f32 %v2736_v37, 0.0  ;;  %v2769_v24 = vmax.f32 %v2735_v40, 0.0  ;;  %v4294_v21 = vor.u32 %v4525_v29, %v4291_v13  ;;  %v4338_v55 = vor.u32 %v4538_v51, %v4337_v41  ;;  %v4542_v4 = vld [vmem:[%s6051_s5 + $0x88] sm:$0xf0]  ;;  %v4339_v5 = vld [vmem:[%s6051_s5 + $0x6c] sm:$0xf0] }
 0x406   : > { %3003 = vmatpush.bf16.msra.mxu2 %v2799_v18  ;;  %v2956_v11 = vand.u32 %v2954_v63, %v2802_v30  ;;  %v2768_v7 = vmax.f32 %v2734_v52, 0.0  ;;  %v4533_v18 = vld [vmem:[%s6051_s5 + $0x40] sm:$0xf0]  ;;  %v4325_v63 = vld [vmem:[%s6051_s5 + $0x48] sm:$0xf]  ;;  %v4306_v30 = vor.u32 %v4528_v32, %v4303_v15  ;;  %v4318_v17 = vor.u32 %v4531_v20, %v4315_v16  ;;  %v4545_v47 = vld [vmem:[%s6049_s3 + $0x10] sm:$0xff] }
 0x407   : > { %v2795_v8 = vpack.c.bf16 %v2771_v43, %v2770_v31  ;;  %v4322_v35 = vor.u32 %v4533_v18, %v4321_v36  ;;  %v4326_v44 = vor.u32 %v4535_v2, %v4325_v63  ;;  %v4330_v22 = vor.u32 %v4534_v38, %v4327_v61  ;;  %v2828_v10 = vld [vmem:[%s6051_s5 + $0x98] sm:$0xf]  ;;  %v4351_v53 = vld [vmem:[%s6051_s5 + $0x84] sm:$0xf0]  ;;  %3173 = vmatpush.bf16.msrb.mxu1 %v4545_v47 }
 0x408   : > { %3051 = vmatpush.bf16.msra.mxu3 %v2956_v11  ;;  %v2794_v46 = vpack.c.bf16 %v2769_v24, %v2768_v7  ;;  %v4539_v11 = vld [vmem:[%s6051_s5 + $0x70] sm:$0xf0]  ;;  %v4342_v19 = vor.u32 %v4537_v28, %v4339_v5  ;;  %v2891_v48 = vunpack.c.l.b16 %v2827_v27  ;;  %v2893_v42 = vunpack.c.l.b16 %v2828_v10  ;;  %v4544_v31 = vld [vmem:[%s6049_s3 + $0x8] sm:$0xff]  ;;  %v4547_v7 = vld [vmem:[%s6049_s3 + $0x20] sm:$0xff] }
 0x409   : > { %v4346_v50 = vor.u32 %v4539_v11, %v4345_v23  ;;  %v2892_v12 = vunpack.c.h.b16 %v2827_v27 }
 0x40a   : > { %3004 = vmatpush.bf16.msra.mxu2 %v2798_v58  ;;  %v4350_v58 = vor.u32 %v4541_v25, %v4349_v45  ;;  %v2912_v57 = vpack.c.b16 %v2891_v48, %v2891_v48  ;;  %v2914_v1 = vpack.c.b16 %v2893_v42, %v2893_v42 }
 0x40b   : > { %4359 = vmatmul.msk.bf16.vlgmr.msra.gmra.mxu3 %vm2929_vm5, %v4298_v60  ;;  %v4357_v60 = vld [vmem:[%s6051_s5 + $0x80] sm:$0xf]  ;;  %v2913_v37 = vpack.c.b16 %v2892_v12, %v2892_v12 }
 0x40c   : > { %v4358_v56 = vor.u32 %v4542_v4, %v4357_v60  ;;  %3314 = vmatpush.bf16.msrb.mxu3 %v4548_v34 }
 0x40e   : > { %3005 = vmatpush.bf16.msra.mxu2 %v2797_v3  ;;  %v4540_v3 = vld [vmem:[%s6051_s5 + $0x7c] sm:$0xf] }
 0x40f   : > { %v4354_v59 = vor.u32 %v4540_v3, %v4351_v53 }
 0x410   : > { %3315 = vmatpush.bf16.msrb.mxu3 %v4547_v7 }
 0x412   : > { %3006 = vmatpush.bf16.msra.mxu2 %v2796_v0 }
 0x414   : > { %2976 = vmatmul.bf16.gmra.mxu1 %v4314_v62 }
 0x416   : > { %3007 = vmatpush.bf16.msra.mxu2 %v2795_v8  ;;  %v4543_v8 = vld [vmem:[%s6049_s3] sm:$0xff] }
 0x41a   : > { %3008 = vmatpush.bf16.msra.mxu2 %v2794_v46 }
 0x41b   : > { %4360 = vmatmul.msk.bf16.gmra.mxu3 %vm2929_vm5, %v4310_v14 }
 0x41d   : > { %3009 = vmatmul.bf16.vlgmr.msra.gmra.mxu2 %v4294_v21 }
 0x41e   : > { %3233 = vmatpush.bf16.msrb.mxu2 %v4544_v31 }
 0x422   : > { %3234 = vmatpush.bf16.msrb.mxu2 %v4543_v8 }
 0x424   : > { %2981 = vmatmul.bf16.gmra.mxu1 %v4326_v44 }
 0x42b   : > { %4361 = vmatmul.msk.bf16.gmra.mxu3 %vm2929_vm5, %v4322_v35 }
 0x42d   : > { %3014 = vmatmul.bf16.gmra.mxu2 %v4306_v30 }
 0x434   : > { %2986 = vmatmul.bf16.gmra.mxu1 %v4338_v55 }
 0x43b   : > { %4362 = vmatmul.msk.bf16.gmra.mxu3 %vm2929_vm5, %v4334_v6 }
 0x43d   : > { %3019 = vmatmul.bf16.gmra.mxu2 %v4318_v17 }
 0x444   : > { %2991 = vmatmul.bf16.gmra.mxu1 %v4350_v58 }
 0x44b   : > { %4363 = vmatmul.msk.bf16.gmra.mxu3 %vm2929_vm5, %v4346_v50 }
 0x44d   : > { %3024 = vmatmul.bf16.gmra.mxu2 %v4330_v22 }
 0x454   : > { %2996 = vmatmul.bf16.gmra.mxu1 %v2912_v57 }
 0x45b   : > { %4364 = vmatmul.msk.bf16.gmra.mxu3 %vm2929_vm5, %v4358_v56 }
 0x45d   : > { %3029 = vmatmul.bf16.gmra.mxu2 %v4342_v19 }
 0x46b   : > { %4365 = vmatmul.msk.bf16.gmra.mxu3 %vm2929_vm5, %v2914_v1 }
 0x46d   : > { %3034 = vmatmul.bf16.gmra.mxu2 %v4354_v59 }
 0x471   : > { %v2967_v54 = vpop.f32.mrf.mxu1 }
 0x479   : > { %v2969_v0 = vpop.f32.mrf.mxu1 }
 0x47d   : > { %3039 = vmatmul.bf16.gmra.mxu2 %v2913_v37 }
 0x481   : > { %v2972_v43 = vpop.f32.mrf.mxu1 }
 0x489   : > { %v2974_v52 = vpop.f32.mrf.mxu1 }
 0x48e   : > { %v3053_v40 = vpop.f32.mrf.mxu3 }
 0x491   : > { %v2977_v33 = vpop.f32.mrf.mxu1 }
 0x496   : > { %v3055_v24 = vpop.f32.mrf.mxu3 }
 0x499   : > { %v2979_v14 = vpop.f32.mrf.mxu1 }
 0x49e   : > { %v3058_v29 = vpop.f32.mrf.mxu3 }
 0x4a0   : > { %v3010_v13 = vpop.f32.mrf.mxu2 }
 0x4a1   : > { %v3011_v46 = vadd.f32 %v3010_v13, %v2967_v54  ;;  %v2982_v63 = vpop.f32.mrf.mxu1 }
 0x4a3   : > { %v3054_v62 = vadd.f32 %v3053_v40, %v3011_v46 }
 0x4a5   : > { %3087 = vst.msk [vmem:[#allocation3] sm:$0xff] %vm2439_vm2, %v3054_v62 }
 0x4a6   : > { %v3060_v21 = vpop.f32.mrf.mxu3 }
 0x4a8   : > { %v3012_v36 = vpop.f32.mrf.mxu2 }
 0x4a9   : > { %v3013_v18 = vadd.f32 %v3012_v36, %v2969_v0  ;;  %v5728_v44 = vpop.f32.mrf.mxu1 }
 0x4ab   : > { %v3056_v2 = vadd.f32 %v3055_v24, %v3013_v18 }
 0x4ac   : > { %v3100_v39 = vld [vmem:[#allocation3] sm:$0xff] }
 0x4ad   : > { %3088 = vst.msk [vmem:[#allocation3 + $0x8] sm:$0xff] %vm2439_vm2, %v3056_v2 }
 0x4ae   : > { %v3063_v32 = vpop.f32.mrf.mxu3 }
 0x4b0   : > { %v3015_v15 = vpop.f32.mrf.mxu2 }
 0x4b1   : > { %v3016_v35 = vadd.f32 %v3015_v15, %v2972_v43  ;;  %v5732_v6 = vpop.f32.mrf.mxu1 }
 0x4b3   : > { %v3059_v30 = vadd.f32 %v3058_v29, %v3016_v35 }
 0x4b4   : > { %v3101_v26 = vld [vmem:[#allocation3 + $0x8] sm:$0xff] }
 0x4b5   : > { %3089 = vst.msk [vmem:[#allocation3 + $0x10] sm:$0xff] %vm2439_vm2, %v3059_v30  ;;  %v3110_v41 = vpack.c.bf16 %v3101_v26, %v3100_v39  ;;  %v3119_v17 = vld [vmem:[#allocation3 + $0x1] sm:$0xff] }
 0x4b6   : > { %v3065_v51 = vpop.f32.mrf.mxu3  ;;  %v3261_v11 = vld [vmem:[#allocation3 + $0x2] sm:$0xff] }
 0x4b7   : > { %4391 = vmatmul.msk.bf16.vlgmr.msrb.gmra.mxu2 %vm2439_vm2, %v3110_v41  ;;  %v4551_v41 = vld [vmem:[%s6049_s3 + $0x40] sm:$0xff] }
 0x4b8   : > { %v3017_v20 = vpop.f32.mrf.mxu2 }
 0x4b9   : > { %v3018_v16 = vadd.f32 %v3017_v20, %v2974_v52  ;;  %v5740_v60 = vpop.f32.mrf.mxu1 }
 0x4bb   : > { %v3061_v55 = vadd.f32 %v3060_v21, %v3018_v16 }
 0x4bc   : > { %v3120_v23 = vld [vmem:[#allocation3 + $0x9] sm:$0xff] }
 0x4bd   : > { %v5734_v45 = vld [vmem:[#allocation3 + $0xa] sm:$0xff]  ;;  %3090 = vst.msk [vmem:[#allocation3 + $0x18] sm:$0xff] %vm2439_vm2, %v3061_v55  ;;  %v3129_v25 = vpack.c.bf16 %v3120_v23, %v3119_v17  ;;  %v4550_v23 = vld [vmem:[%s6049_s3 + $0x38] sm:$0xff] }
 0x4be   : > { %v3271_v38 = vpack.c.bf16 %v5734_v45, %v3261_v11  ;;  %v3068_v61 = vpop.f32.mrf.mxu3  ;;  %v3102_v4 = vld [vmem:[#allocation3 + $0x10] sm:$0xff]  ;;  %v4554_v11 = vld [vmem:[%s6049_s3 + $0x58] sm:$0xff]  ;;  %3405 = vmatpush.bf16.msra.mxu1 %v4550_v23 }
 0x4bf   : > { %4378 = vmatmul.msk.bf16.vlgmr.msrb.gmra.mxu1 %vm2439_vm2, %v3129_v25  ;;  %3587 = vmatpush.bf16.msra.mxu3 %v4554_v11 }
 0x4c0   : > { %4408 = vmatmul.msk.bf16.vlgmr.msrb.gmra.mxu3 %vm2439_vm2, %v3271_v38  ;;  %v3020_v50 = vpop.f32.mrf.mxu2 }
 0x4c1   : > { %v3021_v58 = vadd.f32 %v3020_v50, %v2977_v33  ;;  %v5753_v12 = vpop.f32.mrf.mxu1  ;;  %v4549_v50 = vld [vmem:[%s6049_s3 + $0x30] sm:$0xff] }
 0x4c2   : > { %3406 = vmatpush.bf16.msra.mxu1 %v4549_v50  ;;  %v4555_v50 = vld [vmem:[%s6049_s3 + $0x60] sm:$0xff] }
 0x4c3   : > { %v3064_v22 = vadd.f32 %v3063_v32, %v3021_v58  ;;  %v4553_v58 = vld [vmem:[%s6049_s3 + $0x50] sm:$0xff] }
 0x4c4   : > { %v3103_v28 = vld [vmem:[#allocation3 + $0x18] sm:$0xff]  ;;  %3588 = vmatpush.bf16.msra.mxu3 %v4553_v58  ;;  %v4559_v58 = vld [vmem:[%s6049_s3 + $0x80] sm:$0xff] }
 0x4c5   : > { %v5742_v5 = vld [vmem:[#allocation3 + $0x12] sm:$0xff]  ;;  %3091 = vst.msk [vmem:[#allocation3 + $0x20] sm:$0xff] %vm2439_vm2, %v3064_v22  ;;  %v3111_v56 = vpack.c.bf16 %v3103_v28, %v3102_v4 }
 0x4c6   : > { %v3362_v19 = vpack.c.bf16 %v5742_v5, %v5734_v45  ;;  %v3070_v27 = vpop.f32.mrf.mxu3  ;;  %v3121_v42 = vld [vmem:[#allocation3 + $0x11] sm:$0xff] }
 0x4c7   : > { %4392 = vmatmul.msk.bf16.gmra.mxu2 %vm2439_vm2, %v3111_v56  ;;  %v5755_v37 = vld [vmem:[#allocation3 + $0x14] sm:$0xff] }
 0x4c8   : > { %v3022_v48 = vpop.f32.mrf.mxu2 }
 0x4c9   : > { %v3023_v57 = vadd.f32 %v3022_v48, %v2979_v14  ;;  %v5769_v7 = vpop.f32.mrf.mxu1 }
 0x4cb   : > { %v3066_v10 = vadd.f32 %v3065_v51, %v3023_v57 }
 0x4cc   : > { %v3122_v3 = vld [vmem:[#allocation3 + $0x19] sm:$0xff] }
 0x4cd   : > { %v5748_v53 = vld [vmem:[#allocation3 + $0x1a] sm:$0xff]  ;;  %3092 = vst.msk [vmem:[#allocation3 + $0x28] sm:$0xff] %vm2439_vm2, %v3066_v10  ;;  %v3130_v1 = vpack.c.bf16 %v3122_v3, %v3121_v42 }
 0x4ce   : > { %v3272_v59 = vpack.c.bf16 %v5748_v53, %v5742_v5  ;;  %v5757_v54 = vld [vmem:[#allocation3 + $0x1c] sm:$0xff]  ;;  %v3073_v43 = vpop.f32.mrf.mxu3 }
 0x4cf   : > { %v3635_v0 = vpack.c.bf16 %v5757_v54, %v5755_v37  ;;  %4379 = vmatmul.msk.bf16.gmra.mxu1 %vm2439_vm2, %v3130_v1  ;;  %v3104_v8 = vld [vmem:[#allocation3 + $0x20] sm:$0xff] }
 0x4d0   : > { %4409 = vmatmul.msk.bf16.gmra.mxu3 %vm2439_vm2, %v3272_v59  ;;  %v3025_v40 = vpop.f32.mrf.mxu2 }
 0x4d1   : > { %v3026_v31 = vadd.f32 %v3025_v40, %v2982_v63  ;;  %v5785_v35 = vpop.f32.mrf.mxu1 }
 0x4d3   : > { %v3069_v52 = vadd.f32 %v3068_v61, %v3026_v31 }
 0x4d4   : > { %v3105_v24 = vld [vmem:[#allocation3 + $0x28] sm:$0xff] }
 0x4d5   : > { %v5763_v9 = vld [vmem:[#allocation3 + $0x22] sm:$0xff]  ;;  %3093 = vst.msk [vmem:[#allocation3 + $0x30] sm:$0xff] %vm2439_vm2, %v3069_v52  ;;  %v3112_v34 = vpack.c.bf16 %v3105_v24, %v3104_v8 }
 0x4d6   : > { %v3363_v33 = vpack.c.bf16 %v5763_v9, %v5748_v53  ;;  %v3075_v47 = vpop.f32.mrf.mxu3  ;;  %v3123_v14 = vld [vmem:[#allocation3 + $0x21] sm:$0xff]  ;;  %v4558_v53 = vld [vmem:[%s6049_s3 + $0x78] sm:$0xff] }
 0x4d7   : > { %4393 = vmatmul.msk.bf16.gmra.mxu2 %vm2439_vm2, %v3112_v34  ;;  %v5777_v63 = vld [vmem:[#allocation3 + $0x24] sm:$0xff] }
 0x4d8   : > { %v3027_v29 = vpop.f32.mrf.mxu2  ;;  %v3545_v11 = vpack.c.bf16 %v5777_v63, %v5757_v54  ;;  %v3809_v54 = vld [vmem:[#allocation3 + $0x26] sm:$0xff] }
 0x4d9   : > { %v3028_v13 = vadd.f32 %v3027_v29, %v5728_v44  ;;  %v4552_v44 = vld [vmem:[%s6049_s3 + $0x48] sm:$0xff]  ;;  %v2999_v25 = vpop.f32.mrf.mxu1 }
 0x4da   : > { %3496 = vmatpush.bf16.msra.mxu2 %v4552_v44 }
 0x4db   : > { %v3071_v46 = vadd.f32 %v3070_v27, %v3028_v13 }
 0x4dc   : > { %v3124_v62 = vld [vmem:[#allocation3 + $0x29] sm:$0xff] }
 0x4dd   : > { %v5772_v21 = vld [vmem:[#allocation3 + $0x2a] sm:$0xff]  ;;  %3094 = vst.msk [vmem:[#allocation3 + $0x38] sm:$0xff] %vm2439_vm2, %v3071_v46  ;;  %v3131_v36 = vpack.c.bf16 %v3124_v62, %v3123_v14 }
 0x4de   : > { %v3273_v18 = vpack.c.bf16 %v5772_v21, %v5763_v9  ;;  %v5779_v2 = vld [vmem:[#allocation3 + $0x2c] sm:$0xff]  ;;  %v3078_v15 = vpop.f32.mrf.mxu3  ;;  %3497 = vmatpush.bf16.msra.mxu2 %v4551_v41 }
 0x4df   : > { %v3636_v32 = vpack.c.bf16 %v5779_v2, %v5777_v63  ;;  %4380 = vmatmul.msk.bf16.gmra.mxu1 %vm2439_vm2, %v3131_v36  ;;  %v3106_v51 = vld [vmem:[#allocation3 + $0x30] sm:$0xff] }
 0x4e0   : > { %4410 = vmatmul.msk.bf16.gmra.mxu3 %vm2439_vm2, %v3273_v18  ;;  %v3030_v30 = vpop.f32.mrf.mxu2  ;;  %v3447_v5 = vld [vmem:[#allocation3 + $0x2b] sm:$0xff] }
 0x4e1   : > { %v3031_v39 = vadd.f32 %v3030_v30, %v5732_v6  ;;  %v3444_v30 = vld [vmem:[#allocation3 + $0x13] sm:$0xff] }
 0x4e2   : > { %3769 = vmatpush.bf16.msrb.mxu2 %v4558_v53  ;;  %v3718_v53 = vld [vmem:[#allocation3 + $0x25] sm:$0xff] }
 0x4e3   : > { %v3074_v26 = vadd.f32 %v3073_v43, %v3031_v39 }
 0x4e4   : > { %v3107_v20 = vld [vmem:[#allocation3 + $0x38] sm:$0xff] }
 0x4e5   : > { %v5794_v16 = vld [vmem:[#allocation3 + $0x32] sm:$0xff]  ;;  %3095 = vst.msk [vmem:[#allocation3 + $0x40] sm:$0xff] %vm2439_vm2, %v3074_v26  ;;  %v3113_v55 = vpack.c.bf16 %v3107_v20, %v3106_v51 }
 0x4e6   : > { %v3364_v17 = vpack.c.bf16 %v5794_v16, %v5772_v21  ;;  %v3080_v6 = vpop.f32.mrf.mxu3  ;;  %v3125_v4 = vld [vmem:[#allocation3 + $0x31] sm:$0xff]  ;;  %v4556_v21 = vld [vmem:[%s6049_s3 + $0x68] sm:$0xff] }
 0x4e7   : > { %4394 = vmatmul.msk.bf16.gmra.mxu2 %vm2439_vm2, %v3113_v55  ;;  %v5818_v48 = vld [vmem:[#allocation3 + $0x34] sm:$0xff]  ;;  %v3443_v26 = vld [vmem:[#allocation3 + $0xb] sm:$0xff]  ;;  %3678 = vmatpush.bf16.msrb.mxu1 %v4556_v21 }
 0x4e8   : > { %v3032_v38 = vpop.f32.mrf.mxu2  ;;  %v3453_v41 = vpack.c.bf16 %v3444_v30, %v3443_v26  ;;  %v3534_v20 = vld [vmem:[#allocation3 + $0xc] sm:$0xff]  ;;  %v3546_v25 = vpack.c.bf16 %v5818_v48, %v5779_v2  ;;  %v3716_v30 = vld [vmem:[#allocation3 + $0x15] sm:$0xff] }
 0x4e9   : > { %v3033_v61 = vadd.f32 %v3032_v38, %v5740_v60  ;;  %v3544_v55 = vpack.c.bf16 %v5755_v37, %v3534_v20  ;;  %v3448_v45 = vld [vmem:[#allocation3 + $0x33] sm:$0xff] }
 0x4ea   : > { %v3810_v21 = vld [vmem:[#allocation3 + $0x2e] sm:$0xff]  ;;  %v3811_v2 = vld [vmem:[#allocation3 + $0x36] sm:$0xff] }
 0x4eb   : > { %v3076_v22 = vadd.f32 %v3075_v47, %v3033_v61  ;;  %3679 = vmatpush.bf16.msrb.mxu1 %v4555_v50 }
 0x4ec   : > { %v3126_v28 = vld [vmem:[#allocation3 + $0x39] sm:$0xff] }
 0x4ed   : > { %v5813_v56 = vld [vmem:[#allocation3 + $0x3a] sm:$0xff]  ;;  %3096 = vst.msk [vmem:[#allocation3 + $0x48] sm:$0xff] %vm2439_vm2, %v3076_v22  ;;  %v3132_v27 = vpack.c.bf16 %v3126_v28, %v3125_v4 }
 0x4ee   : > { %v3274_v60 = vpack.c.bf16 %v5813_v56, %v5794_v16  ;;  %v5820_v57 = vld [vmem:[#allocation3 + $0x3c] sm:$0xff]  ;;  %v3083_v42 = vpop.f32.mrf.mxu3  ;;  %v4560_v16 = vld [vmem:[%s6049_s3 + $0x88] sm:$0xff] }
 0x4ef   : > { %v3637_v10 = vpack.c.bf16 %v5820_v57, %v5818_v48  ;;  %4381 = vmatmul.msk.bf16.gmra.mxu1 %vm2439_vm2, %v3132_v27  ;;  %v3108_v43 = vld [vmem:[#allocation3 + $0x40] sm:$0xff]  ;;  %3860 = vmatpush.bf16.msrb.mxu3 %v4560_v16 }
 0x4f0   : > { %4411 = vmatmul.msk.bf16.gmra.mxu3 %vm2439_vm2, %v3274_v60  ;;  %v3035_v3 = vpop.f32.mrf.mxu2  ;;  %v3449_v38 = vld [vmem:[#allocation3 + $0x3b] sm:$0xff] }
 0x4f1   : > { %v3036_v1 = vadd.f32 %v3035_v3, %v5753_v12 }
 0x4f3   : > { %v3079_v59 = vadd.f32 %v3078_v15, %v3036_v1  ;;  %3861 = vmatpush.bf16.msrb.mxu3 %v4559_v58 }
 0x4f4   : > { %v3109_v40 = vld [vmem:[#allocation3 + $0x48] sm:$0xff] }
 0x4f5   : > { %v5827_v31 = vld [vmem:[#allocation3 + $0x42] sm:$0xff]  ;;  %3097 = vst.msk [vmem:[#allocation3 + $0x50] sm:$0xff] %vm2439_vm2, %v3079_v59  ;;  %v3114_v52 = vpack.c.bf16 %v3109_v40, %v3108_v43 }
 0x4f6   : > { %v3365_v8 = vpack.c.bf16 %v5827_v31, %v5813_v56  ;;  %v3085_v24 = vpop.f32.mrf.mxu3  ;;  %v3127_v13 = vld [vmem:[#allocation3 + $0x41] sm:$0xff] }
 0x4f7   : > { %4395 = vmatmul.msk.bf16.gmra.mxu2 %vm2439_vm2, %v3114_v52  ;;  %v5839_v36 = vld [vmem:[#allocation3 + $0x44] sm:$0xff] }
 0x4f8   : > { %v3037_v34 = vpop.f32.mrf.mxu2  ;;  %v3450_v9 = vld [vmem:[#allocation3 + $0x43] sm:$0xff]  ;;  %v3547_v28 = vpack.c.bf16 %v5839_v36, %v5820_v57 }
 0x4f9   : > { %v3038_v47 = vadd.f32 %v3037_v34, %v5769_v7  ;;  %v3456_v61 = vpack.c.bf16 %v3450_v9, %v3449_v38  ;;  %v3813_v57 = vld [vmem:[#allocation3 + $0x46] sm:$0xff] }
 0x4fb   : > { %v3081_v29 = vadd.f32 %v3080_v6, %v3038_v47  ;;  %v3445_v6 = vld [vmem:[#allocation3 + $0x1b] sm:$0xff] }
 0x4fc   : > { %v3128_v12 = vld [vmem:[#allocation3 + $0x49] sm:$0xff] }
 0x4fd   : > { %v5834_v46 = vld [vmem:[#allocation3 + $0x4a] sm:$0xff]  ;;  %3098 = vst.msk [vmem:[#allocation3 + $0x58] sm:$0xff] %vm2439_vm2, %v3081_v29  ;;  %v3133_v14 = vpack.c.bf16 %v3128_v12, %v3127_v13 }
 0x4fe   : > { %v3275_v62 = vpack.c.bf16 %v5834_v46, %v5827_v31  ;;  %v5841_v18 = vld [vmem:[#allocation3 + $0x4c] sm:$0xff] }
 0x4ff   : > { %v3638_v15 = vpack.c.bf16 %v5841_v18, %v5839_v36  ;;  %4382 = vmatmul.msk.bf16.gmra.mxu1 %vm2439_vm2, %v3133_v14  ;;  %v3451_v59 = vld [vmem:[#allocation3 + $0x4b] sm:$0xff] }
 0x500   : > { %4412 = vmatmul.msk.bf16.gmra.mxu3 %vm2439_vm2, %v3275_v62  ;;  %v3040_v7 = vpop.f32.mrf.mxu2  ;;  %v3717_v62 = vld [vmem:[#allocation3 + $0x1d] sm:$0xff] }
 0x501   : > { %v3041_v44 = vadd.f32 %v3040_v7, %v5785_v35  ;;  %v3446_v35 = vld [vmem:[#allocation3 + $0x23] sm:$0xff]  ;;  %v3726_v26 = vpack.c.bf16 %v3717_v62, %v3716_v30  ;;  %v3814_v30 = vld [vmem:[#allocation3 + $0x4e] sm:$0xff] }
 0x502   : > { %v3454_v23 = vpack.c.bf16 %v3446_v35, %v3445_v6  ;;  %v3807_v35 = vld [vmem:[#allocation3 + $0x16] sm:$0xff] }
 0x503   : > { %v3084_v39 = vadd.f32 %v3083_v42, %v3041_v44 }
 0x504   : > { %v3452_v42 = vld [vmem:[#allocation3 + $0x53] sm:$0xff] }
 0x505   : > { %3099 = vst.msk [vmem:[#allocation3 + $0x60] sm:$0xff] %vm2439_vm2, %v3084_v39  ;;  %v3457_v40 = vpack.c.bf16 %v3452_v42, %v3451_v59  ;;  %v3361_v34 = vld [vmem:[#allocation3 + $0x52] sm:$0xff] }
 0x506   : > { %v5901_v47 = vld [vmem:[#allocation3 + $0x54] sm:$0xff]  ;;  %v3366_v29 = vpack.c.bf16 %v3361_v34, %v5834_v46 }
 0x507   : > { %4442 = vmatmul.msk.bf16.vlgmr.msra.gmra.mxu2 %vm2439_vm2, %v3453_v41  ;;  %v3548_v13 = vpack.c.bf16 %v5901_v47, %v5841_v18 }
 0x508   : > { %v3042_v51 = vpop.f32.mrf.mxu2 }
 0x509   : > { %v3808_v51 = vld [vmem:[#allocation3 + $0x1e] sm:$0xff] }
 0x50c   : > { %v3634_v18 = vld [vmem:[#allocation3 + $0x5c] sm:$0xff] }
 0x50f   : > { %4425 = vmatmul.msk.bf16.vlgmr.msra.gmra.mxu1 %vm2439_vm2, %v3362_v19  ;;  %v3455_v19 = vpack.c.bf16 %v3448_v45, %v3447_v5  ;;  %v3719_v5 = vld [vmem:[#allocation3 + $0x2d] sm:$0xff] }
 0x510   : > { %4459 = vmatmul.msk.bf16.vlgmr.msra.gmra.mxu3 %vm2439_vm2, %v3544_v55 }
 0x517   : > { %4443 = vmatmul.msk.bf16.gmra.mxu2 %vm2439_vm2, %v3454_v23  ;;  %v3817_v23 = vpack.c.bf16 %v3808_v51, %v3807_v35 }
 0x51f   : > { %4426 = vmatmul.msk.bf16.gmra.mxu1 %vm2439_vm2, %v3363_v33  ;;  %v4557_v33 = vld [vmem:[%s6049_s3 + $0x70] sm:$0xff] }
 0x520   : > { %4460 = vmatmul.msk.bf16.gmra.mxu3 %vm2439_vm2, %v3545_v11  ;;  %3770 = vmatpush.bf16.msrb.mxu2 %v4557_v33  ;;  %v3727_v33 = vpack.c.bf16 %v3719_v5, %v3718_v53 }
 0x527   : > { %4444 = vmatmul.msk.bf16.gmra.mxu2 %vm2439_vm2, %v3455_v19 }
 0x52f   : > { %4427 = vmatmul.msk.bf16.gmra.mxu1 %vm2439_vm2, %v3364_v17 }
 0x530   : > { %4461 = vmatmul.msk.bf16.gmra.mxu3 %vm2439_vm2, %v3546_v25 }
 0x537   : > { %4445 = vmatmul.msk.bf16.gmra.mxu2 %vm2439_vm2, %v3456_v61 }
 0x53a   : > { %v3236_v17 = vpop.f32.mrf.mxu2 }
 0x53c   : > { %v3175_v22 = vpop.f32.mrf.mxu1 }
 0x53d   : > { %v3237_v4 = vadd.f32 %v3236_v17, %v3175_v22  ;;  %v3818_v17 = vpack.c.bf16 %v3810_v21, %v3809_v54  ;;  %v3721_v22 = vld [vmem:[#allocation3 + $0x3d] sm:$0xff] }
 0x53f   : > { %4428 = vmatmul.msk.bf16.gmra.mxu1 %vm2439_vm2, %v3365_v8 }
 0x540   : > { %4462 = vmatmul.msk.bf16.gmra.mxu3 %vm2439_vm2, %v3547_v28 }
 0x542   : > { %v3238_v27 = vpop.f32.mrf.mxu2 }
 0x543   : > { %v3317_v60 = vpop.f32.mrf.mxu3 }
 0x544   : > { %v5898_v3 = vadd.f32 %v3317_v60, %v3237_v4  ;;  %v3177_v1 = vpop.f32.mrf.mxu1 }
 0x545   : > { %v3239_v43 = vadd.f32 %v3238_v27, %v3177_v1  ;;  %v3720_v27 = vld [vmem:[#allocation3 + $0x35] sm:$0xff] }
 0x546   : > { %v3728_v42 = vpack.c.bf16 %v3721_v22, %v3720_v27 }
 0x547   : > { %4446 = vmatmul.msk.bf16.gmra.mxu2 %vm2439_vm2, %v3457_v40 }
 0x54a   : > { %v3241_v52 = vpop.f32.mrf.mxu2 }
 0x54b   : > { %v3319_v24 = vpop.f32.mrf.mxu3 }
 0x54c   : > { %v5903_v56 = vadd.f32 %v3319_v24, %v3239_v43  ;;  %v3180_v31 = vpop.f32.mrf.mxu1  ;;  %v3812_v43 = vld [vmem:[#allocation3 + $0x3e] sm:$0xff] }
 0x54d   : > { %v3242_v8 = vadd.f32 %v3241_v52, %v3180_v31  ;;  %v3819_v52 = vpack.c.bf16 %v3812_v43, %v3811_v2  ;;  %v3723_v31 = vld [vmem:[#allocation3 + $0x4d] sm:$0xff] }
 0x54f   : > { %4429 = vmatmul.msk.bf16.gmra.mxu1 %vm2439_vm2, %v3366_v29 }
 0x550   : > { %4463 = vmatmul.msk.bf16.gmra.mxu3 %vm2439_vm2, %v3548_v13  ;;  %v3722_v13 = vld [vmem:[#allocation3 + $0x45] sm:$0xff] }
 0x552   : > { %v3243_v12 = vpop.f32.mrf.mxu2 }
 0x553   : > { %v3322_v14 = vpop.f32.mrf.mxu3 }
 0x554   : > { %v5910_v7 = vadd.f32 %v3322_v14, %v3242_v8  ;;  %v3182_v44 = vpop.f32.mrf.mxu1  ;;  %v3729_v14 = vpack.c.bf16 %v3723_v31, %v3722_v13 }
 0x555   : > { %v3244_v39 = vadd.f32 %v3243_v12, %v3182_v44 }
 0x557   : > { %4493 = vmatmul.msk.bf16.vlgmr.msrb.gmra.mxu2 %vm2439_vm2, %v3726_v26  ;;  %v3820_v26 = vpack.c.bf16 %v3814_v30, %v3813_v57 }
 0x55a   : > { %v3246_v41 = vpop.f32.mrf.mxu2 }
 0x55b   : > { %v3324_v46 = vpop.f32.mrf.mxu3 }
 0x55c   : > { %v5913_v20 = vadd.f32 %v3324_v46, %v3244_v39  ;;  %v3185_v55 = vpop.f32.mrf.mxu1 }
 0x55d   : > { %v3247_v6 = vadd.f32 %v3246_v41, %v3185_v55  ;;  %v3725_v55 = vld [vmem:[#allocation3 + $0x5d] sm:$0xff] }
 0x55f   : > { %4476 = vmatmul.msk.bf16.vlgmr.msrb.gmra.mxu1 %vm2439_vm2, %v3635_v0 }
 0x560   : > { %4510 = vmatmul.msk.bf16.vlgmr.msrb.gmra.mxu3 %vm2439_vm2, %v3817_v23  ;;  %v3724_v23 = vld [vmem:[#allocation3 + $0x55] sm:$0xff] }
 0x562   : > { %v3248_v11 = vpop.f32.mrf.mxu2 }
 0x563   : > { %v3327_v45 = vpop.f32.mrf.mxu3 }
 0x564   : > { %v5920_v19 = vadd.f32 %v3327_v45, %v3247_v6  ;;  %v3187_v25 = vpop.f32.mrf.mxu1  ;;  %v3730_v45 = vpack.c.bf16 %v3725_v55, %v3724_v23 }
 0x565   : > { %v3249_v9 = vadd.f32 %v3248_v11, %v3187_v25 }
 0x567   : > { %4494 = vmatmul.msk.bf16.gmra.mxu2 %vm2439_vm2, %v3727_v33 }
 0x56a   : > { %v3251_v38 = vpop.f32.mrf.mxu2 }
 0x56b   : > { %v3329_v61 = vpop.f32.mrf.mxu3 }
 0x56c   : > { %v5923_v16 = vadd.f32 %v3329_v61, %v3249_v9  ;;  %v3190_v37 = vpop.f32.mrf.mxu1  ;;  %v3815_v9 = vld [vmem:[#allocation3 + $0x56] sm:$0xff] }
 0x56d   : > { %v3252_v0 = vadd.f32 %v3251_v38, %v3190_v37  ;;  %v3639_v38 = vpack.c.bf16 %v3634_v18, %v5901_v47 }
 0x56f   : > { %4477 = vmatmul.msk.bf16.gmra.mxu1 %vm2439_vm2, %v3636_v32 }
 0x570   : > { %4511 = vmatmul.msk.bf16.gmra.mxu3 %vm2439_vm2, %v3818_v17 }
 0x572   : > { %v3253_v50 = vpop.f32.mrf.mxu2 }
 0x573   : > { %v3332_v58 = vpop.f32.mrf.mxu3 }
 0x574   : > { %v5930_v4 = vadd.f32 %v3332_v58, %v3252_v0  ;;  %v3192_v28 = vpop.f32.mrf.mxu1 }
 0x575   : > { %v3254_v60 = vadd.f32 %v3253_v50, %v3192_v28 }
 0x577   : > { %4495 = vmatmul.msk.bf16.gmra.mxu2 %vm2439_vm2, %v3728_v42 }
 0x57a   : > { %v3256_v1 = vpop.f32.mrf.mxu2 }
 0x57b   : > { %v3334_v59 = vpop.f32.mrf.mxu3 }
 0x57c   : > { %v5933_v40 = vadd.f32 %v3334_v59, %v3254_v60  ;;  %v3195_v63 = vpop.f32.mrf.mxu1 }
 0x57d   : > { %v3257_v32 = vadd.f32 %v3256_v1, %v3195_v63 }
 0x57f   : > { %4478 = vmatmul.msk.bf16.gmra.mxu1 %vm2439_vm2, %v3637_v10 }
 0x580   : > { %4512 = vmatmul.msk.bf16.gmra.mxu3 %vm2439_vm2, %v3819_v52 }
 0x582   : > { %v3258_v24 = vpop.f32.mrf.mxu2 }
 0x583   : > { %v3337_v34 = vpop.f32.mrf.mxu3 }
 0x584   : > { %v5940_v8 = vadd.f32 %v3337_v34, %v3257_v32  ;;  %v3197_v29 = vpop.f32.mrf.mxu1 }
 0x585   : > { %v3259_v12 = vadd.f32 %v3258_v24, %v3197_v29 }
 0x587   : > { %4496 = vmatmul.msk.bf16.gmra.mxu2 %vm2439_vm2, %v3729_v14 }
 0x58a   : > { %v3499_v44 = vpop.f32.mrf.mxu2 }
 0x58b   : > { %v3339_v62 = vpop.f32.mrf.mxu3 }
 0x58c   : > { %v5943_v39 = vadd.f32 %v3339_v62, %v3259_v12  ;;  %v3408_v48 = vpop.f32.mrf.mxu1 }
 0x58d   : > { %v3433_v10 = vadd.f32 %v3408_v48, %v5898_v3 }
 0x58f   : > { %4479 = vmatmul.msk.bf16.gmra.mxu1 %vm2439_vm2, %v3638_v15  ;;  %v3524_v41 = vadd.f32 %v3499_v44, %v3433_v10  ;;  %v3816_v15 = vld [vmem:[#allocation3 + $0x5e] sm:$0xff] }
 0x590   : > { %4513 = vmatmul.msk.bf16.gmra.mxu3 %vm2439_vm2, %v3820_v26  ;;  %v3821_v61 = vpack.c.bf16 %v3816_v15, %v3815_v9 }
 0x592   : > { %v3501_v46 = vpop.f32.mrf.mxu2 }
 0x593   : > { %v3590_v51 = vpop.f32.mrf.mxu3 }
 0x594   : > { %v5951_v35 = vadd.f32 %v3590_v51, %v3524_v41  ;;  %v3410_v6 = vpop.f32.mrf.mxu1 }
 0x595   : > { %v3434_v11 = vadd.f32 %v3410_v6, %v5903_v56 }
 0x597   : > { %4497 = vmatmul.msk.bf16.gmra.mxu2 %vm2439_vm2, %v3730_v45  ;;  %v3525_v3 = vadd.f32 %v3501_v46, %v3434_v11 }
 0x59a   : > { %v3504_v5 = vpop.f32.mrf.mxu2 }
 0x59b   : > { %v3592_v36 = vpop.f32.mrf.mxu3 }
 0x59c   : > { %v5955_v25 = vadd.f32 %v3592_v36, %v3525_v3  ;;  %v3413_v53 = vpop.f32.mrf.mxu1 }
 0x59d   : > { %v3435_v33 = vadd.f32 %v3413_v53, %v5910_v7 }
 0x59f   : > { %4480 = vmatmul.msk.bf16.gmra.mxu1 %vm2439_vm2, %v3639_v38  ;;  %v3526_v56 = vadd.f32 %v3504_v5, %v3435_v33 }
 0x5a0   : > { %4514 = vmatmul.msk.bf16.gmra.mxu3 %vm2439_vm2, %v3821_v61 }
 0x5a2   : > { %v3506_v21 = vpop.f32.mrf.mxu2 }
 0x5a3   : > { %v3595_v37 = vpop.f32.mrf.mxu3 }
 0x5a4   : > { %v3617_v54 = vadd.f32 %v3595_v37, %v3526_v56  ;;  %v3415_v0 = vpop.f32.mrf.mxu1 }
 0x5a5   : > { %v3436_v17 = vadd.f32 %v3415_v0, %v5913_v20 }
 0x5a7   : > { %v3527_v50 = vadd.f32 %v3506_v21, %v3436_v17 }
 0x5aa   : > { %v3509_v58 = vpop.f32.mrf.mxu2 }
 0x5ab   : > { %v3597_v22 = vpop.f32.mrf.mxu3 }
 0x5ac   : > { %v3618_v28 = vadd.f32 %v3597_v22, %v3527_v50  ;;  %v3418_v27 = vpop.f32.mrf.mxu1 }
 0x5ad   : > { %v3437_v7 = vadd.f32 %v3418_v27, %v5920_v19 }
 0x5af   : > { %v3528_v47 = vadd.f32 %v3509_v58, %v3437_v7 }
 0x5b2   : > { %v3511_v60 = vpop.f32.mrf.mxu2 }
 0x5b3   : > { %v3600_v42 = vpop.f32.mrf.mxu3 }
 0x5b4   : > { %v3619_v1 = vadd.f32 %v3600_v42, %v3528_v47  ;;  %v3420_v59 = vpop.f32.mrf.mxu1 }
 0x5b5   : > { %v3438_v43 = vadd.f32 %v3420_v59, %v5923_v16 }
 0x5b7   : > { %v3529_v63 = vadd.f32 %v3511_v60, %v3438_v43 }
 0x5ba   : > { %v3514_v2 = vpop.f32.mrf.mxu2 }
 0x5bb   : > { %v3602_v32 = vpop.f32.mrf.mxu3 }
 0x5bc   : > { %v3620_v52 = vadd.f32 %v3602_v32, %v3529_v63  ;;  %v3423_v24 = vpop.f32.mrf.mxu1 }
 0x5bd   : > { %v3439_v20 = vadd.f32 %v3423_v24, %v5930_v4 }
 0x5bf   : > { %v3530_v34 = vadd.f32 %v3514_v2, %v3439_v20 }
 0x5c2   : > { %v3516_v31 = vpop.f32.mrf.mxu2 }
 0x5c3   : > { %v3605_v29 = vpop.f32.mrf.mxu3 }
 0x5c4   : > { %v5965_v13 = vadd.f32 %v3605_v29, %v3530_v34  ;;  %v3425_v19 = vpop.f32.mrf.mxu1 }
 0x5c5   : > { %v3440_v12 = vadd.f32 %v3425_v19, %v5933_v40 }
 0x5c7   : > { %v3531_v14 = vadd.f32 %v3516_v31, %v3440_v12 }
 0x5ca   : > { %v3519_v62 = vpop.f32.mrf.mxu2 }
 0x5cb   : > { %v3607_v44 = vpop.f32.mrf.mxu3 }
 0x5cc   : > { %v5968_v30 = vadd.f32 %v3607_v44, %v3531_v14  ;;  %v3428_v16 = vpop.f32.mrf.mxu1 }
 0x5cd   : > { %v3441_v48 = vadd.f32 %v3428_v16, %v5940_v8 }
 0x5cf   : > { %v3532_v57 = vadd.f32 %v3519_v62, %v3441_v48 }
 0x5d2   : > { %v3521_v10 = vpop.f32.mrf.mxu2 }
 0x5d3   : > { %v3610_v26 = vpop.f32.mrf.mxu3 }
 0x5d4   : > { %v5971_v4 = vadd.f32 %v3610_v26, %v3532_v57  ;;  %v3430_v41 = vpop.f32.mrf.mxu1 }
 0x5d5   : > { %v3442_v46 = vadd.f32 %v3430_v41, %v5943_v39 }
 0x5d7   : > { %v3533_v51 = vadd.f32 %v3521_v10, %v3442_v46 }
 0x5da   : > { %v3772_v6 = vpop.f32.mrf.mxu2 }
 0x5db   : > { %v3612_v55 = vpop.f32.mrf.mxu3 }
 0x5dc   : > { %v5974_v40 = vadd.f32 %v3612_v55, %v3533_v51  ;;  %v3681_v23 = vpop.f32.mrf.mxu1 }
 0x5dd   : > { %v3706_v11 = vadd.f32 %v3681_v23, %v5951_v35 }
 0x5df   : > { %v3797_v45 = vadd.f32 %v3772_v6, %v3706_v11 }
 0x5e2   : > { %v3774_v3 = vpop.f32.mrf.mxu2 }
 0x5e3   : > { %v3863_v5 = vpop.f32.mrf.mxu3 }
 0x5e4   : > { %v3888_v8 = vadd.f32 %v3863_v5, %v3797_v45  ;;  %v3683_v36 = vpop.f32.mrf.mxu1 }
 0x5e5   : > { %v3707_v18 = vadd.f32 %v3683_v36, %v5955_v25 }
 0x5e6   : > { %3899 = vst.msk [vmem:[#allocation4] sm:$0xff] %vm3898_vm6, %v3888_v8 }
 0x5e7   : > { %v3798_v15 = vadd.f32 %v3774_v3, %v3707_v18 }
 0x5ea   : > { %v3777_v39 = vpop.f32.mrf.mxu2 }
 0x5eb   : > { %v3865_v53 = vpop.f32.mrf.mxu3 }
 0x5ec   : > { %v3889_v9 = vadd.f32 %v3865_v53, %v3798_v15  ;;  %v3686_v33 = vpop.f32.mrf.mxu1 }
 0x5ed   : > { %v3708_v38 = vadd.f32 %v3686_v33, %v3617_v54 }
 0x5ee   : > { %3900 = vst.msk [vmem:[#allocation4 + $0x8] sm:$0xff] %vm3898_vm6, %v3889_v9 }
 0x5ef   : > { %v3799_v61 = vadd.f32 %v3777_v39, %v3708_v38 }
 0x5f2   : > { %v3779_v35 = vpop.f32.mrf.mxu2 }
 0x5f3   : > { %v3868_v56 = vpop.f32.mrf.mxu3 }
 0x5f4   : > { %v3890_v21 = vadd.f32 %v3868_v56, %v3799_v61  ;;  %v3688_v37 = vpop.f32.mrf.mxu1 }
 0x5f5   : > { %v3709_v0 = vadd.f32 %v3688_v37, %v3618_v28 }
 0x5f6   : > { %3901 = vst.msk [vmem:[#allocation4 + $0x10] sm:$0xff] %vm3898_vm6, %v3890_v21 }
 0x5f7   : > { %v3800_v17 = vadd.f32 %v3779_v35, %v3709_v0  ;;  %v5995_v0 = vld [vmem:[%s6050_s4] ss:$0 sm:$0xff] }
 0x5fa   : > { %v3782_v50 = vpop.f32.mrf.mxu2 }
 0x5fb   : > { %v3870_v58 = vpop.f32.mrf.mxu3 }
 0x5fc   : > { %v3891_v25 = vadd.f32 %v3870_v58, %v3800_v17  ;;  %v3691_v22 = vpop.f32.mrf.mxu1 }
 0x5fd   : > { %v3710_v27 = vadd.f32 %v3691_v22, %v3619_v1 }
 0x5fe   : > { %3902 = vst.msk [vmem:[#allocation4 + $0x18] sm:$0xff] %vm3898_vm6, %v3891_v25 }
 0x5ff   : > { %v3801_v7 = vadd.f32 %v3782_v50, %v3710_v27 }
 0x602   : > { %v3784_v47 = vpop.f32.mrf.mxu2 }
 0x603   : > { %v3873_v60 = vpop.f32.mrf.mxu3 }
 0x604   : > { %v3892_v54 = vadd.f32 %v3873_v60, %v3801_v7  ;;  %v3693_v42 = vpop.f32.mrf.mxu1 }
 0x605   : > { %v3711_v59 = vadd.f32 %v3693_v42, %v3620_v52 }
 0x606   : > { %3903 = vst.msk [vmem:[#allocation4 + $0x20] sm:$0xff] %vm3898_vm6, %v3892_v54  ;;  %v4012_v54 = vsel %vm4010_vm7, 4294967295, %v4672_v49 }
 0x607   : > { %v3802_v43 = vadd.f32 %v3784_v47, %v3711_v59 }
 0x60a   : > { %v3787_v63 = vpop.f32.mrf.mxu2 }
 0x60b   : > { %v3875_v2 = vpop.f32.mrf.mxu3 }
 0x60c   : > { %v3893_v28 = vadd.f32 %v3875_v2, %v3802_v43  ;;  %v3696_v32 = vpop.f32.mrf.mxu1 }
 0x60d   : > { %v3712_v24 = vadd.f32 %v3696_v32, %v5965_v13  ;;  %v3913_v59 = vld [vmem:[#allocation4 + $0x20] sm:$0xff] }
 0x60e   : > { %3904 = vst.msk [vmem:[#allocation4 + $0x28] sm:$0xff] %vm3898_vm6, %v3893_v28  ;;  %v3912_v28 = vld [vmem:[#allocation4 + $0x18] sm:$0xff] }
 0x60f   : > { %v3803_v20 = vadd.f32 %v3787_v63, %v3712_v24  ;;  %v3921_v63 = vld [vmem:[#allocation4 + $0x19] sm:$0xff] }
 0x610   : > { %v3938_v32 = vld [vmem:[#allocation4 + $0x1a] sm:$0xff] }
 0x611   : > { %v3947_v24 = vld [vmem:[#allocation4 + $0x1b] sm:$0xff] }
 0x612   : > { %v3789_v31 = vpop.f32.mrf.mxu2 }
 0x613   : > { %v3878_v34 = vpop.f32.mrf.mxu3 }
 0x614   : > { %v3894_v1 = vadd.f32 %v3878_v34, %v3803_v20  ;;  %v3698_v29 = vpop.f32.mrf.mxu1 }
 0x615   : > { %v3713_v19 = vadd.f32 %v3698_v29, %v5968_v30  ;;  %v3914_v50 = vld [vmem:[#allocation4 + $0x28] sm:$0xff] }
 0x616   : > { %3905 = vst.msk [vmem:[#allocation4 + $0x30] sm:$0xff] %vm3898_vm6, %v3894_v1  ;;  %v3922_v58 = vld [vmem:[#allocation4 + $0x21] sm:$0xff] }
 0x617   : > { %v3804_v12 = vadd.f32 %v3789_v31, %v3713_v19  ;;  %v3939_v7 = vld [vmem:[#allocation4 + $0x22] sm:$0xff]  ;;  %v3931_v2 = vmax.f32 %v3913_v59, %v3922_v58  ;;  %v3920_v31 = vld [vmem:[#allocation4 + $0x11] sm:$0xff] }
 0x618   : > { %v3948_v47 = vld [vmem:[#allocation4 + $0x23] sm:$0xff]  ;;  %v3937_v19 = vld [vmem:[#allocation4 + $0x12] sm:$0xff] }
 0x619   : > { %v3957_v29 = vmax.f32 %v3939_v7, %v3948_v47 }
 0x61a   : > { %v3792_v16 = vpop.f32.mrf.mxu2 }
 0x61b   : > { %v3880_v52 = vpop.f32.mrf.mxu3 }
 0x61c   : > { %v3895_v14 = vadd.f32 %v3880_v52, %v3804_v12  ;;  %v3701_v62 = vpop.f32.mrf.mxu1  ;;  %v3946_v12 = vld [vmem:[#allocation4 + $0x13] sm:$0xff]  ;;  %v4013_v52 = vsel %vm4011_vm8, %v4012_v54, 0 }
 0x61d   : > { %v3714_v44 = vadd.f32 %v3701_v62, %v5971_v4  ;;  %v3923_v33 = vld [vmem:[#allocation4 + $0x29] sm:$0xff] }
 0x61e   : > { %3906 = vst.msk [vmem:[#allocation4 + $0x38] sm:$0xff] %vm3898_vm6, %v3895_v14  ;;  %v3915_v38 = vld [vmem:[#allocation4 + $0x30] sm:$0xff]  ;;  %v3932_v27 = vmax.f32 %v3914_v50, %v3923_v33  ;;  %v3930_v14 = vmax.f32 %v3912_v28, %v3921_v63 }
 0x61f   : > { %v3805_v48 = vadd.f32 %v3792_v16, %v3714_v44  ;;  %v3940_v56 = vld [vmem:[#allocation4 + $0x2a] sm:$0xff] }
 0x620   : > { %v3949_v21 = vld [vmem:[#allocation4 + $0x2b] sm:$0xff] }
 0x621   : > { %v3958_v43 = vmax.f32 %v3940_v56, %v3949_v21  ;;  %v3911_v16 = vld [vmem:[#allocation4 + $0x10] sm:$0xff] }
 0x622   : > { %v3794_v41 = vpop.f32.mrf.mxu2 }
 0x623   : > { %v3883_v13 = vpop.f32.mrf.mxu3  ;;  %v3967_v44 = vmax.f32 %v3931_v2, %v3958_v43 }
 0x624   : > { %v3896_v57 = vadd.f32 %v3883_v13, %v3805_v48  ;;  %v3703_v10 = vpop.f32.mrf.mxu1  ;;  %v3956_v48 = vmax.f32 %v3938_v32, %v3947_v24  ;;  %v3919_v13 = vld [vmem:[#allocation4 + $0x9] sm:$0xff] }
 0x625   : > { %v3715_v26 = vadd.f32 %v3703_v10, %v5974_v40  ;;  %v3924_v23 = vld [vmem:[#allocation4 + $0x31] sm:$0xff] }
 0x626   : > { %3907 = vst.msk [vmem:[#allocation4 + $0x40] sm:$0xff] %vm3898_vm6, %v3896_v57  ;;  %v3941_v3 = vld [vmem:[#allocation4 + $0x32] sm:$0xff]  ;;  %v3933_v17 = vmax.f32 %v3915_v38, %v3924_v23  ;;  %v3929_v57 = vmax.f32 %v3911_v16, %v3920_v31  ;;  %v3936_v10 = vld [vmem:[#allocation4 + $0xa] sm:$0xff]  ;;  %v3918_v23 = vld [vmem:[#allocation4 + $0x1] sm:$0xff] }
 0x627   : > { %v3806_v46 = vadd.f32 %v3794_v41, %v3715_v26  ;;  %v3950_v5 = vld [vmem:[#allocation4 + $0x33] sm:$0xff]  ;;  %v3945_v26 = vld [vmem:[#allocation4 + $0xb] sm:$0xff]  ;;  %v3955_v41 = vmax.f32 %v3937_v19, %v3946_v12 }
 0x628   : > { %v3916_v40 = vld [vmem:[#allocation4 + $0x38] sm:$0xff]  ;;  %v3959_v25 = vmax.f32 %v3941_v3, %v3950_v5  ;;  %v3965_v3 = vmax.f32 %v3929_v57, %v3956_v48  ;;  %v3909_v5 = vld [vmem:[#allocation4] sm:$0xff] }
 0x62a   : > { %v3968_v1 = vmax.f32 %v3932_v27, %v3959_v25  ;;  %v4561_v25 = vld [vmem:[%s6052_s6] sm:$0xff] }
 0x62b   : > { %v3885_v30 = vpop.f32.mrf.mxu3 }
 0x62c   : > { %v3897_v51 = vadd.f32 %v3885_v30, %v3806_v46 }
 0x62d   : > { %v3917_v55 = vld [vmem:[#allocation4 + $0x40] sm:$0x1f] }
 0x62e   : > { %3908 = vst.msk [vmem:[#allocation4 + $0x48] sm:$0xff] %vm3898_vm6, %v3897_v51  ;;  %v3926_v6 = vld [vmem:[#allocation4 + $0x41] sm:$0x1f]  ;;  %v3925_v45 = vld [vmem:[#allocation4 + $0x39] sm:$0xff]  ;;  %v3981_v51 = vadd.f32 %v5995_v0, %v3968_v1 }
 0x62f   : > { %v3942_v11 = vld [vmem:[#allocation4 + $0x3a] sm:$0xff]  ;;  %v3935_v15 = vmax.f32 %v3917_v55, %v3926_v6  ;;  %v3934_v61 = vmax.f32 %v3916_v40, %v3925_v45  ;;  %v3966_v55 = vmax.f32 %v3930_v14, %v3957_v29  ;;  %v3910_v6 = vld [vmem:[#allocation4 + $0x8] sm:$0xff]  ;;  %v3980_v45 = vadd.f32 %v5995_v0, %v3967_v44 }
 0x630   : > { %v3951_v4 = vld [vmem:[#allocation4 + $0x3b] sm:$0xff] }
 0x631   : > { %v3960_v9 = vmax.f32 %v3942_v11, %v3951_v4  ;;  %v3928_v11 = vmax.f32 %v3910_v6, %v3919_v13 }
 0x633   : > { %v3969_v42 = vmax.f32 %v3933_v17, %v3960_v9  ;;  %v3964_v40 = vmax.f32 %v3928_v11, %v3955_v41  ;;  %v3978_v9 = vadd.f32 %v5995_v0, %v3965_v3 }
 0x635   : > { %v3944_v8 = vld [vmem:[#allocation4 + $0x4a] sm:$0x1f]  ;;  %v3943_v18 = vld [vmem:[#allocation4 + $0x42] sm:$0xff]  ;;  %v3982_v62 = vadd.f32 %v5995_v0, %v3969_v42  ;;  %v3987_v56 = vmax.f32 %v3978_v9, 0.0 }
 0x636   : > { %v3953_v36 = vld [vmem:[#allocation4 + $0x4b] sm:$0x1f]  ;;  %v3952_v53 = vld [vmem:[#allocation4 + $0x43] sm:$0xff] }
 0x637   : > { %v3962_v39 = vmax.f32 %v3944_v8, %v3953_v36  ;;  %v3961_v35 = vmax.f32 %v3943_v18, %v3952_v53  ;;  %v3991_v4 = vmax.f32 %v3982_v62, 0.0  ;;  %v3954_v8 = vmax.f32 %v3936_v10, %v3945_v26 }
 0x638   : > { %v3927_v36 = vmax.f32 %v3909_v5, %v3918_v23  ;;  %v3989_v53 = vmax.f32 %v3980_v45, 0.0 }
 0x639   : > { %v3971_v37 = vmax.f32 %v3935_v15, %v3962_v39  ;;  %v3970_v22 = vmax.f32 %v3934_v61, %v3961_v35  ;;  %v3990_v15 = vmax.f32 %v3981_v51, 0.0  ;;  %v3979_v39 = vadd.f32 %v5995_v0, %v3966_v55 }
 0x63a   : > { %v3963_v33 = vmax.f32 %v3927_v36, %v3954_v8  ;;  %v3977_v35 = vadd.f32 %v5995_v0, %v3964_v40 }
 0x63b   : > { %v3984_v60 = vadd.f32 %v5995_v0, %v3971_v37  ;;  %v3983_v34 = vadd.f32 %v5995_v0, %v3970_v22  ;;  %v3996_v38 = vpack.c.bf16 %v3990_v15, %v3989_v53  ;;  %v3988_v61 = vmax.f32 %v3979_v39, 0.0 }
 0x63c   : > { %v3976_v21 = vadd.f32 %v5995_v0, %v3963_v33  ;;  %v3986_v17 = vmax.f32 %v3977_v35, 0.0 }
 0x63d   : > { %v3993_v20 = vmax.f32 %v3984_v60, 0.0  ;;  %v3992_v30 = vmax.f32 %v3983_v34, 0.0  ;;  %v3995_v37 = vpack.c.bf16 %v3988_v61, %v3987_v56 }
 0x63e   : > { %v3985_v50 = vmax.f32 %v3976_v21, 0.0 }
 0x63f   : > { %v3998_v49 = vpack.c.bf16 %v3993_v20, %v3993_v20  ;;  %v3997_v18 = vpack.c.bf16 %v3992_v30, %v3991_v4 }
 0x640   : > { %v3994_v58 = vpack.c.bf16 %v3986_v17, %v3985_v50 }
 0x641   : > { %v4015_v46 = vand.u32 %v4013_v52, %v3998_v49 }
 0x643   : > { %4020 = vmatpush.bf16.msrb.mxu0 %v4015_v46 }
 0x647   : > { %4021 = vmatpush.bf16.msrb.mxu0 %v3997_v18 }
 0x64b   : > { %4022 = vmatpush.bf16.msrb.mxu0 %v3996_v38 }
 0x64f   : > { %4023 = vmatpush.bf16.msrb.mxu0 %v3995_v37 }
 0x653   : > { %4024 = vmatpush.bf16.msrb.mxu0 %v3994_v58 }
 0x656   : > { %4519 = vmatmul.msk.bf16.vlgmr.msrb.gmra.mxu0 %vm4006_vm9, %v4561_v25 }
 0x6d3   : > { %v4026_v22 = vpop.f32.mrf.mxu0 }
 0x6d4   : > { %4031 = vst.msk [vmem:[%s271_s17] sm:$0xff] %vm3898_vm6, %v4026_v22 }
 0x6db   : > { %v4028_v0 = vpop.f32.mrf.mxu0 }
 0x6dc   : > { %4032 = vst.msk [vmem:[%s271_s17 + $0x8] sm:$0xff] %vm3898_vm6, %v4028_v0 }
 0x6dd   : > { %4635 = shalt.err (!%p4632_p3)
}
 0x6de   : > { %s4673_s14 = smov 128   ;;  %s4674_s17 = smov 8  }
 0x6df   : > { %4564 = dma.vmem_to_hbm [thread:$0]  (%p4753_p5), %s4047_s21, 256, %s4049_s22, %s4034_s23, %s4673_s14, %s4673_s14, %s4674_s17  }
 0x6e0 PF: > { %p4570_p4 = scmp.ge.s32.totalorder %s4670_s27, 2  ;;  %s4063_s18 = sand.u32 1, %s4658_s24  }
 0x6e1   : > { %s4064_s19 = scalar_lea.sflag [#allocation6], %s4063_s18 }
 0x6e2   : > { %p4567_p7 = pnand %p4570_p4, %p4757_p6 }
 0x6e4   : > { %p4568_p8 = pneg %p4567_p7 }
 0x6e6   : > { %4653 = dma.done.wait (%p4568_p8), %s4064_s19, 256  }
 0x6e7   : > { %4655 = vsyncadd (%p4568_p8), %s4064_s19, 4294967040  ;;  %p17_p9 = scmp.ge.s32.totalorder %s4740_s30, 4   ;;  %s6056_s24 = smov %s4662_s25 }
 0x6e8   : > { %s6057_s25 = smov %s4666_s26  ;;  %s6058_s26 = smov %s4751_s10 }
 0x6e9   : > { %s6059_s27 = smov %s4740_s30  ;;  %19 = sbr.rel (!%p17_p9) target bundleno = 3 (0x3), region = 99 }
 0x6ee   :  { %4070 = vsyncpa [#allocation6], 1 }
 0x6ef   :  { %4072 = vsyncpa [#allocation6 + $0x1], 1 }

</bundles_post_ra>
